<compile_context>
chip_gen: v7x
topology: tpu7x:2x2x1
jax: 0.10.0
libtpu: 0.0.40
codegen_flags: <defaults>
</compile_context>

<pallas_src>
import jax
import jax.numpy as jnp
from jax.experimental import pallas as pl
from jax.experimental.pallas import tpu as pltpu


_NEG = -3.0e38        # plain Python float -> jaxpr literal (no captured const)
_W_OFF = 8            # interior column offset in the W-pool scratch (aligned)


def _silu(y):
    # y * sigmoid(y); exp goes to the EUP, divide lowers to reciprocal+mul.
    return y * (1.0 / (1.0 + jnp.exp(-y)))


# ---------------------------------------------------------------------------
# Fused SPPF kernel: cv1 (1x1+BN+SiLU) -> 3 chained 5x5/s1/p2 max pools ->
# cv2 (1x1+BN+SiLU) with the channel concat folded into 4 accumulated matmuls.
# One grid step == one batch element; everything stays in VMEM.
# ---------------------------------------------------------------------------
def _sppf_kernel(x_ref, w1_ref, s1_ref, b1_ref, w2_ref, s2_ref, b2_ref,
                 o_ref, padw_sc, padh_sc):
    # x_ref  : (H*W, Cin)    bf16   channels-last, lane-dense
    # w1_ref : (Cin, Hd)     bf16   cv1 1x1 weight
    # s1/b1  : (1, Hd)       f32    folded eval-mode BN scale / shift for cv1
    # w2_ref : (4, Hd, Cout) bf16   cv2 1x1 weight split into 4 concat groups
    # s2/b2  : (1, Cout)     f32    folded BN for cv2
    # o_ref  : (H*W, Cout)   f32
    # padw_sc: (H, W+10, Hd) f32    W-pool scratch, interior at cols [8:8+W]
    # padh_sc: (H+4, W, Hd)  f32    H-pool scratch, interior at rows [2:2+H]
    hp4, W, hd = padh_sc.shape
    H = hp4 - 4
    HW = o_ref.shape[0]

    # Border init: only the 2 pad columns / rows on each side that the pooling
    # actually reads.  Cheap (O(H*2*Hd + 2*W*Hd)) and megacore-safe because it
    # runs every grid step.
    padw_sc[:, _W_OFF - 2:_W_OFF, :] = jnp.full((H, 2, hd), _NEG, jnp.float32)
    padw_sc[:, _W_OFF + W:_W_OFF + W + 2, :] = jnp.full((H, 2, hd), _NEG,
                                                        jnp.float32)
    padh_sc[0:2, :, :] = jnp.full((2, W, hd), _NEG, jnp.float32)
    padh_sc[2 + H:, :, :] = jnp.full((2, W, hd), _NEG, jnp.float32)

    # cv1: (HW, Cin) @ (Cin, Hd) on the MXU, bf16 operands, f32 accumulation,
    # fused BN + SiLU.
    a = jnp.dot(x_ref[...], w1_ref[...], preferred_element_type=jnp.float32)
    a = _silu(a * s1_ref[...] + b1_ref[...])

    # cv2 accumulator; concat group 0 is the cv1 output itself.
    acc = jnp.dot(a.astype(jnp.bfloat16), w2_ref[0],
                  preferred_element_type=jnp.float32)

    cur = a.reshape(H, W, hd)          # layout no-op when W % 8 == 0
    for level in range(1, 4):
        # Separable 5x5 max pool, stride 1, pad 2 (PyTorch MaxPool2d semantics:
        # padding acts as -inf and never wins, every window holds a real value).
        # ---- 5 taps along W (sublane axis): balanced max tree, center tap
        #      reuses `cur` which is already in registers.
        padw_sc[:, _W_OFF:_W_OFF + W, :] = cur        # sublane-aligned store
        m = jnp.maximum(
            jnp.maximum(
                jnp.maximum(padw_sc[:, _W_OFF - 2:_W_OFF - 2 + W, :],
                            padw_sc[:, _W_OFF - 1:_W_OFF - 1 + W, :]),
                jnp.maximum(padw_sc[:, _W_OFF + 1:_W_OFF + 1 + W, :],
                            padw_sc[:, _W_OFF + 2:_W_OFF + 2 + W, :])),
            cur)
        # ---- 5 taps along H (leading axis: shifted reads are just base-address
        #      changes, free).
        padh_sc[2:2 + H, :, :] = m
        cur = jnp.maximum(
            jnp.maximum(
                jnp.maximum(padh_sc[0:H, :, :], padh_sc[1:1 + H, :, :]),
                jnp.maximum(padh_sc[3:3 + H, :, :], padh_sc[4:4 + H, :, :])),
            m)
        # cv2 group `level` (pooled activations), bf16 into the MXU, f32 acc.
        acc = acc + jnp.dot(cur.reshape(HW, hd).astype(jnp.bfloat16),
                            w2_ref[level], preferred_element_type=jnp.float32)

    y = _silu(acc * s2_ref[...] + b2_ref[...])
    o_ref[...] = y.astype(o_ref.dtype)


# ---------------------------------------------------------------------------
# Wrapper calling pallas_call
# ---------------------------------------------------------------------------
def sppf_forward(x_nchw, params):
    """SPPF forward.  x_nchw: (N, Cin, H, W) f32 -> (N, Cout, H, W) f32."""
    N, cin, H, W = x_nchw.shape
    hd = params["cv1"]["w"].shape[-1]
    cout = params["cv2"]["w"].shape[-1]
    HW = H * W
    wp = W + _W_OFF + 2          # W-pool scratch width

    # NCHW -> (N, H*W, C) lane-dense 2-D tiles, bf16 MXU operands. One fused
    # transpose+convert per boundary.
    # TODO(synk): drop these boundary transposes if the surrounding model can
    #             stay channels-last.
    x2d = jnp.transpose(x_nchw.reshape(N, cin, HW), (0, 2, 1)).astype(jnp.bfloat16)
    w1 = params["cv1"]["w"].astype(jnp.bfloat16)
    w2 = params["cv2"]["w"].reshape(4, hd, cout).astype(jnp.bfloat16)
    s1, b1 = params["cv1"]["scale"], params["cv1"]["shift"]
    s2, b2 = params["cv2"]["scale"], params["cv2"]["shift"]

    # Explicit scoped-VMEM budget from the actual footprint (with headroom).
    scratch_bytes = (H * wp * hd + (H + 4) * W * hd) * 4
    block_bytes = 2 * HW * cin * 2 + 2 * HW * cout * 4      # double-buffered I/O
    weight_bytes = (cin * hd + 4 * hd * cout) * 2 + 4 * (hd + cout) * 4
    temp_bytes = HW * hd * 4 * 6 + HW * cout * 4 * 2        # a/cur/pool temps, acc
    vmem_limit = int(min(max(2 * (scratch_bytes + block_bytes + weight_bytes
                                  + temp_bytes), 32 * 2**20), 100 * 2**20))

    out2d = pl.pallas_call(
        _sppf_kernel,
        out_shape=jax.ShapeDtypeStruct((N, HW, cout), jnp.float32),
        grid_spec=pltpu.PrefetchScalarGridSpec(
            num_scalar_prefetch=0,
            grid=(N,),
            in_specs=[
                pl.BlockSpec((None, HW, cin), lambda n: (n, 0, 0)),   # x
                pl.BlockSpec((cin, hd), lambda n: (0, 0)),            # w1
                pl.BlockSpec((1, hd), lambda n: (0, 0)),              # s1
                pl.BlockSpec((1, hd), lambda n: (0, 0)),              # b1
                pl.BlockSpec((4, hd, cout), lambda n: (0, 0, 0)),     # w2 groups
                pl.BlockSpec((1, cout), lambda n: (0, 0)),            # s2
                pl.BlockSpec((1, cout), lambda n: (0, 0)),            # b2
            ],
            out_specs=pl.BlockSpec((None, HW, cout), lambda n: (n, 0, 0)),
            scratch_shapes=[
                pltpu.VMEM((H, wp, hd), jnp.float32),      # W-pool pad scratch
                pltpu.VMEM((H + 4, W, hd), jnp.float32),   # H-pool pad scratch
            ],
        ),
        compiler_params=pltpu.CompilerParams(
            dimension_semantics=("parallel",),
            vmem_limit_bytes=vmem_limit),
    )(x2d, w1, s1, b1, w2, s2, b2)

    return jnp.transpose(out2d, (0, 2, 1)).reshape(N, cout, H, W)


# ---------------------------------------------------------------------------
# Deterministic parameter init (Conv2d weight + folded eval-mode BatchNorm)
# ---------------------------------------------------------------------------
def _make_conv_params(key, cin, cout):
    kw, kg, kb, km, kv = jax.random.split(key, 5)
    w = 0.1 * jax.random.normal(kw, (cin, cout), jnp.float32)     # 1x1 conv
    gamma = 1.0 + 0.1 * jax.random.normal(kg, (cout,), jnp.float32)
    beta = 0.1 * jax.random.normal(kb, (cout,), jnp.float32)
    mean = 0.1 * jax.random.normal(km, (cout,), jnp.float32)
    var = jnp.abs(jax.random.normal(kv, (cout,), jnp.float32)) + 0.5
    eps = 1e-5
    scale = gamma / jnp.sqrt(var + eps)
    shift = beta - mean * scale
    return {"w": w, "scale": scale.reshape(1, cout),
            "shift": shift.reshape(1, cout)}


def make_sppf_params(key, in_channel, out_channel):
    hidden = in_channel // 2
    k1, k2 = jax.random.split(key)
    return {"cv1": _make_conv_params(k1, in_channel, hidden),
            "cv2": _make_conv_params(k2, 4 * hidden, out_channel)}


# ---------------------------------------------------------------------------
# Pure-JAX reference (numeric sanity check against the Pallas path)
# ---------------------------------------------------------------------------
def _maxpool5_ref(x_nhwc):
    return jax.lax.reduce_window(
        x_nhwc, -jnp.inf, jax.lax.max,
        window_dimensions=(1, 5, 5, 1), window_strides=(1, 1, 1, 1),
        padding=((0, 0), (2, 2), (2, 2), (0, 0)))


def _ref_conv1x1(x_nhwc, p):
    z = jnp.einsum("nhwc,co->nhwo", x_nhwc, p["w"])
    z = z * p["scale"].reshape(1, 1, 1, -1) + p["shift"].reshape(1, 1, 1, -1)
    return z * jax.nn.sigmoid(z)


def sppf_reference(x_nchw, params):
    x = jnp.transpose(x_nchw, (0, 2, 3, 1))
    a = _ref_conv1x1(x, params["cv1"])
    y1 = _maxpool5_ref(a)
    y2 = _maxpool5_ref(y1)
    y3 = _maxpool5_ref(y2)
    out = _ref_conv1x1(jnp.concatenate([a, y1, y2, y3], axis=-1),
                       params["cv2"])
    return jnp.transpose(out, (0, 3, 1, 2))


if __name__ == "__main__":
    key = jax.random.PRNGKey(0)
    k_x, k_p = jax.random.split(key)

    # Small test config (hidden = 4).  Note: production SPPF shapes have
    # hd/cout >= 128 which keeps the lanes and the MXU busy.
    N, C_IN, C_OUT, H, W = 2, 8, 8, 16, 16
    x = jax.random.normal(k_x, (N, C_IN, H, W), jnp.float32)
    params = make_sppf_params(k_p, C_IN, C_OUT)

    out = jax.block_until_ready(jax.jit(sppf_forward)(x, params))
    ref = jax.block_until_ready(sppf_reference(x, params))

    assert out.shape == (N, C_OUT, H, W)
    # bf16 MXU operands -> loosened tolerance vs. the f32 reference.
    max_err = float(jnp.max(jnp.abs(out - ref)))
    assert jnp.allclose(out, ref, atol=2e-2, rtol=2e-2), (
        f"mismatch vs reference (max abs err {max_err})")
    print("KERNEL_OK")
</pallas_src>

<mosaic_0001>
module attributes {stable_mosaic.version = 11 : i64} {
  func.func @_sppf_kernel(%arg0: i32, %arg1: memref<1x256x8xbf16, #tpu.memory_space<vmem>>, %arg2: memref<8x4xbf16, #tpu.memory_space<vmem>>, %arg3: memref<1x4xf32, #tpu.memory_space<vmem>>, %arg4: memref<1x4xf32, #tpu.memory_space<vmem>>, %arg5: memref<4x4x8xbf16, #tpu.memory_space<vmem>>, %arg6: memref<1x8xf32, #tpu.memory_space<vmem>>, %arg7: memref<1x8xf32, #tpu.memory_space<vmem>>, %arg8: memref<1x256x8xf32, #tpu.memory_space<vmem>>, %arg9: memref<16x26x4xf32, #tpu.memory_space<vmem>>, %arg10: memref<20x16x4xf32, #tpu.memory_space<vmem>>) attributes {dimension_semantics = [#tpu.dimension_semantics<parallel>], iteration_bounds = array<i64: 2>, scalar_prefetch = 0 : i64, scratch_operands = 2 : i64, tpu.core_type = #tpu.core_type<tc>, window_params = [{transform_indices = @transform_0, window_bounds = array<i64: 1, 256, 8>}, {pipeline_mode = #tpu.pipeline_mode<synchronous>, transform_indices = @transform_1, window_bounds = array<i64: 8, 4>}, {pipeline_mode = #tpu.pipeline_mode<synchronous>, transform_indices = @transform_2, window_bounds = array<i64: 1, 4>}, {pipeline_mode = #tpu.pipeline_mode<synchronous>, transform_indices = @transform_3, window_bounds = array<i64: 1, 4>}, {pipeline_mode = #tpu.pipeline_mode<synchronous>, transform_indices = @transform_4, window_bounds = array<i64: 4, 4, 8>}, {pipeline_mode = #tpu.pipeline_mode<synchronous>, transform_indices = @transform_5, window_bounds = array<i64: 1, 8>}, {pipeline_mode = #tpu.pipeline_mode<synchronous>, transform_indices = @transform_6, window_bounds = array<i64: 1, 8>}, {transform_indices = @transform_7, window_bounds = array<i64: 1, 256, 8>}]} {
    %cst = arith.constant -3.000000e+38 : f32
    %0 = vector.broadcast %cst : f32 to vector<16x2x4xf32>
    %c0 = arith.constant 0 : index
    %c6 = arith.constant 6 : index
    %c0_0 = arith.constant 0 : index
    %1 = vector.load %arg9[%c0, %c6, %c0_0] : memref<16x26x4xf32, #tpu.memory_space<vmem>>, vector<16x2x4xf32>
    tpu.vector_store %arg9[%c0, %c6, %c0_0], %0 {strides = array<i32>} : memref<16x26x4xf32, #tpu.memory_space<vmem>>, vector<16x2x4xf32>,
    %cst_1 = arith.constant -3.000000e+38 : f32
    %2 = vector.broadcast %cst_1 : f32 to vector<16x2x4xf32>
    %c0_2 = arith.constant 0 : index
    %c24 = arith.constant 24 : index
    %c0_3 = arith.constant 0 : index
    %3 = vector.load %arg9[%c0_2, %c24, %c0_3] : memref<16x26x4xf32, #tpu.memory_space<vmem>>, vector<16x2x4xf32>
    tpu.vector_store %arg9[%c0_2, %c24, %c0_3], %2 {strides = array<i32>} : memref<16x26x4xf32, #tpu.memory_space<vmem>>, vector<16x2x4xf32>,
    %cst_4 = arith.constant -3.000000e+38 : f32
    %4 = vector.broadcast %cst_4 : f32 to vector<2x16x4xf32>
    %c0_5 = arith.constant 0 : index
    %c0_6 = arith.constant 0 : index
    %c0_7 = arith.constant 0 : index
    %5 = vector.load %arg10[%c0_5, %c0_6, %c0_7] : memref<20x16x4xf32, #tpu.memory_space<vmem>>, vector<2x16x4xf32>
    tpu.vector_store %arg10[%c0_5, %c0_6, %c0_7], %4 {strides = array<i32>} : memref<20x16x4xf32, #tpu.memory_space<vmem>>, vector<2x16x4xf32>,
    %cst_8 = arith.constant -3.000000e+38 : f32
    %6 = vector.broadcast %cst_8 : f32 to vector<2x16x4xf32>
    %c18 = arith.constant 18 : index
    %c0_9 = arith.constant 0 : index
    %c0_10 = arith.constant 0 : index
    %7 = vector.load %arg10[%c18, %c0_9, %c0_10] : memref<20x16x4xf32, #tpu.memory_space<vmem>>, vector<2x16x4xf32>
    tpu.vector_store %arg10[%c18, %c0_9, %c0_10], %6 {strides = array<i32>} : memref<20x16x4xf32, #tpu.memory_space<vmem>>, vector<2x16x4xf32>,
    %c0_11 = arith.constant 0 : index
    %c0_12 = arith.constant 0 : index
    %c0_13 = arith.constant 0 : index
    %8 = vector.load %arg1[%c0_11, %c0_12, %c0_13] : memref<1x256x8xbf16, #tpu.memory_space<vmem>>, vector<1x256x8xbf16>
    %9 = vector.shape_cast %8 : vector<1x256x8xbf16> to vector<256x8xbf16>
    %c0_14 = arith.constant 0 : index
    %c0_15 = arith.constant 0 : index
    %10 = vector.load %arg2[%c0_14, %c0_15] : memref<8x4xbf16, #tpu.memory_space<vmem>>, vector<8x4xbf16>
    %cst_16 = arith.constant dense<0.000000e+00> : vector<256x4xf32>
    %11 = tpu.matmul %9, %10, %cst_16 {dimension_numbers = #tpu.dot_dimension_numbers<[1], [0], [0], [1], [0, 0, 1, 1], [], []>} : vector<256x8xbf16>, vector<8x4xbf16>, vector<256x4xf32> -> vector<256x4xf32>
    %c0_17 = arith.constant 0 : index
    %c0_18 = arith.constant 0 : index
    %12 = vector.load %arg3[%c0_17, %c0_18] : memref<1x4xf32, #tpu.memory_space<vmem>>, vector<1x4xf32>
    %13 = vector.broadcast %12 : vector<1x4xf32> to vector<256x4xf32>
    %14 = arith.mulf %11, %13 : vector<256x4xf32>
    %c0_19 = arith.constant 0 : index
    %c0_20 = arith.constant 0 : index
    %15 = vector.load %arg4[%c0_19, %c0_20] : memref<1x4xf32, #tpu.memory_space<vmem>>, vector<1x4xf32>
    %16 = vector.broadcast %15 : vector<1x4xf32> to vector<256x4xf32>
    %17 = arith.addf %14, %16 : vector<256x4xf32>
    %cst_21 = arith.constant 0.000000e+00 : f32
    %18 = vector.broadcast %cst_21 : f32 to vector<256x4xf32>
    %19 = arith.subf %18, %17 : vector<256x4xf32>
    %20 = math.exp %19 : vector<256x4xf32>
    %cst_22 = arith.constant 1.000000e+00 : f32
    %21 = vector.broadcast %cst_22 : f32 to vector<256x4xf32>
    %22 = arith.addf %21, %20 : vector<256x4xf32>
    %cst_23 = arith.constant 1.000000e+00 : f32
    %23 = vector.broadcast %cst_23 : f32 to vector<256x4xf32>
    %24 = arith.divf %23, %22 : vector<256x4xf32>
    %25 = arith.mulf %17, %24 : vector<256x4xf32>
    %26 = arith.truncf %25 : vector<256x4xf32> to vector<256x4xbf16>
    %c0_24 = arith.constant 0 : index
    %c0_25 = arith.constant 0 : index
    %c0_26 = arith.constant 0 : index
    %27 = vector.load %arg5[%c0_24, %c0_25, %c0_26] : memref<4x4x8xbf16, #tpu.memory_space<vmem>>, vector<1x4x8xbf16>
    %28 = vector.shape_cast %27 : vector<1x4x8xbf16> to vector<4x8xbf16>
    %cst_27 = arith.constant dense<0.000000e+00> : vector<256x8xf32>
    %29 = tpu.matmul %26, %28, %cst_27 {dimension_numbers = #tpu.dot_dimension_numbers<[1], [0], [0], [1], [0, 0, 1, 1], [], []>} : vector<256x4xbf16>, vector<4x8xbf16>, vector<256x8xf32> -> vector<256x8xf32>
    %30 = vector.shape_cast %25 : vector<256x4xf32> to vector<16x16x4xf32>
    %c0_28 = arith.constant 0 : index
    %c8 = arith.constant 8 : index
    %c0_29 = arith.constant 0 : index
    %31 = vector.load %arg9[%c0_28, %c8, %c0_29] : memref<16x26x4xf32, #tpu.memory_space<vmem>>, vector<16x16x4xf32>
    tpu.vector_store %arg9[%c0_28, %c8, %c0_29], %30 {strides = array<i32>} : memref<16x26x4xf32, #tpu.memory_space<vmem>>, vector<16x16x4xf32>,
    %c0_30 = arith.constant 0 : index
    %c6_31 = arith.constant 6 : index
    %c0_32 = arith.constant 0 : index
    %32 = vector.load %arg9[%c0_30, %c6_31, %c0_32] : memref<16x26x4xf32, #tpu.memory_space<vmem>>, vector<16x16x4xf32>
    %c0_33 = arith.constant 0 : index
    %c7 = arith.constant 7 : index
    %c0_34 = arith.constant 0 : index
    %33 = vector.load %arg9[%c0_33, %c7, %c0_34] : memref<16x26x4xf32, #tpu.memory_space<vmem>>, vector<16x16x4xf32>
    %34 = arith.maximumf %32, %33 : vector<16x16x4xf32>
    %c0_35 = arith.constant 0 : index
    %c9 = arith.constant 9 : index
    %c0_36 = arith.constant 0 : index
    %35 = vector.load %arg9[%c0_35, %c9, %c0_36] : memref<16x26x4xf32, #tpu.memory_space<vmem>>, vector<16x16x4xf32>
    %c0_37 = arith.constant 0 : index
    %c10 = arith.constant 10 : index
    %c0_38 = arith.constant 0 : index
    %36 = vector.load %arg9[%c0_37, %c10, %c0_38] : memref<16x26x4xf32, #tpu.memory_space<vmem>>, vector<16x16x4xf32>
    %37 = arith.maximumf %35, %36 : vector<16x16x4xf32>
    %38 = arith.maximumf %34, %37 : vector<16x16x4xf32>
    %39 = arith.maximumf %38, %30 : vector<16x16x4xf32>
    %c2 = arith.constant 2 : index
    %c0_39 = arith.constant 0 : index
    %c0_40 = arith.constant 0 : index
    %40 = vector.load %arg10[%c2, %c0_39, %c0_40] : memref<20x16x4xf32, #tpu.memory_space<vmem>>, vector<16x16x4xf32>
    tpu.vector_store %arg10[%c2, %c0_39, %c0_40], %39 {strides = array<i32>} : memref<20x16x4xf32, #tpu.memory_space<vmem>>, vector<16x16x4xf32>,
    %c0_41 = arith.constant 0 : index
    %c0_42 = arith.constant 0 : index
    %c0_43 = arith.constant 0 : index
    %41 = vector.load %arg10[%c0_41, %c0_42, %c0_43] : memref<20x16x4xf32, #tpu.memory_space<vmem>>, vector<16x16x4xf32>
    %c1 = arith.constant 1 : index
    %c0_44 = arith.constant 0 : index
    %c0_45 = arith.constant 0 : index
    %42 = vector.load %arg10[%c1, %c0_44, %c0_45] : memref<20x16x4xf32, #tpu.memory_space<vmem>>, vector<16x16x4xf32>
    %43 = arith.maximumf %41, %42 : vector<16x16x4xf32>
    %c3 = arith.constant 3 : index
    %c0_46 = arith.constant 0 : index
    %c0_47 = arith.constant 0 : index
    %44 = vector.load %arg10[%c3, %c0_46, %c0_47] : memref<20x16x4xf32, #tpu.memory_space<vmem>>, vector<16x16x4xf32>
    %c4 = arith.constant 4 : index
    %c0_48 = arith.constant 0 : index
    %c0_49 = arith.constant 0 : index
    %45 = vector.load %arg10[%c4, %c0_48, %c0_49] : memref<20x16x4xf32, #tpu.memory_space<vmem>>, vector<16x16x4xf32>
    %46 = arith.maximumf %44, %45 : vector<16x16x4xf32>
    %47 = arith.maximumf %43, %46 : vector<16x16x4xf32>
    %48 = arith.maximumf %47, %39 : vector<16x16x4xf32>
    %49 = vector.shape_cast %48 : vector<16x16x4xf32> to vector<256x4xf32>
    %50 = arith.truncf %49 : vector<256x4xf32> to vector<256x4xbf16>
    %c1_50 = arith.constant 1 : index
    %c0_51 = arith.constant 0 : index
    %c0_52 = arith.constant 0 : index
    %51 = vector.load %arg5[%c1_50, %c0_51, %c0_52] : memref<4x4x8xbf16, #tpu.memory_space<vmem>>, vector<1x4x8xbf16>
    %52 = vector.shape_cast %51 : vector<1x4x8xbf16> to vector<4x8xbf16>
    %cst_53 = arith.constant dense<0.000000e+00> : vector<256x8xf32>
    %53 = tpu.matmul %50, %52, %cst_53 {dimension_numbers = #tpu.dot_dimension_numbers<[1], [0], [0], [1], [0, 0, 1, 1], [], []>} : vector<256x4xbf16>, vector<4x8xbf16>, vector<256x8xf32> -> vector<256x8xf32>
    %54 = arith.addf %29, %53 : vector<256x8xf32>
    %c0_54 = arith.constant 0 : index
    %c8_55 = arith.constant 8 : index
    %c0_56 = arith.constant 0 : index
    %55 = vector.load %arg9[%c0_54, %c8_55, %c0_56] : memref<16x26x4xf32, #tpu.memory_space<vmem>>, vector<16x16x4xf32>
    tpu.vector_store %arg9[%c0_54, %c8_55, %c0_56], %48 {strides = array<i32>} : memref<16x26x4xf32, #tpu.memory_space<vmem>>, vector<16x16x4xf32>,
    %c0_57 = arith.constant 0 : index
    %c6_58 = arith.constant 6 : index
    %c0_59 = arith.constant 0 : index
    %56 = vector.load %arg9[%c0_57, %c6_58, %c0_59] : memref<16x26x4xf32, #tpu.memory_space<vmem>>, vector<16x16x4xf32>
    %c0_60 = arith.constant 0 : index
    %c7_61 = arith.constant 7 : index
    %c0_62 = arith.constant 0 : index
    %57 = vector.load %arg9[%c0_60, %c7_61, %c0_62] : memref<16x26x4xf32, #tpu.memory_space<vmem>>, vector<16x16x4xf32>
    %58 = arith.maximumf %56, %57 : vector<16x16x4xf32>
    %c0_63 = arith.constant 0 : index
    %c9_64 = arith.constant 9 : index
    %c0_65 = arith.constant 0 : index
    %59 = vector.load %arg9[%c0_63, %c9_64, %c0_65] : memref<16x26x4xf32, #tpu.memory_space<vmem>>, vector<16x16x4xf32>
    %c0_66 = arith.constant 0 : index
    %c10_67 = arith.constant 10 : index
    %c0_68 = arith.constant 0 : index
    %60 = vector.load %arg9[%c0_66, %c10_67, %c0_68] : memref<16x26x4xf32, #tpu.memory_space<vmem>>, vector<16x16x4xf32>
    %61 = arith.maximumf %59, %60 : vector<16x16x4xf32>
    %62 = arith.maximumf %58, %61 : vector<16x16x4xf32>
    %63 = arith.maximumf %62, %48 : vector<16x16x4xf32>
    %c2_69 = arith.constant 2 : index
    %c0_70 = arith.constant 0 : index
    %c0_71 = arith.constant 0 : index
    %64 = vector.load %arg10[%c2_69, %c0_70, %c0_71] : memref<20x16x4xf32, #tpu.memory_space<vmem>>, vector<16x16x4xf32>
    tpu.vector_store %arg10[%c2_69, %c0_70, %c0_71], %63 {strides = array<i32>} : memref<20x16x4xf32, #tpu.memory_space<vmem>>, vector<16x16x4xf32>,
    %c0_72 = arith.constant 0 : index
    %c0_73 = arith.constant 0 : index
    %c0_74 = arith.constant 0 : index
    %65 = vector.load %arg10[%c0_72, %c0_73, %c0_74] : memref<20x16x4xf32, #tpu.memory_space<vmem>>, vector<16x16x4xf32>
    %c1_75 = arith.constant 1 : index
    %c0_76 = arith.constant 0 : index
    %c0_77 = arith.constant 0 : index
    %66 = vector.load %arg10[%c1_75, %c0_76, %c0_77] : memref<20x16x4xf32, #tpu.memory_space<vmem>>, vector<16x16x4xf32>
    %67 = arith.maximumf %65, %66 : vector<16x16x4xf32>
    %c3_78 = arith.constant 3 : index
    %c0_79 = arith.constant 0 : index
    %c0_80 = arith.constant 0 : index
    %68 = vector.load %arg10[%c3_78, %c0_79, %c0_80] : memref<20x16x4xf32, #tpu.memory_space<vmem>>, vector<16x16x4xf32>
    %c4_81 = arith.constant 4 : index
    %c0_82 = arith.constant 0 : index
    %c0_83 = arith.constant 0 : index
    %69 = vector.load %arg10[%c4_81, %c0_82, %c0_83] : memref<20x16x4xf32, #tpu.memory_space<vmem>>, vector<16x16x4xf32>
    %70 = arith.maximumf %68, %69 : vector<16x16x4xf32>
    %71 = arith.maximumf %67, %70 : vector<16x16x4xf32>
    %72 = arith.maximumf %71, %63 : vector<16x16x4xf32>
    %73 = vector.shape_cast %72 : vector<16x16x4xf32> to vector<256x4xf32>
    %74 = arith.truncf %73 : vector<256x4xf32> to vector<256x4xbf16>
    %c2_84 = arith.constant 2 : index
    %c0_85 = arith.constant 0 : index
    %c0_86 = arith.constant 0 : index
    %75 = vector.load %arg5[%c2_84, %c0_85, %c0_86] : memref<4x4x8xbf16, #tpu.memory_space<vmem>>, vector<1x4x8xbf16>
    %76 = vector.shape_cast %75 : vector<1x4x8xbf16> to vector<4x8xbf16>
    %cst_87 = arith.constant dense<0.000000e+00> : vector<256x8xf32>
    %77 = tpu.matmul %74, %76, %cst_87 {dimension_numbers = #tpu.dot_dimension_numbers<[1], [0], [0], [1], [0, 0, 1, 1], [], []>} : vector<256x4xbf16>, vector<4x8xbf16>, vector<256x8xf32> -> vector<256x8xf32>
    %78 = arith.addf %54, %77 : vector<256x8xf32>
    %c0_88 = arith.constant 0 : index
    %c8_89 = arith.constant 8 : index
    %c0_90 = arith.constant 0 : index
    %79 = vector.load %arg9[%c0_88, %c8_89, %c0_90] : memref<16x26x4xf32, #tpu.memory_space<vmem>>, vector<16x16x4xf32>
    tpu.vector_store %arg9[%c0_88, %c8_89, %c0_90], %72 {strides = array<i32>} : memref<16x26x4xf32, #tpu.memory_space<vmem>>, vector<16x16x4xf32>,
    %c0_91 = arith.constant 0 : index
    %c6_92 = arith.constant 6 : index
    %c0_93 = arith.constant 0 : index
    %80 = vector.load %arg9[%c0_91, %c6_92, %c0_93] : memref<16x26x4xf32, #tpu.memory_space<vmem>>, vector<16x16x4xf32>
    %c0_94 = arith.constant 0 : index
    %c7_95 = arith.constant 7 : index
    %c0_96 = arith.constant 0 : index
    %81 = vector.load %arg9[%c0_94, %c7_95, %c0_96] : memref<16x26x4xf32, #tpu.memory_space<vmem>>, vector<16x16x4xf32>
    %82 = arith.maximumf %80, %81 : vector<16x16x4xf32>
    %c0_97 = arith.constant 0 : index
    %c9_98 = arith.constant 9 : index
    %c0_99 = arith.constant 0 : index
    %83 = vector.load %arg9[%c0_97, %c9_98, %c0_99] : memref<16x26x4xf32, #tpu.memory_space<vmem>>, vector<16x16x4xf32>
    %c0_100 = arith.constant 0 : index
    %c10_101 = arith.constant 10 : index
    %c0_102 = arith.constant 0 : index
    %84 = vector.load %arg9[%c0_100, %c10_101, %c0_102] : memref<16x26x4xf32, #tpu.memory_space<vmem>>, vector<16x16x4xf32>
    %85 = arith.maximumf %83, %84 : vector<16x16x4xf32>
    %86 = arith.maximumf %82, %85 : vector<16x16x4xf32>
    %87 = arith.maximumf %86, %72 : vector<16x16x4xf32>
    %c2_103 = arith.constant 2 : index
    %c0_104 = arith.constant 0 : index
    %c0_105 = arith.constant 0 : index
    %88 = vector.load %arg10[%c2_103, %c0_104, %c0_105] : memref<20x16x4xf32, #tpu.memory_space<vmem>>, vector<16x16x4xf32>
    tpu.vector_store %arg10[%c2_103, %c0_104, %c0_105], %87 {strides = array<i32>} : memref<20x16x4xf32, #tpu.memory_space<vmem>>, vector<16x16x4xf32>,
    %c0_106 = arith.constant 0 : index
    %c0_107 = arith.constant 0 : index
    %c0_108 = arith.constant 0 : index
    %89 = vector.load %arg10[%c0_106, %c0_107, %c0_108] : memref<20x16x4xf32, #tpu.memory_space<vmem>>, vector<16x16x4xf32>
    %c1_109 = arith.constant 1 : index
    %c0_110 = arith.constant 0 : index
    %c0_111 = arith.constant 0 : index
    %90 = vector.load %arg10[%c1_109, %c0_110, %c0_111] : memref<20x16x4xf32, #tpu.memory_space<vmem>>, vector<16x16x4xf32>
    %91 = arith.maximumf %89, %90 : vector<16x16x4xf32>
    %c3_112 = arith.constant 3 : index
    %c0_113 = arith.constant 0 : index
    %c0_114 = arith.constant 0 : index
    %92 = vector.load %arg10[%c3_112, %c0_113, %c0_114] : memref<20x16x4xf32, #tpu.memory_space<vmem>>, vector<16x16x4xf32>
    %c4_115 = arith.constant 4 : index
    %c0_116 = arith.constant 0 : index
    %c0_117 = arith.constant 0 : index
    %93 = vector.load %arg10[%c4_115, %c0_116, %c0_117] : memref<20x16x4xf32, #tpu.memory_space<vmem>>, vector<16x16x4xf32>
    %94 = arith.maximumf %92, %93 : vector<16x16x4xf32>
    %95 = arith.maximumf %91, %94 : vector<16x16x4xf32>
    %96 = arith.maximumf %95, %87 : vector<16x16x4xf32>
    %97 = vector.shape_cast %96 : vector<16x16x4xf32> to vector<256x4xf32>
    %98 = arith.truncf %97 : vector<256x4xf32> to vector<256x4xbf16>
    %c3_118 = arith.constant 3 : index
    %c0_119 = arith.constant 0 : index
    %c0_120 = arith.constant 0 : index
    %99 = vector.load %arg5[%c3_118, %c0_119, %c0_120] : memref<4x4x8xbf16, #tpu.memory_space<vmem>>, vector<1x4x8xbf16>
    %100 = vector.shape_cast %99 : vector<1x4x8xbf16> to vector<4x8xbf16>
    %cst_121 = arith.constant dense<0.000000e+00> : vector<256x8xf32>
    %101 = tpu.matmul %98, %100, %cst_121 {dimension_numbers = #tpu.dot_dimension_numbers<[1], [0], [0], [1], [0, 0, 1, 1], [], []>} : vector<256x4xbf16>, vector<4x8xbf16>, vector<256x8xf32> -> vector<256x8xf32>
    %102 = arith.addf %78, %101 : vector<256x8xf32>
    %c0_122 = arith.constant 0 : index
    %c0_123 = arith.constant 0 : index
    %103 = vector.load %arg6[%c0_122, %c0_123] : memref<1x8xf32, #tpu.memory_space<vmem>>, vector<1x8xf32>
    %104 = vector.broadcast %103 : vector<1x8xf32> to vector<256x8xf32>
    %105 = arith.mulf %102, %104 : vector<256x8xf32>
    %c0_124 = arith.constant 0 : index
    %c0_125 = arith.constant 0 : index
    %106 = vector.load %arg7[%c0_124, %c0_125] : memref<1x8xf32, #tpu.memory_space<vmem>>, vector<1x8xf32>
    %107 = vector.broadcast %106 : vector<1x8xf32> to vector<256x8xf32>
    %108 = arith.addf %105, %107 : vector<256x8xf32>
    %cst_126 = arith.constant 0.000000e+00 : f32
    %109 = vector.broadcast %cst_126 : f32 to vector<256x8xf32>
    %110 = arith.subf %109, %108 : vector<256x8xf32>
    %111 = math.exp %110 : vector<256x8xf32>
    %cst_127 = arith.constant 1.000000e+00 : f32
    %112 = vector.broadcast %cst_127 : f32 to vector<256x8xf32>
    %113 = arith.addf %112, %111 : vector<256x8xf32>
    %cst_128 = arith.constant 1.000000e+00 : f32
    %114 = vector.broadcast %cst_128 : f32 to vector<256x8xf32>
    %115 = arith.divf %114, %113 : vector<256x8xf32>
    %116 = arith.mulf %108, %115 : vector<256x8xf32>
    %c0_129 = arith.constant 0 : index
    %c0_130 = arith.constant 0 : index
    %c0_131 = arith.constant 0 : index
    %117 = vector.load %arg8[%c0_129, %c0_130, %c0_131] : memref<1x256x8xf32, #tpu.memory_space<vmem>>, vector<1x256x8xf32>
    %118 = vector.shape_cast %117 : vector<1x256x8xf32> to vector<256x8xf32>
    %119 = vector.shape_cast %116 : vector<256x8xf32> to vector<1x256x8xf32>
    tpu.vector_store %arg8[%c0_129, %c0_130, %c0_131], %119 {strides = array<i32>} : memref<1x256x8xf32, #tpu.memory_space<vmem>>, vector<1x256x8xf32>,
    return
  }
  func.func @transform_0(%arg0: i32) -> (i32, i32, i32) {
    %c0_i32 = arith.constant 0 : i32
    %c0_i32_0 = arith.constant 0 : i32
    %c0_i32_1 = arith.constant 0 : i32
    return %arg0, %c0_i32, %c0_i32_0 : i32, i32, i32
  }
  func.func @transform_1(%arg0: i32) -> (i32, i32) {
    %c0_i32 = arith.constant 0 : i32
    %c0_i32_0 = arith.constant 0 : i32
    %c0_i32_1 = arith.constant 0 : i32
    return %c0_i32, %c0_i32_0 : i32, i32
  }
  func.func @transform_2(%arg0: i32) -> (i32, i32) {
    %c0_i32 = arith.constant 0 : i32
    %c0_i32_0 = arith.constant 0 : i32
    %c0_i32_1 = arith.constant 0 : i32
    return %c0_i32, %c0_i32_0 : i32, i32
  }
  func.func @transform_3(%arg0: i32) -> (i32, i32) {
    %c0_i32 = arith.constant 0 : i32
    %c0_i32_0 = arith.constant 0 : i32
    %c0_i32_1 = arith.constant 0 : i32
    return %c0_i32, %c0_i32_0 : i32, i32
  }
  func.func @transform_4(%arg0: i32) -> (i32, i32, i32) {
    %c0_i32 = arith.constant 0 : i32
    %c0_i32_0 = arith.constant 0 : i32
    %c0_i32_1 = arith.constant 0 : i32
    %c0_i32_2 = arith.constant 0 : i32
    return %c0_i32, %c0_i32_0, %c0_i32_1 : i32, i32, i32
  }
  func.func @transform_5(%arg0: i32) -> (i32, i32) {
    %c0_i32 = arith.constant 0 : i32
    %c0_i32_0 = arith.constant 0 : i32
    %c0_i32_1 = arith.constant 0 : i32
    return %c0_i32, %c0_i32_0 : i32, i32
  }
  func.func @transform_6(%arg0: i32) -> (i32, i32) {
    %c0_i32 = arith.constant 0 : i32
    %c0_i32_0 = arith.constant 0 : i32
    %c0_i32_1 = arith.constant 0 : i32
    return %c0_i32, %c0_i32_0 : i32, i32
  }
  func.func @transform_7(%arg0: i32) -> (i32, i32, i32) {
    %c0_i32 = arith.constant 0 : i32
    %c0_i32_0 = arith.constant 0 : i32
    %c0_i32_1 = arith.constant 0 : i32
    return %arg0, %c0_i32, %c0_i32_0 : i32, i32, i32
  }
}

</mosaic_0001>

<bundles_post_ra>
// kernel: sppf_forward.1
= control target key start
LH: loop header
LB: loop body
LE: loop exit
PB: predicated region body
PF: predicated region fallthrough
CT: control target
= control target key end

     0   :  { %s4866_s24 = smov 0   ;;  %s7351_s0 = inlined_call_operand.vmem [shape: bf16[2,256,8], index: 0, kind: input, shape index: {}]   ;;  %s7352_s1 = inlined_call_operand.vmem [shape: bf16[8,4], index: 1, kind: input, shape index: {}]   ;;  %s7353_s2 = inlined_call_operand.vmem [shape: f32[1,4], index: 2, kind: input, shape index: {}]   ;;  %s7354_s3 = inlined_call_operand.vmem [shape: f32[1,4], index: 3, kind: input, shape index: {}]   ;;  %s7355_s4 = inlined_call_operand.vmem [shape: bf16[4,4,8], index: 4, kind: input, shape index: {}]   ;;  %s7356_s5 = inlined_call_operand.vmem [shape: f32[1,8], index: 5, kind: input, shape index: {}]   ;;  %s7357_s6 = inlined_call_operand.vmem [shape: f32[1,8], index: 6, kind: input, shape index: {}]   ;;  %s7358_s7 = inlined_call_operand.vmem [shape: f32[2,256,8], index: 7, kind: output, shape index: {}]  }
   0x1 LB: > { %s4057_s25 = sadd.s32 4294967295, %s4823_s24   ;;  %p4061_p0 = scmp.ge.s32.totalorder %s4823_s24, 1  ;;  %s4823_s24 = sphi %s4866_s24, %s17_s24  }
   0x2   : > { %p237_p1 = scmp.lt.s32.totalorder %s4823_s24, 3 }
   0x4   : > { %p238_p2 = pnand %p4061_p0, %p237_p1 }
   0x6   : > { %241 = sbr.rel (%p238_p2) target bundleno = 871 (0x367), region = 48 }
   0xd   : > { %v355_v0 = vld [vmem:[%s7352_s1] sm:$0xf]  ;;  %vm485_vm0 = vcmask 1043456   ;;  %p269_p3 = scmp.lt.s32.totalorder %s4057_s25, 1  ;;  %vm280_vm1 = vcmask 25600   ;;  %vm313_vm2 = vcmask 31744  }
   0xe   : > { %4526 = vmatprep.subr.msk.bf16.mxu0 %vm485_vm0, %v355_v0  ;;  %v487_v1 = vsel %vm485_vm0, %v355_v0, 0  ;;  %v4825_v2 = vmov -3e+38   ;;  %vm436_vm3 = vcmask 64512   ;;  %v968_v19 = vld [vmem:[%s7355_s4] sm:$0x3] }
   0xf   : > { %4259 = vmatpush3.bf16.msra.mxu0 %v487_v1  ;;  %s7615_s25 = smov (!%p269_p3, %s4057_s25), 1  ;;  %282 = vst.msk [vmem:[#allocation2 + $0x26] sm:$0x3] %vm280_vm1, %v4825_v2  ;;  %281 = vst.msk [vmem:[#allocation2 + $0x6] sm:$0x3] %vm280_vm1, %v4825_v2  ;;  %vm1615_vm4 = vcmask 1041408  }
  0x10   : > { %283 = vst.msk [vmem:[#allocation2 + $0x46] sm:$0x3] %vm280_vm1, %v4825_v2  ;;  %284 = vst.msk [vmem:[#allocation2 + $0x66] sm:$0x3] %vm280_vm1, %v4825_v2  ;;  %s4171_s28 = sshll.u32 %s7615_s25, 7  ;;  %4529 = vmatprep.subr.msk.bf16.mxu1 %vm1615_vm4, %v968_v19  ;;  %v4962_v20 = vsel %vm1615_vm4, %v968_v19, 0 }
  0x11   : > { %285 = vst.msk [vmem:[#allocation2 + $0x86] sm:$0x3] %vm280_vm1, %v4825_v2  ;;  %286 = vst.msk [vmem:[#allocation2 + $0xa6] sm:$0x3] %vm280_vm1, %v4825_v2  ;;  %s4923_s8 = scalar_lea.vmem %s7351_s0, %s4171_s28  ;;  %4429 = vmatpush3.bf16.msra.mxu1 %v4962_v20  ;;  %v4100_v21 = vld [vmem:[%s7355_s4 + $0x2] sm:$0x3] }
  0x12   : > { %287 = vst.msk [vmem:[#allocation2 + $0xc6] sm:$0x3] %vm280_vm1, %v4825_v2  ;;  %288 = vst.msk [vmem:[#allocation2 + $0xe6] sm:$0x3] %vm280_vm1, %v4825_v2  ;;  %v4541_v3 = vld [vmem:[%s4923_s8] sm:$0xff]   ;;  %v4542_v4 = vld [vmem:[%s4923_s8 + $0x8] sm:$0xff]   ;;  %4527 = vmatprep.subr.msk.bf16.mxu0 %vm1615_vm4, %v4100_v21 }
  0x13   : > { %289 = vst.msk [vmem:[#allocation2 + $0x106] sm:$0x3] %vm280_vm1, %v4825_v2  ;;  %290 = vst.msk [vmem:[#allocation2 + $0x126] sm:$0x3] %vm280_vm1, %v4825_v2  ;;  %4260 = vmatprep.mubr.msk.bf16.mxu0 %vm436_vm3, %v4541_v3  ;;  %v4543_v5 = vld [vmem:[%s4923_s8 + $0x10] sm:$0xff]   ;;  %v4544_v6 = vld [vmem:[%s4923_s8 + $0x18] sm:$0xff]  }
  0x14   : > { %291 = vst.msk [vmem:[#allocation2 + $0x146] sm:$0x3] %vm280_vm1, %v4825_v2  ;;  %292 = vst.msk [vmem:[#allocation2 + $0x166] sm:$0x3] %vm280_vm1, %v4825_v2  ;;  %4261 = vmatmul.mubr.msk.bf16.vlgmr.msra.gmra.mrb[0].mxu0 %vm436_vm3, %v4542_v4  ;;  %v4545_v7 = vld [vmem:[%s4923_s8 + $0x20] sm:$0xff]   ;;  %v4546_v8 = vld [vmem:[%s4923_s8 + $0x28] sm:$0xff]  }
  0x15   : > { %293 = vst.msk [vmem:[#allocation2 + $0x186] sm:$0x3] %vm280_vm1, %v4825_v2  ;;  %294 = vst.msk [vmem:[#allocation2 + $0x1a6] sm:$0x3] %vm280_vm1, %v4825_v2  ;;  %4264 = vmatprep.mubr.msk.bf16.mxu0 %vm436_vm3, %v4543_v5  ;;  %v4547_v9 = vld [vmem:[%s4923_s8 + $0x30] sm:$0xff]   ;;  %v4548_v10 = vld [vmem:[%s4923_s8 + $0x38] sm:$0xff]  }
  0x16   : > { %295 = vst.msk [vmem:[#allocation2 + $0x1c6] sm:$0x3] %vm280_vm1, %v4825_v2  ;;  %296 = vst.msk [vmem:[#allocation2 + $0x1e6] sm:$0x3] %vm280_vm1, %v4825_v2  ;;  %v4549_v11 = vld [vmem:[%s4923_s8 + $0x40] sm:$0xff]   ;;  %v4550_v12 = vld [vmem:[%s4923_s8 + $0x48] sm:$0xff]  }
  0x17   : > { %297 = vst.msk [vmem:[#allocation2 + $0x18] sm:$0x3] %vm280_vm1, %v4825_v2  ;;  %298 = vst.msk [vmem:[#allocation2 + $0x38] sm:$0x3] %vm280_vm1, %v4825_v2  ;;  %v4551_v13 = vld [vmem:[%s4923_s8 + $0x50] sm:$0xff]   ;;  %v4552_v14 = vld [vmem:[%s4923_s8 + $0x58] sm:$0xff]  }
  0x18   : > { %299 = vst.msk [vmem:[#allocation2 + $0x58] sm:$0x3] %vm280_vm1, %v4825_v2  ;;  %300 = vst.msk [vmem:[#allocation2 + $0x78] sm:$0x3] %vm280_vm1, %v4825_v2  ;;  %v4553_v15 = vld [vmem:[%s4923_s8 + $0x60] sm:$0xff]   ;;  %v4554_v16 = vld [vmem:[%s4923_s8 + $0x68] sm:$0xff]  }
  0x19   : > { %301 = vst.msk [vmem:[#allocation2 + $0x98] sm:$0x3] %vm280_vm1, %v4825_v2  ;;  %302 = vst.msk [vmem:[#allocation2 + $0xb8] sm:$0x3] %vm280_vm1, %v4825_v2  ;;  %v4555_v17 = vld [vmem:[%s4923_s8 + $0x70] sm:$0xff]   ;;  %v4556_v18 = vld [vmem:[%s4923_s8 + $0x78] sm:$0xff]  }
  0x1a   : > { %303 = vst.msk [vmem:[#allocation2 + $0xd8] sm:$0x3] %vm280_vm1, %v4825_v2  ;;  %304 = vst.msk [vmem:[#allocation2 + $0xf8] sm:$0x3] %vm280_vm1, %v4825_v2  ;;  %v1617_v22 = vsel %vm1615_vm4, %v4100_v21, 0  ;;  %s4172_s27 = sshll.u32 %s7615_s25, 8 }
  0x1b   : > { %305 = vst.msk [vmem:[#allocation2 + $0x118] sm:$0x3] %vm280_vm1, %v4825_v2  ;;  %306 = vst.msk [vmem:[#allocation2 + $0x138] sm:$0x3] %vm280_vm1, %v4825_v2  ;;  %4293 = vmatpush3.bf16.msra.mxu0 %v1617_v22  ;;  %v4974_v23 = vld [vmem:[%s7353_s2] ss:$0 sm:$0xff]  ;;  %s7153_s29 = scalar_lea.vmem %s7358_s7, %s4172_s27 }
  0x1c   : > { %307 = vst.msk [vmem:[#allocation2 + $0x158] sm:$0x3] %vm280_vm1, %v4825_v2  ;;  %308 = vst.msk [vmem:[#allocation2 + $0x178] sm:$0x3] %vm280_vm1, %v4825_v2  ;;  %4265 = vmatmul.mubr.msk.bf16.gmra.mrb[4].mxu0 %vm436_vm3, %v4544_v6  ;;  %4528 = vmatprep.subr.msk.bf16.mxu0 %vm1615_vm4, %v968_v19  ;;  %v4979_v25 = vld [vmem:[%s7354_s3] ss:$0 sm:$0xff] }
  0x1d   : > { %309 = vst.msk [vmem:[#allocation2 + $0x198] sm:$0x3] %vm280_vm1, %v4825_v2  ;;  %310 = vst.msk [vmem:[#allocation2 + $0x1b8] sm:$0x3] %vm280_vm1, %v4825_v2  ;;  %4268 = vmatprep.mubr.msk.bf16.mxu0 %vm436_vm3, %v4545_v7 }
  0x1e   : > { %311 = vst.msk [vmem:[#allocation2 + $0x1d8] sm:$0x3] %vm280_vm1, %v4825_v2  ;;  %312 = vst.msk [vmem:[#allocation2 + $0x1f8] sm:$0x3] %vm280_vm1, %v4825_v2 }
  0x1f   : > { %314 = vst.msk [vmem:[#allocation3] sm:$0xff] %vm313_vm2, %v4825_v2  ;;  %315 = vst.msk [vmem:[#allocation3 + $0x8] sm:$0xff] %vm313_vm2, %v4825_v2 }
  0x20   : > { %316 = vst.msk [vmem:[#allocation3 + $0x10] sm:$0xff] %vm313_vm2, %v4825_v2  ;;  %317 = vst.msk [vmem:[#allocation3 + $0x18] sm:$0xff] %vm313_vm2, %v4825_v2 }
  0x21   : > { %319 = vst.msk [vmem:[#allocation3 + $0x120] sm:$0xff] %vm313_vm2, %v4825_v2  ;;  %320 = vst.msk [vmem:[#allocation3 + $0x128] sm:$0xff] %vm313_vm2, %v4825_v2 }
  0x22   : > { %321 = vst.msk [vmem:[#allocation3 + $0x130] sm:$0xff] %vm313_vm2, %v4825_v2  ;;  %322 = vst.msk [vmem:[#allocation3 + $0x138] sm:$0xff] %vm313_vm2, %v4825_v2 }
  0x23   : > { %7436 = vst [vmem:[#allocation4_spill] sm:$0xff] %v4962_v20 }
  0x24   : > { %4269 = vmatmul.mubr.msk.bf16.gmra.mrb[8].mxu0 %vm436_vm3, %v4546_v8 }
  0x25   : > { %4272 = vmatprep.mubr.msk.bf16.mxu0 %vm436_vm3, %v4547_v9 }
  0x2c   : > { %4273 = vmatmul.mubr.msk.bf16.gmra.mrb[12].mxu0 %vm436_vm3, %v4548_v10 }
  0x2d   : > { %4276 = vmatprep.mubr.msk.bf16.mxu0 %vm436_vm3, %v4549_v11 }
  0x34   : > { %4277 = vmatmul.mubr.msk.bf16.gmra.mrb[16].mxu0 %vm436_vm3, %v4550_v12 }
  0x35   : > { %4280 = vmatprep.mubr.msk.bf16.mxu0 %vm436_vm3, %v4551_v13 }
  0x3c   : > { %4281 = vmatmul.mubr.msk.bf16.gmra.mrb[20].mxu0 %vm436_vm3, %v4552_v14 }
  0x3d   : > { %4284 = vmatprep.mubr.msk.bf16.mxu0 %vm436_vm3, %v4553_v15 }
  0x44   : > { %4285 = vmatmul.mubr.msk.bf16.gmra.mrb[24].mxu0 %vm436_vm3, %v4554_v16 }
  0x45   : > { %4288 = vmatprep.mubr.msk.bf16.mxu0 %vm436_vm3, %v4555_v17 }
  0x4c   : > { %4289 = vmatmul.mubr.msk.bf16.gmra.mrb[28].mxu0 %vm436_vm3, %v4556_v18  ;;  %v4133_v18 = vld [vmem:[%s7355_s4 + $0x4] sm:$0x3] }
  0x4d   : > { %4530 = vmatprep.subr.msk.bf16.mxu1 %vm1615_vm4, %v4133_v18 }
  0xe7   : > { %v4262_v24 = vpop.f32.mrb[0].mxu0 }
  0xe8   : > { %v659_v26 = vmul.f32 %v4262_v24, %v4974_v23  ;;  %v523_v27 = vpop.f32.mrb[1].mxu0 }
  0xe9   : > { %v657_v28 = vmul.f32 %v4974_v23, %v523_v27  ;;  %v4263_v29 = vpop.f32.mrb[2].mxu0 }
  0xea   : > { %v4984_v30 = vadd.f32 %v4979_v25, %v659_v26  ;;  %v660_v31 = vmul.f32 %v4263_v29, %v4974_v23  ;;  %v526_v32 = vpop.f32.mrb[3].mxu0  ;;  %v1290_v29 = vld [vmem:[#allocation3] sm:$0xff] }
  0xeb   : > { %v4988_v33 = vadd.f32 %v4979_v25, %v657_v28  ;;  %v658_v34 = vmul.f32 %v4974_v23, %v526_v32 }
  0xec   : > { %v730_v35 = vsub.f32 0.0, %v4984_v30  ;;  %v4993_v36 = vadd.f32 %v4979_v25, %v660_v31 }
  0xed   : > { %v728_v37 = vsub.f32 0.0, %v4988_v33  ;;  %v4997_v38 = vadd.f32 %v4979_v25, %v658_v34 }
  0xee   : > { %v764_v39 = vmul.f32 1.442695, %v730_v35  ;;  %v731_v40 = vsub.f32 0.0, %v4993_v36  ;;  %v1291_v35 = vld [vmem:[#allocation3 + $0x8] sm:$0xff] }
  0xef   : > { %v760_v41 = vmul.f32 1.442695, %v728_v37  ;;  %v729_v42 = vsub.f32 0.0, %v4997_v38  ;;  %v4266_v43 = vpop.f32.mrb[4].mxu0 }
  0xf0   : > { %4557 = vpow2.f32 %v764_v39  ;;  %v766_v44 = vmul.f32 1.442695, %v731_v40  ;;  %v663_v45 = vmul.f32 %v4266_v43, %v4974_v23  ;;  %v539_v46 = vpop.f32.mrb[5].mxu0 }
  0xf1   : > { %4559 = vpow2.f32 %v760_v41  ;;  %v762_v47 = vmul.f32 1.442695, %v729_v42  ;;  %v661_v48 = vmul.f32 %v4974_v23, %v539_v46  ;;  %v4267_v49 = vpop.f32.mrb[6].mxu0  ;;  %v1323_v41 = vld [vmem:[#allocation3 + $0x10] sm:$0xff] }
  0xf2   : > { %4561 = vpow2.f32 %v766_v44  ;;  %v5004_v50 = vadd.f32 %v4979_v25, %v663_v45  ;;  %v664_v51 = vmul.f32 %v4267_v49, %v4974_v23  ;;  %v542_v52 = vpop.f32.mrb[7].mxu0  ;;  %v5047_v45 = vld [vmem:[#allocation3 + $0x18] sm:$0xff]  ;;  %v5049_v46 = vmax.f32 %v1290_v29, %v1323_v41 }
  0xf3   : > { %4563 = vpow2.f32 %v762_v47  ;;  %v5008_v53 = vadd.f32 %v4979_v25, %v661_v48  ;;  %v662_v54 = vmul.f32 %v4974_v23, %v542_v52  ;;  %v5056_v52 = vmax.f32 %v1291_v35, %v5047_v45 }
  0xf4   : > { %v734_v55 = vsub.f32 0.0, %v5004_v50  ;;  %v5013_v56 = vadd.f32 %v4979_v25, %v664_v51  ;;  %7437 = vst [vmem:[#allocation5_spill] sm:$0xff] %v5049_v46 }
  0xf5   : > { %v732_v57 = vsub.f32 0.0, %v5008_v53  ;;  %v5017_v58 = vadd.f32 %v4979_v25, %v662_v54  ;;  %7438 = vst [vmem:[#allocation6_spill] sm:$0xff] %v5056_v52 }
  0xf6   : > { %v772_v59 = vmul.f32 1.442695, %v734_v55  ;;  %v735_v60 = vsub.f32 0.0, %v5013_v56 }
  0xf7   : > { %v768_v61 = vmul.f32 1.442695, %v732_v57  ;;  %v733_v62 = vsub.f32 0.0, %v5017_v58  ;;  %v4270_v63 = vpop.f32.mrb[8].mxu0 }
  0xf8   : > { %4565 = vpow2.f32 %v772_v59  ;;  %v774_v0 = vmul.f32 1.442695, %v735_v60  ;;  %v667_v1 = vmul.f32 %v4270_v63, %v4974_v23  ;;  %v555_v2 = vpop.f32.mrb[9].mxu0 }
  0xf9   : > { %4567 = vpow2.f32 %v768_v61  ;;  %v770_v3 = vmul.f32 1.442695, %v733_v62  ;;  %v665_v4 = vmul.f32 %v4974_v23, %v555_v2  ;;  %v4271_v5 = vpop.f32.mrb[10].mxu0 }
  0xfa   : > { %v4558_v6 = vpop.eup %4557  ;;  %4569 = vpow2.f32 %v774_v0  ;;  %v5024_v7 = vadd.f32 %v4979_v25, %v667_v1  ;;  %v668_v8 = vmul.f32 %v4271_v5, %v4974_v23  ;;  %v558_v9 = vpop.f32.mrb[11].mxu0 }
  0xfb   : > { %v4560_v10 = vpop.eup %4559  ;;  %v826_v11 = vadd.f32 1.0, %v4558_v6  ;;  %4571 = vpow2.f32 %v770_v3  ;;  %v5028_v12 = vadd.f32 %v4979_v25, %v665_v4  ;;  %v666_v13 = vmul.f32 %v4974_v23, %v558_v9 }
  0xfc   : > { %v4562_v14 = vpop.eup %4561  ;;  %v824_v15 = vadd.f32 1.0, %v4560_v10  ;;  %v738_v16 = vsub.f32 0.0, %v5024_v7  ;;  %v5033_v17 = vadd.f32 %v4979_v25, %v668_v8 }
  0xfd   : > { %v4564_v19 = vpop.eup %4563  ;;  %4573 = vrcp.f32 %v826_v11  ;;  %v827_v21 = vadd.f32 1.0, %v4562_v14  ;;  %v736_v22 = vsub.f32 0.0, %v5028_v12  ;;  %v5040_v24 = vadd.f32 %v4979_v25, %v666_v13 }
  0xfe   : > { %4575 = vrcp.f32 %v824_v15  ;;  %v825_v26 = vadd.f32 1.0, %v4564_v19  ;;  %v780_v27 = vmul.f32 1.442695, %v738_v16  ;;  %v739_v28 = vsub.f32 0.0, %v5033_v17 }
  0xff   : > { %4577 = vrcp.f32 %v827_v21  ;;  %v776_v31 = vmul.f32 1.442695, %v736_v22  ;;  %v737_v32 = vsub.f32 0.0, %v5040_v24  ;;  %v4274_v34 = vpop.f32.mrb[12].mxu0  ;;  %v5073_v13 = vsel %vm1615_vm4, %v4133_v18, 0 }
 0x100   : > { %4579 = vrcp.f32 %v825_v26  ;;  %v782_v37 = vmul.f32 1.442695, %v739_v28  ;;  %v671_v39 = vmul.f32 %v4274_v34, %v4974_v23  ;;  %v571_v40 = vpop.f32.mrb[13].mxu0 }
 0x101   : > { %4581 = vpow2.f32 %v780_v27  ;;  %v778_v42 = vmul.f32 1.442695, %v737_v32  ;;  %v669_v43 = vmul.f32 %v4974_v23, %v571_v40  ;;  %v4275_v44 = vpop.f32.mrb[14].mxu0 }
 0x102   : > { %v4566_v47 = vpop.eup %4565  ;;  %4583 = vpow2.f32 %v776_v31  ;;  %v5052_v48 = vadd.f32 %v4979_v25, %v671_v39  ;;  %v672_v49 = vmul.f32 %v4275_v44, %v4974_v23  ;;  %v574_v51 = vpop.f32.mrb[15].mxu0 }
 0x103   : > { %v4568_v54 = vpop.eup %4567  ;;  %v830_v55 = vadd.f32 1.0, %v4566_v47  ;;  %4585 = vpow2.f32 %v782_v37  ;;  %v5059_v57 = vadd.f32 %v4979_v25, %v669_v43  ;;  %v670_v59 = vmul.f32 %v4974_v23, %v574_v51 }
 0x104   : > { %v4570_v60 = vpop.eup %4569  ;;  %v828_v61 = vadd.f32 1.0, %v4568_v54  ;;  %4587 = vpow2.f32 %v778_v42  ;;  %v742_v62 = vsub.f32 0.0, %v5052_v48  ;;  %v5064_v63 = vadd.f32 %v4979_v25, %v672_v49 }
 0x105   : > { %v4572_v0 = vpop.eup %4571  ;;  %4589 = vrcp.f32 %v830_v55  ;;  %v831_v1 = vadd.f32 1.0, %v4570_v60  ;;  %v740_v2 = vsub.f32 0.0, %v5059_v57  ;;  %v5068_v3 = vadd.f32 %v4979_v25, %v670_v59 }
 0x106   : > { %4591 = vrcp.f32 %v828_v61  ;;  %v829_v4 = vadd.f32 1.0, %v4572_v0  ;;  %v788_v5 = vmul.f32 1.442695, %v742_v62  ;;  %v743_v6 = vsub.f32 0.0, %v5064_v63 }
 0x107   : > { %v4574_v8 = vpop.eup %4573  ;;  %4593 = vrcp.f32 %v831_v1  ;;  %v784_v9 = vmul.f32 1.442695, %v740_v2  ;;  %v741_v10 = vsub.f32 0.0, %v5068_v3  ;;  %v4278_v11 = vpop.f32.mrb[16].mxu0 }
 0x108   : > { %v4576_v14 = vpop.eup %4575  ;;  %v5076_v15 = vmul.f32 %v4574_v8, %v4984_v30  ;;  %4595 = vrcp.f32 %v829_v4  ;;  %v790_v16 = vmul.f32 1.442695, %v743_v6  ;;  %v675_v19 = vmul.f32 %v4278_v11, %v4974_v23  ;;  %v587_v21 = vpop.f32.mrb[17].mxu0 }
 0x109   : > { %v4578_v22 = vpop.eup %4577  ;;  %v5080_v26 = vmul.f32 %v4576_v14, %v4988_v33  ;;  %4597 = vpow2.f32 %v788_v5  ;;  %v786_v27 = vmul.f32 1.442695, %v741_v10  ;;  %v673_v28 = vmul.f32 %v4974_v23, %v587_v21  ;;  %v4279_v29 = vpop.f32.mrb[18].mxu0 }
 0x10a   : > { %7439 = vst [vmem:[#allocation7_spill] sm:$0xff] %v5076_v15  ;;  %v4580_v18 = vpop.eup %4579  ;;  %971 = vst.msk [vmem:[#allocation2 + $0x28] sm:$0xff] %vm313_vm2, %v5076_v15  ;;  %v5086_v30 = vmul.f32 %v4578_v22, %v4993_v36  ;;  %4599 = vpow2.f32 %v784_v9  ;;  %v5089_v31 = vadd.f32 %v4979_v25, %v675_v19  ;;  %v676_v32 = vmul.f32 %v4279_v29, %v4974_v23  ;;  %v590_v33 = vpop.f32.mrb[19].mxu0 }
 0x10b   : > { %7440 = vst [vmem:[#allocation8_spill] sm:$0xff] %v5080_v26  ;;  %v4582_v34 = vpop.eup %4581  ;;  %969 = vst.msk [vmem:[#allocation2 + $0x8] sm:$0xff] %vm313_vm2, %v5080_v26  ;;  %v5095_v35 = vmul.f32 %v4580_v18, %v4997_v38  ;;  %4601 = vpow2.f32 %v790_v16  ;;  %v5098_v37 = vadd.f32 %v4979_v25, %v673_v28  ;;  %v674_v36 = vmul.f32 %v4974_v23, %v590_v33 }
 0x10c   : > { %7441 = vst [vmem:[#allocation9_spill] sm:$0xff] %v5086_v30  ;;  %v4584_v39 = vpop.eup %4583  ;;  %972 = vst.msk [vmem:[#allocation2 + $0x30] sm:$0xff] %vm313_vm2, %v5086_v30  ;;  %v834_v41 = vadd.f32 1.0, %v4582_v34  ;;  %4603 = vpow2.f32 %v786_v27  ;;  %v746_v42 = vsub.f32 0.0, %v5089_v31  ;;  %v5110_v47 = vadd.f32 %v4979_v25, %v676_v32 }
 0x10d   : > { %7442 = vst [vmem:[#allocation10_spill] sm:$0xff] %v5095_v35  ;;  %v4586_v43 = vpop.eup %4585  ;;  %970 = vst.msk [vmem:[#allocation2 + $0x10] sm:$0xff] %vm313_vm2, %v5095_v35  ;;  %v832_v38 = vadd.f32 1.0, %v4584_v39  ;;  %v744_v44 = vsub.f32 0.0, %v5098_v37  ;;  %v5113_v49 = vadd.f32 %v4979_v25, %v674_v36 }
 0x10e   : > { %v4588_v51 = vpop.eup %4587  ;;  %4605 = vrcp.f32 %v834_v41  ;;  %v835_v54 = vadd.f32 1.0, %v4586_v43  ;;  %v796_v55 = vmul.f32 1.442695, %v746_v42  ;;  %v747_v0 = vsub.f32 0.0, %v5110_v47 }
 0x10f   : > { %v4590_v60 = vpop.eup %4589  ;;  %4607 = vrcp.f32 %v832_v38  ;;  %v833_v61 = vadd.f32 1.0, %v4588_v51  ;;  %v792_v62 = vmul.f32 1.442695, %v744_v44  ;;  %v4282_v1 = vpop.f32.mrb[20].mxu0  ;;  %v745_v5 = vsub.f32 0.0, %v5113_v49 }
 0x110   : > { %v4592_v2 = vpop.eup %4591  ;;  %v5119_v4 = vmul.f32 %v4590_v60, %v5004_v50  ;;  %4609 = vrcp.f32 %v835_v54  ;;  %v679_v6 = vmul.f32 %v4282_v1, %v4974_v23  ;;  %v603_v8 = vpop.f32.mrb[21].mxu0  ;;  %v798_v16 = vmul.f32 1.442695, %v747_v0 }
 0x111   : > { %v4594_v9 = vpop.eup %4593  ;;  %v1003_v10 = vld [vmem:[#allocation2 + $0x26] sm:$0xff]  ;;  %v5124_v14 = vmul.f32 %v4592_v2, %v5008_v53  ;;  %4611 = vrcp.f32 %v833_v61  ;;  %v677_v19 = vmul.f32 %v4974_v23, %v603_v8  ;;  %v4283_v21 = vpop.f32.mrb[22].mxu0  ;;  %v794_v28 = vmul.f32 1.442695, %v745_v5 }
 0x112   : > { %7443 = vst [vmem:[#allocation11_spill] sm:$0xff] %v5119_v4  ;;  %v1035_v11 = vld [vmem:[#allocation2 + $0x27] sm:$0xff]  ;;  %v4596_v22 = vpop.eup %4595  ;;  %975 = vst.msk [vmem:[#allocation2 + $0x68] sm:$0xff] %vm313_vm2, %v5119_v4  ;;  %v5130_v27 = vmul.f32 %v4594_v9, %v5013_v56  ;;  %4613 = vpow2.f32 %v796_v55  ;;  %v5132_v29 = vpop.f32.mrb[23].mxu0  ;;  %v5140_v36 = vadd.f32 %v4979_v25, %v679_v6 }
 0x113   : > { %7444 = vst [vmem:[#allocation12_spill] sm:$0xff] %v5124_v14  ;;  %v1067_v50 = vmax.f32 %v1003_v10, %v1035_v11  ;;  %v4598_v18 = vpop.eup %4597  ;;  %v1004_v53 = vld [vmem:[#allocation2 + $0x2e] sm:$0xff]  ;;  %973 = vst.msk [vmem:[#allocation2 + $0x48] sm:$0xff] %vm313_vm2, %v5124_v14  ;;  %v5137_v34 = vmul.f32 %v4596_v22, %v5017_v58  ;;  %4615 = vpow2.f32 %v792_v62  ;;  %v5143_v56 = vadd.f32 %v4979_v25, %v677_v19 }
 0x114   : > { %7445 = vst [vmem:[#allocation13_spill] sm:$0xff] %v5130_v27  ;;  %v1036_v32 = vld [vmem:[#allocation2 + $0x2f] sm:$0xff]  ;;  %v4600_v39 = vpop.eup %4599  ;;  %976 = vst.msk [vmem:[#allocation2 + $0x70] sm:$0xff] %vm313_vm2, %v5130_v27  ;;  %v838_v44 = vadd.f32 1.0, %v4598_v18  ;;  %4617 = vpow2.f32 %v798_v16  ;;  %v680_v58 = vmul.f32 %v4283_v21, %v4974_v23  ;;  %v750_v8 = vsub.f32 0.0, %v5140_v36 }
 0x115   : > { %v1099_v33 = vld [vmem:[#allocation2 + $0x29] sm:$0xff]  ;;  %7446 = vst [vmem:[#allocation14_spill] sm:$0xff] %v5137_v34  ;;  %v1068_v41 = vmax.f32 %v1004_v53, %v1036_v32  ;;  %v1100_v42 = vld [vmem:[#allocation2 + $0x31] sm:$0xff]  ;;  %v4602_v51 = vpop.eup %4601  ;;  %974 = vst.msk [vmem:[#allocation2 + $0x50] sm:$0xff] %vm313_vm2, %v5137_v34  ;;  %v836_v0 = vadd.f32 1.0, %v4600_v39  ;;  %4619 = vpow2.f32 %v794_v28  ;;  %v748_v18 = vsub.f32 0.0, %v5143_v56 }
 0x116   : > { %v1131_v43 = vld [vmem:[#allocation2 + $0x2a] sm:$0xff]  ;;  %v1132_v38 = vld [vmem:[#allocation2 + $0x32] sm:$0xff]  ;;  %v4604_v1 = vpop.eup %4603  ;;  %4621 = vrcp.f32 %v838_v44  ;;  %v839_v6 = vadd.f32 1.0, %v4602_v51  ;;  %v804_v22 = vmul.f32 1.442695, %v750_v8 }
 0x117   : > { %v1163_v54 = vmax.f32 %v1099_v33, %v1131_v43  ;;  %v1164_v55 = vmax.f32 %v1100_v42, %v1132_v38  ;;  %v1002_v60 = vld [vmem:[#allocation2 + $0xe] sm:$0xff]  ;;  %4623 = vrcp.f32 %v836_v0  ;;  %v4286_v16 = vpop.f32.mrb[24].mxu0  ;;  %v837_v21 = vadd.f32 1.0, %v4604_v1 }
 0x118   : > { %v1034_v61 = vld [vmem:[#allocation2 + $0xf] sm:$0xff]  ;;  %v4606_v19 = vpop.eup %4605  ;;  %4625 = vrcp.f32 %v839_v6  ;;  %v5154_v28 = vpop.f32.mrb[25].mxu0  ;;  %v5163_v42 = vadd.f32 %v4979_v25, %v680_v58 }
 0x119   : > { %v1098_v62 = vld [vmem:[#allocation2 + $0x11] sm:$0xff]  ;;  %v1066_v2 = vmax.f32 %v1002_v60, %v1034_v61  ;;  %v5151_v9 = vmax.f32 %v1067_v50, %v1163_v54  ;;  %v1196_v10 = vmax.f32 %v1068_v41, %v1164_v55  ;;  %v4608_v53 = vpop.eup %4607  ;;  %v1007_v39 = vld [vmem:[#allocation2 + $0x66] sm:$0xff]  ;;  %v5160_v41 = vmul.f32 %v4606_v19, %v5024_v7  ;;  %v5165_v43 = vpop.f32.mrb[26].mxu0 }
 0x11a   : > { %v1130_v5 = vld [vmem:[#allocation2 + $0x12] sm:$0xff]  ;;  %v1039_v50 = vld [vmem:[#allocation2 + $0x67] sm:$0xff]  ;;  %v4610_v38 = vpop.eup %4609  ;;  %v5168_v55 = vmul.f32 %v4608_v53, %v5028_v12  ;;  %4627 = vrcp.f32 %v837_v21  ;;  %v800_v60 = vmul.f32 1.442695, %v748_v18  ;;  %v5170_v61 = vpop.f32.mrb[27].mxu0  ;;  %v751_v21 = vsub.f32 0.0, %v5163_v42 }
 0x11b   : > { %v1162_v11 = vmax.f32 %v1098_v62, %v1130_v5  ;;  %v5157_v32 = vmax.f32 %v1196_v10, %v5086_v30  ;;  %7447 = vst [vmem:[#allocation15_spill] sm:$0xff] %v5160_v41  ;;  %v1071_v44 = vmax.f32 %v1007_v39, %v1039_v50  ;;  %v1005_v51 = vld [vmem:[#allocation2 + $0x46] sm:$0xff]  ;;  %v4612_v62 = vpop.eup %4611  ;;  %v1008_v0 = vld [vmem:[#allocation2 + $0x6e] sm:$0xff]  ;;  %979 = vst.msk [vmem:[#allocation2 + $0xa8] sm:$0xff] %vm313_vm2, %v5160_v41  ;;  %4629 = vpow2.f32 %v804_v22 }
 0x11c   : > { %v1037_v54 = vld [vmem:[#allocation2 + $0x47] sm:$0xff]  ;;  %7448 = vst [vmem:[#allocation16_spill] sm:$0xff] %v5168_v55  ;;  %v1040_v1 = vld [vmem:[#allocation2 + $0x6f] sm:$0xff]  ;;  %v5180_v12 = vmul.f32 %v4610_v38, %v5033_v17  ;;  %v4614_v5 = vpop.eup %4613  ;;  %977 = vst.msk [vmem:[#allocation2 + $0x88] sm:$0xff] %vm313_vm2, %v5168_v55  ;;  %v5185_v19 = vmul.f32 %v4612_v62, %v5040_v24  ;;  %4631 = vpow2.f32 %v800_v60  ;;  %v678_v24 = vmul.f32 %v4974_v23, %v5132_v29 }
 0x11d   : > { %v1194_v33 = vmax.f32 %v1066_v2, %v1162_v11  ;;  %1261 = vst.msk [vmem:[#allocation3 + $0x38] sm:$0xff] %vm313_vm2, %v5157_v32  ;;  %v1069_v58 = vmax.f32 %v1005_v51, %v1037_v54  ;;  %v1103_v2 = vld [vmem:[#allocation2 + $0x69] sm:$0xff]  ;;  %v1072_v6 = vmax.f32 %v1008_v0, %v1040_v1  ;;  %v1104_v8 = vld [vmem:[#allocation2 + $0x71] sm:$0xff]  ;;  %v4616_v18 = vpop.eup %4615  ;;  %v842_v50 = vadd.f32 1.0, %v4614_v5 }
 0x11e   : > { %7449 = vst [vmem:[#allocation17_spill] sm:$0xff] %v5180_v12  ;;  %v1135_v10 = vld [vmem:[#allocation2 + $0x6a] sm:$0xff]  ;;  %v1136_v11 = vld [vmem:[#allocation2 + $0x72] sm:$0xff]  ;;  %7450 = vst [vmem:[#allocation18_spill] sm:$0xff] %v5185_v19  ;;  %v4618_v38 = vpop.eup %4617  ;;  %v840_v0 = vadd.f32 1.0, %v4616_v18  ;;  %v5200_v30 = vadd.f32 %v4979_v25, %v678_v24 }
 0x11f   : > { %v5175_v7 = vmax.f32 %v1194_v33, %v5095_v35  ;;  %v1167_v17 = vmax.f32 %v1103_v2, %v1135_v10  ;;  %v1168_v22 = vmax.f32 %v1104_v8, %v1136_v11  ;;  %v1006_v53 = vld [vmem:[#allocation2 + $0x4e] sm:$0xff]  ;;  %980 = vst.msk [vmem:[#allocation2 + $0xb0] sm:$0xff] %vm313_vm2, %v5180_v12  ;;  %978 = vst.msk [vmem:[#allocation2 + $0x90] sm:$0xff] %vm313_vm2, %v5185_v19  ;;  %v806_v1 = vmul.f32 1.442695, %v751_v21  ;;  %v4620_v8 = vpop.eup %4619  ;;  %v5197_v59 = vpop.f32.mrb[28].mxu0 }
 0x120   : > { %v1038_v33 = vld [vmem:[#allocation2 + $0x4f] sm:$0xff]  ;;  %v683_v2 = vmul.f32 %v4286_v16, %v4974_v23  ;;  %v4622_v29 = vpop.eup %4621  ;;  %4633 = vrcp.f32 %v842_v50  ;;  %v5202_v35 = vpop.f32.mrb[29].mxu0 }
 0x121   : > { %1259 = vst.msk [vmem:[#allocation3 + $0x28] sm:$0xff] %vm313_vm2, %v5175_v7  ;;  %v1101_v39 = vld [vmem:[#allocation2 + $0x49] sm:$0xff]  ;;  %v1070_v51 = vmax.f32 %v1006_v53, %v1038_v33  ;;  %v1102_v54 = vld [vmem:[#allocation2 + $0x51] sm:$0xff]  ;;  %v1199_v10 = vmax.f32 %v1071_v44, %v1167_v17  ;;  %v1200_v11 = vmax.f32 %v1072_v6, %v1168_v22  ;;  %v843_v53 = vadd.f32 1.0, %v4618_v38  ;;  %v4624_v18 = vpop.eup %4623  ;;  %v5212_v17 = vpop.f32.mrb[30].mxu0 }
 0x122   : > { %v1133_v60 = vld [vmem:[#allocation2 + $0x4a] sm:$0xff]  ;;  %v1134_v62 = vld [vmem:[#allocation2 + $0x52] sm:$0xff]  ;;  %v841_v33 = vadd.f32 1.0, %v4620_v8  ;;  %v4626_v22 = vpop.eup %4625  ;;  %v5215_v24 = vmul.f32 %v4622_v29, %v5052_v48  ;;  %v5218_v38 = vmul.f32 %v4624_v18, %v5059_v57  ;;  %4635 = vrcp.f32 %v840_v0 }
 0x123   : > { %v1165_v40 = vmax.f32 %v1101_v39, %v1133_v60  ;;  %v1166_v5 = vmax.f32 %v1102_v54, %v1134_v62  ;;  %v5205_v21 = vmax.f32 %v1199_v10, %v5119_v4  ;;  %v5208_v16 = vmax.f32 %v1200_v11, %v5130_v27  ;;  %v1011_v39 = vld [vmem:[#allocation2 + $0xa6] sm:$0xff]  ;;  %v5221_v60 = vpop.f32.mrb[31].mxu0 }
 0x124   : > { %v1043_v50 = vld [vmem:[#allocation2 + $0xa7] sm:$0xff]  ;;  %7452 = vst [vmem:[#allocation20_spill] sm:$0xff] %v5215_v24  ;;  %7453 = vst [vmem:[#allocation21_spill] sm:$0xff] %v5218_v38  ;;  %v749_v54 = vsub.f32 0.0, %v5200_v30  ;;  %v5231_v57 = vmul.f32 %v4626_v22, %v5064_v63  ;;  %4637 = vrcp.f32 %v843_v53  ;;  %v4628_v62 = vpop.eup %4627  ;;  %v5238_v29 = vadd.f32 %v4979_v25, %v683_v2 }
 0x125   : > { %7451 = vst [vmem:[#allocation19_spill] sm:$0xff] %v5205_v21  ;;  %v5210_v44 = vmax.f32 %v1069_v58, %v1165_v40  ;;  %v1198_v6 = vmax.f32 %v1070_v51, %v1166_v5  ;;  %1264 = vst.msk [vmem:[#allocation3 + $0x50] sm:$0xff] %vm313_vm2, %v5205_v21  ;;  %v1075_v58 = vmax.f32 %v1011_v39, %v1043_v50  ;;  %v1009_v48 = vld [vmem:[#allocation2 + $0x86] sm:$0xff]  ;;  %4639 = vrcp.f32 %v841_v33  ;;  %v4630_v18 = vpop.eup %4629 }
 0x126   : > { %1265 = vst.msk [vmem:[#allocation3 + $0x58] sm:$0xff] %vm313_vm2, %v5208_v16  ;;  %v1041_v51 = vld [vmem:[#allocation2 + $0x87] sm:$0xff]  ;;  %7454 = vst [vmem:[#allocation22_spill] sm:$0xff] %v5231_v57  ;;  %v1044_v10 = vld [vmem:[#allocation2 + $0xaf] sm:$0xff]  ;;  %v802_v5 = vmul.f32 1.442695, %v749_v54  ;;  %v5245_v39 = vmul.f32 %v4628_v62, %v5068_v3  ;;  %4641 = vpow2.f32 %v806_v1  ;;  %v681_v33 = vmul.f32 %v4974_v23, %v5154_v28  ;;  %v4632_v2 = vpop.eup %4631 }
 0x127   : > { %v5228_v40 = vmax.f32 %v1198_v6, %v5137_v34  ;;  %v1073_v0 = vmax.f32 %v1009_v48, %v1041_v51  ;;  %v1012_v8 = vld [vmem:[#allocation2 + $0xae] sm:$0xff]  ;;  %983 = vst.msk [vmem:[#allocation2 + $0xe8] sm:$0xff] %vm313_vm2, %v5215_v24  ;;  %981 = vst.msk [vmem:[#allocation2 + $0xc8] sm:$0xff] %vm313_vm2, %v5218_v38  ;;  %v844_v3 = vadd.f32 1.0, %v4632_v2  ;;  %v754_v1 = vsub.f32 0.0, %v5238_v29 }
 0x128   : > { %v1107_v11 = vld [vmem:[#allocation2 + $0xa9] sm:$0xff]  ;;  %v1076_v63 = vmax.f32 %v1012_v8, %v1044_v10  ;;  %v1108_v53 = vld [vmem:[#allocation2 + $0xb1] sm:$0xff]  ;;  %984 = vst.msk [vmem:[#allocation2 + $0xf0] sm:$0xff] %vm313_vm2, %v5231_v57  ;;  %7455 = vst [vmem:[#allocation23_spill] sm:$0xff] %v5245_v39  ;;  %v846_v8 = vadd.f32 1.0, %v4630_v18  ;;  %4643 = vpow2.f32 %v802_v5  ;;  %v5253_v28 = vadd.f32 %v4979_v25, %v681_v33 }
 0x129   : > { %1263 = vst.msk [vmem:[#allocation3 + $0x48] sm:$0xff] %vm313_vm2, %v5228_v40  ;;  %v1139_v6 = vld [vmem:[#allocation2 + $0xaa] sm:$0xff]  ;;  %v1140_v22 = vld [vmem:[#allocation2 + $0xb2] sm:$0xff]  ;;  %982 = vst.msk [vmem:[#allocation2 + $0xd0] sm:$0xff] %vm313_vm2, %v5245_v39  ;;  %v812_v5 = vmul.f32 1.442695, %v754_v1 }
 0x12a   : > { %v1171_v50 = vmax.f32 %v1107_v11, %v1139_v6  ;;  %v1172_v54 = vmax.f32 %v1108_v53, %v1140_v22  ;;  %v1010_v48 = vld [vmem:[#allocation2 + $0x8e] sm:$0xff]  ;;  %4645 = vrcp.f32 %v846_v8  ;;  %v752_v18 = vsub.f32 0.0, %v5253_v28 }
 0x12b   : > { %v1042_v51 = vld [vmem:[#allocation2 + $0x8f] sm:$0xff]  ;;  %v684_v22 = vmul.f32 %v5165_v43, %v4974_v23  ;;  %4647 = vrcp.f32 %v844_v3  ;;  %v687_v3 = vmul.f32 %v5197_v59, %v4974_v23 }
 0x12c   : > { %v1105_v27 = vld [vmem:[#allocation2 + $0x89] sm:$0xff]  ;;  %v1074_v10 = vmax.f32 %v1010_v48, %v1042_v51  ;;  %v1106_v4 = vld [vmem:[#allocation2 + $0x91] sm:$0xff]  ;;  %v5255_v62 = vmax.f32 %v1075_v58, %v1171_v50  ;;  %v1204_v11 = vmax.f32 %v1076_v63, %v1172_v54  ;;  %v4634_v48 = vpop.eup %4633  ;;  %4649 = vpow2.f32 %v812_v5 }
 0x12d   : > { %v1137_v34 = vld [vmem:[#allocation2 + $0x8a] sm:$0xff]  ;;  %v1138_v20 = vld [vmem:[#allocation2 + $0x92] sm:$0xff] }
 0x12e   : > { %v1169_v53 = vmax.f32 %v1105_v27, %v1137_v34  ;;  %v1170_v6 = vmax.f32 %v1106_v4, %v1138_v20  ;;  %v5261_v2 = vmax.f32 %v1204_v11, %v5180_v12  ;;  %v1015_v58 = vld [vmem:[#allocation2 + $0xe6] sm:$0xff]  ;;  %v5266_v20 = vmul.f32 %v4634_v48, %v5089_v31  ;;  %v4636_v34 = vpop.eup %4635 }
 0x12f   : > { %v1047_v50 = vld [vmem:[#allocation2 + $0xe7] sm:$0xff]  ;;  %v808_v4 = vmul.f32 1.442695, %v752_v18  ;;  %v5269_v27 = vadd.f32 %v4979_v25, %v684_v22  ;;  %v682_v31 = vmul.f32 %v4974_v23, %v5170_v61  ;;  %v4638_v1 = vpop.eup %4637  ;;  %v1112_v5 = vld [vmem:[#allocation2 + $0xf1] sm:$0xff]  ;;  %v5283_v22 = vmul.f32 %v4636_v34, %v5098_v37 }
 0x130   : > { %7456 = vst [vmem:[#allocation24_spill] sm:$0xff] %v5261_v2  ;;  %v5263_v51 = vmax.f32 %v1073_v0, %v1169_v53  ;;  %v1202_v33 = vmax.f32 %v1074_v10, %v1170_v6  ;;  %v1013_v63 = vld [vmem:[#allocation2 + $0xc6] sm:$0xff]  ;;  %7457 = vst [vmem:[#allocation25_spill] sm:$0xff] %v5266_v20  ;;  %v1079_v0 = vmax.f32 %v1015_v58, %v1047_v50  ;;  %v1016_v8 = vld [vmem:[#allocation2 + $0xee] sm:$0xff]  ;;  %v4640_v48 = vpop.eup %4639 }
 0x131   : > { %1269 = vst.msk [vmem:[#allocation3 + $0x78] sm:$0xff] %vm313_vm2, %v5261_v2  ;;  %v1045_v54 = vld [vmem:[#allocation2 + $0xc7] sm:$0xff]  ;;  %v1048_v10 = vld [vmem:[#allocation2 + $0xef] sm:$0xff]  ;;  %987 = vst.msk [vmem:[#allocation2 + $0x128] sm:$0xff] %vm313_vm2, %v5266_v20  ;;  %4651 = vpow2.f32 %v808_v4  ;;  %v5288_v50 = vmul.f32 %v4638_v1, %v5110_v47  ;;  %v5300_v47 = vadd.f32 %v4979_v25, %v687_v3 }
 0x132   : > { %v5274_v43 = vmax.f32 %v1202_v33, %v5185_v19  ;;  %v1077_v11 = vmax.f32 %v1013_v63, %v1045_v54  ;;  %v1080_v53 = vmax.f32 %v1016_v8, %v1048_v10  ;;  %v1111_v6 = vld [vmem:[#allocation2 + $0xe9] sm:$0xff]  ;;  %7459 = vst [vmem:[#allocation27_spill] sm:$0xff] %v5283_v22  ;;  %v1144_v61 = vld [vmem:[#allocation2 + $0xf2] sm:$0xff]  ;;  %v755_v63 = vsub.f32 0.0, %v5269_v27  ;;  %v4642_v8 = vpop.eup %4641  ;;  %985 = vst.msk [vmem:[#allocation2 + $0x108] sm:$0xff] %vm313_vm2, %v5283_v22 }
 0x133   : > { %v1143_v18 = vld [vmem:[#allocation2 + $0xea] sm:$0xff]  ;;  %v5292_v54 = vadd.f32 %v4979_v25, %v682_v31  ;;  %v1176_v37 = vmax.f32 %v1112_v5, %v1144_v61  ;;  %7460 = vst [vmem:[#allocation28_spill] sm:$0xff] %v5300_v47  ;;  %v4644_v1 = vpop.eup %4643  ;;  %v1142_v31 = vld [vmem:[#allocation2 + $0xd2] sm:$0xff]  ;;  %988 = vst.msk [vmem:[#allocation2 + $0x130] sm:$0xff] %vm313_vm2, %v5288_v50  ;;  %v847_v5 = vadd.f32 1.0, %v4642_v8 }
 0x134   : > { %7458 = vst [vmem:[#allocation26_spill] sm:$0xff] %v5274_v43  ;;  %1267 = vst.msk [vmem:[#allocation3 + $0x68] sm:$0xff] %vm313_vm2, %v5274_v43  ;;  %v1175_v33 = vmax.f32 %v1111_v6, %v1143_v18  ;;  %v1014_v59 = vld [vmem:[#allocation2 + $0xce] sm:$0xff]  ;;  %v5297_v6 = vmul.f32 %v4640_v48, %v5113_v49  ;;  %v814_v61 = vmul.f32 1.442695, %v755_v63  ;;  %v845_v49 = vadd.f32 1.0, %v4644_v1 }
 0x135   : > { %v1046_v58 = vld [vmem:[#allocation2 + $0xcf] sm:$0xff]  ;;  %v753_v48 = vsub.f32 0.0, %v5292_v54  ;;  %4653 = vrcp.f32 %v847_v5 }
 0x136   : > { %v1078_v34 = vmax.f32 %v1014_v59, %v1046_v58  ;;  %v1109_v4 = vld [vmem:[#allocation2 + $0xc9] sm:$0xff]  ;;  %v1110_v10 = vld [vmem:[#allocation2 + $0xd1] sm:$0xff]  ;;  %v5302_v18 = vmax.f32 %v1079_v0, %v1175_v33  ;;  %v1208_v59 = vmax.f32 %v1080_v53, %v1176_v37  ;;  %986 = vst.msk [vmem:[#allocation2 + $0x110] sm:$0xff] %vm313_vm2, %v5297_v6  ;;  %v758_v0 = vsub.f32 0.0, %v5300_v47  ;;  %v4646_v33 = vpop.eup %4645 }
 0x137   : > { %v1141_v12 = vld [vmem:[#allocation2 + $0xca] sm:$0xff]  ;;  %v1174_v58 = vmax.f32 %v1110_v10, %v1142_v31  ;;  %4655 = vrcp.f32 %v845_v49  ;;  %v810_v63 = vmul.f32 1.442695, %v753_v48  ;;  %v4648_v37 = vpop.eup %4647  ;;  %v5318_v1 = vmul.f32 %v4646_v33, %v5140_v36 }
 0x138   : > { %v1173_v19 = vmax.f32 %v1109_v4, %v1141_v12  ;;  %v685_v12 = vmul.f32 %v4974_v23, %v5202_v35  ;;  %v5315_v8 = vmax.f32 %v1208_v59, %v5231_v57  ;;  %v1019_v4 = vld [vmem:[#allocation2 + $0x126] sm:$0xff]  ;;  %4657 = vpow2.f32 %v814_v61  ;;  %v4650_v31 = vpop.eup %4649 }
 0x139   : > { %v1206_v53 = vmax.f32 %v1078_v34, %v1174_v58  ;;  %v1051_v10 = vld [vmem:[#allocation2 + $0x127] sm:$0xff]  ;;  %v5329_v5 = vmul.f32 %v4648_v37, %v5143_v56  ;;  %4659 = vpow2.f32 %v810_v63  ;;  %991 = vst.msk [vmem:[#allocation2 + $0x168] sm:$0xff] %vm313_vm2, %v5318_v1  ;;  %v850_v48 = vadd.f32 1.0, %v4650_v31 }
 0x13a   : > { %v5309_v3 = vmax.f32 %v1077_v11, %v1173_v19  ;;  %7461 = vst [vmem:[#allocation29_spill] sm:$0xff] %v5315_v8  ;;  %v820_v19 = vmul.f32 1.442695, %v758_v0  ;;  %v5321_v11 = vadd.f32 %v4979_v25, %v685_v12  ;;  %1273 = vst.msk [vmem:[#allocation3 + $0x98] sm:$0xff] %vm313_vm2, %v5315_v8  ;;  %v1083_v34 = vmax.f32 %v1019_v4, %v1051_v10  ;;  %v1001_v59 = vld [vmem:[#allocation2 + $0x6] sm:$0xff]  ;;  %v1020_v63 = vld [vmem:[#allocation2 + $0x12e] sm:$0xff] }
 0x13b   : > { %v5326_v35 = vmax.f32 %v1206_v53, %v5245_v39  ;;  %v1033_v36 = vld [vmem:[#allocation2 + $0x7] sm:$0xff]  ;;  %v688_v12 = vmul.f32 %v5212_v17, %v4974_v23  ;;  %v4652_v53 = vpop.eup %4651  ;;  %v1052_v37 = vld [vmem:[#allocation2 + $0x12f] sm:$0xff]  ;;  %989 = vst.msk [vmem:[#allocation2 + $0x148] sm:$0xff] %vm313_vm2, %v5329_v5  ;;  %v686_v10 = vmul.f32 %v4974_v23, %v5221_v60  ;;  %v961_v17 = vpack.c.bf16 %v5288_v50, %v5266_v20 }
 0x13c   : > { %7462 = vst [vmem:[#allocation30_spill] sm:$0xff] %v5321_v11  ;;  %v1097_v58 = vld [vmem:[#allocation2 + $0x9] sm:$0xff]  ;;  %4661 = vpow2.f32 %v820_v19  ;;  %v756_v0 = vsub.f32 0.0, %v5321_v11  ;;  %v960_v19 = vpack.c.bf16 %v5297_v6, %v5283_v22  ;;  %v5349_v31 = vld [vmem:[%s7355_s4 + $0x6] sm:$0x3]  ;;  %v1148_v39 = vld [vmem:[#allocation2 + $0x132] sm:$0xff] }
 0x13d   : > { %7463 = vst [vmem:[#allocation31_spill] sm:$0xff] %v5326_v35  ;;  %v1017_v61 = vld [vmem:[#allocation2 + $0x106] sm:$0xff]  ;;  %1271 = vst.msk [vmem:[#allocation3 + $0x88] sm:$0xff] %vm313_vm2, %v5326_v35  ;;  %4663 = vrcp.f32 %v850_v48  ;;  %v848_v8 = vadd.f32 1.0, %v4652_v53  ;;  %v1018_v60 = vld [vmem:[#allocation2 + $0x10e] sm:$0xff]  ;;  %v5352_v11 = vadd.f32 %v4979_v25, %v688_v12  ;;  %v5355_v20 = vadd.f32 %v4979_v25, %v686_v10 }
 0x13e   : > { %v1049_v49 = vld [vmem:[#allocation2 + $0x107] sm:$0xff]  ;;  %v816_v35 = vmul.f32 1.442695, %v756_v0  ;;  %v1050_v21 = vld [vmem:[#allocation2 + $0x10f] sm:$0xff]  ;;  %4344 = vmatprep.mubr.msk.bf16.mxu1 %vm313_vm2, %v960_v19 }
 0x13f   : > { %v1129_v33 = vld [vmem:[#allocation2 + $0xa] sm:$0xff]  ;;  %v1081_v56 = vmax.f32 %v1017_v61, %v1049_v49  ;;  %v1084_v61 = vmax.f32 %v1020_v63, %v1052_v37  ;;  %v1082_v63 = vmax.f32 %v1018_v60, %v1050_v21  ;;  %v1146_v47 = vld [vmem:[#allocation2 + $0x112] sm:$0xff]  ;;  %4665 = vrcp.f32 %v848_v8  ;;  %4345 = vmatmul.mubr.msk.bf16.vlgmr.msra.gmra.mrb[0].mxu1 %vm313_vm2, %v961_v17  ;;  %v4654_v25 = vpop.eup %4653 }
 0x140   : > { %v1115_v4 = vld [vmem:[#allocation2 + $0x129] sm:$0xff]  ;;  %v1116_v49 = vld [vmem:[#allocation2 + $0x131] sm:$0xff]  ;;  %4361 = vmatpush3.bf16.msra.mxu1 %v5073_v13  ;;  %4667 = vpow2.f32 %v816_v35  ;;  %v757_v21 = vsub.f32 0.0, %v5355_v20  ;;  %v5378_v35 = vmul.f32 %v4654_v25, %v5163_v42 }
 0x141   : > { %v1147_v57 = vld [vmem:[#allocation2 + $0x12a] sm:$0xff]  ;;  %v1180_v23 = vmax.f32 %v1116_v49, %v1148_v39  ;;  %v1161_v39 = vmax.f32 %v1097_v58, %v1129_v33  ;;  %4531 = vmatprep.subr.msk.bf16.mxu1 %vm1615_vm4, %v5349_v31  ;;  %v4656_v8 = vpop.eup %4655 }
 0x142   : > { %v1179_v2 = vmax.f32 %v1115_v4, %v1147_v57  ;;  %v1113_v22 = vld [vmem:[#allocation2 + $0x109] sm:$0xff]  ;;  %v1114_v37 = vld [vmem:[#allocation2 + $0x111] sm:$0xff]  ;;  %v1065_v57 = vmax.f32 %v1001_v59, %v1033_v36  ;;  %v759_v4 = vsub.f32 0.0, %v5352_v11  ;;  %v4658_v59 = vpop.eup %4657  ;;  %v818_v17 = vmul.f32 1.442695, %v757_v21  ;;  %992 = vst.msk [vmem:[#allocation2 + $0x170] sm:$0xff] %vm313_vm2, %v5378_v35 }
 0x143   : > { %v1145_v43 = vld [vmem:[#allocation2 + $0x10a] sm:$0xff]  ;;  %v1212_v0 = vmax.f32 %v1084_v61, %v1180_v23  ;;  %v1178_v12 = vmax.f32 %v1114_v37, %v1146_v47  ;;  %v4660_v61 = vpop.eup %4659  ;;  %v851_v23 = vadd.f32 1.0, %v4658_v59  ;;  %v963_v21 = vpack.c.bf16 %v5378_v35, %v5318_v1 }
 0x144   : > { %v5359_v48 = vmax.f32 %v1083_v34, %v1179_v2  ;;  %v1177_v53 = vmax.f32 %v1113_v22, %v1145_v43  ;;  %v1193_v10 = vmax.f32 %v1065_v57, %v1161_v39  ;;  %v5364_v19 = vld [vmem:[#allocation3 + $0x28] sm:$0xff]  ;;  %v849_v37 = vadd.f32 1.0, %v4660_v61  ;;  %v1389_v39 = vld [vmem:[#allocation3 + $0x38] sm:$0xff] }
 0x145   : > { %v5369_v2 = vmax.f32 %v1212_v0, %v5288_v50  ;;  %v1210_v22 = vmax.f32 %v1082_v63, %v1178_v12  ;;  %v5373_v13 = vld [vmem:[#allocation2 + $0x166] sm:$0xff]  ;;  %v5387_v50 = vmul.f32 %v4656_v8, %v5200_v30  ;;  %v1424_v30 = vld [vmem:[#allocation3 + $0x58] sm:$0xff]  ;;  %v5409_v57 = vmax.f32 %v5210_v44, %v5124_v14 }
 0x146   : > { %v5371_v43 = vmax.f32 %v1081_v56, %v1177_v53  ;;  %v5375_v47 = vld [vmem:[#allocation2 + $0x167] sm:$0xff]  ;;  %v822_v56 = vmul.f32 1.442695, %v759_v4  ;;  %v5399_v60 = vmax.f32 %v1193_v10, %v5080_v26  ;;  %v4662_v63 = vpop.eup %4661  ;;  %v1358_v12 = vmax.f32 %v5047_v45, %v5364_v19  ;;  %v1428_v10 = vld [vmem:[#allocation3 + $0x78] sm:$0xff] }
 0x147   : > { %7464 = vst [vmem:[#allocation32_spill] sm:$0xff] %v5369_v2  ;;  %v1422_v34 = vld [vmem:[#allocation3 + $0x48] sm:$0xff]  ;;  %1277 = vst.msk [vmem:[#allocation3 + $0xb8] sm:$0xff] %vm313_vm2, %v5369_v2  ;;  %v5392_v42 = vmax.f32 %v1210_v22, %v5297_v6  ;;  %v5405_v6 = vmax.f32 %v5151_v9, %v5076_v15  ;;  %v854_v0 = vadd.f32 1.0, %v4662_v63  ;;  %v4664_v25 = vpop.eup %4663  ;;  %v962_v4 = vpack.c.bf16 %v5387_v50, %v5329_v5 }
 0x148   : > { %v5382_v58 = vld [vmem:[#allocation2 + $0x146] sm:$0xff]  ;;  %990 = vst.msk [vmem:[#allocation2 + $0x150] sm:$0xff] %vm313_vm2, %v5387_v50  ;;  %4669 = vpow2.f32 %v822_v56  ;;  %1258 = vst.msk [vmem:[#allocation3 + $0x20] sm:$0xff] %vm313_vm2, %v5399_v60  ;;  %v5415_v53 = vmax.f32 %v1389_v39, %v1422_v34  ;;  %v5423_v44 = vmax.f32 %v1422_v34, %v1424_v30  ;;  %v5430_v45 = vmul.f32 %v4664_v25, %v5238_v29 }
 0x149   : > { %v5384_v33 = vld [vmem:[#allocation2 + $0x147] sm:$0xff]  ;;  %1275 = vst.msk [vmem:[#allocation3 + $0xa8] sm:$0xff] %vm313_vm2, %v5392_v42  ;;  %4671 = vrcp.f32 %v851_v23  ;;  %1260 = vst.msk [vmem:[#allocation3 + $0x30] sm:$0xff] %vm313_vm2, %v5405_v6  ;;  %v5436_v22 = vmax.f32 %v5263_v51, %v5168_v55  ;;  %v4666_v59 = vpop.eup %4665  ;;  %4348 = vmatprep.mubr.msk.bf16.mxu1 %vm313_vm2, %v962_v4  ;;  %v1360_v61 = vmax.f32 %v5364_v19, %v1389_v39  ;;  %v1120_v4 = vld [vmem:[#allocation2 + $0x171] sm:$0xff] }
 0x14a   : > { %v1426_v9 = vld [vmem:[#allocation3 + $0x68] sm:$0xff]  ;;  %4673 = vrcp.f32 %v849_v37  ;;  %1262 = vst.msk [vmem:[#allocation3 + $0x40] sm:$0xff] %vm313_vm2, %v5409_v57  ;;  %v1486_v8 = vmax.f32 %v5056_v52, %v5415_v53  ;;  %v1488_v56 = vmax.f32 %v1358_v12, %v5423_v44  ;;  %995 = vst.msk [vmem:[#allocation2 + $0x1a8] sm:$0xff] %vm313_vm2, %v5430_v45  ;;  %v5446_v29 = vmul.f32 %v4666_v59, %v5253_v28  ;;  %v4668_v63 = vpop.eup %4667 }
 0x14b   : > { %4675 = vrcp.f32 %v854_v0  ;;  %v1430_v34 = vld [vmem:[#allocation3 + $0x88] sm:$0xff]  ;;  %v5441_v23 = vmax.f32 %v1424_v30, %v1426_v9  ;;  %4349 = vmatmul.mubr.msk.bf16.gmra.mrb[4].mxu1 %vm313_vm2, %v963_v21  ;;  %1266 = vst.msk [vmem:[#allocation3 + $0x60] sm:$0xff] %vm313_vm2, %v5436_v22  ;;  %v5458_v19 = vmax.f32 %v1426_v9, %v1428_v10  ;;  %v5460_v30 = vld [vmem:[#allocation3 + $0x98] sm:$0xff]  ;;  %v5462_v0 = vld [vmem:[#allocation3 + $0x50] sm:$0xff]  ;;  %v5470_v25 = vmax.f32 %v5309_v3, %v5218_v38 }
 0x14c   : > { %4677 = vpow2.f32 %v818_v17  ;;  %v5449_v51 = vmax.f32 %v1486_v8, %v5175_v7  ;;  %v5456_v17 = vmax.f32 %v5255_v62, %v5160_v41  ;;  %v1024_v37 = vld [vmem:[#allocation2 + $0x16e] sm:$0xff]  ;;  %v5465_v7 = vmax.f32 %v1488_v56, %v5157_v32  ;;  %993 = vst.msk [vmem:[#allocation2 + $0x188] sm:$0xff] %vm313_vm2, %v5446_v29 }
 0x14d   : > { %v1056_v28 = vld [vmem:[#allocation2 + $0x16f] sm:$0xff]  ;;  %v1490_v12 = vmax.f32 %v1360_v61, %v5441_v23  ;;  %7466 = vst [vmem:[#allocation34_spill] sm:$0xff] %v5470_v25  ;;  %v5472_v62 = vmax.f32 %v1428_v10, %v1430_v34  ;;  %v852_v59 = vadd.f32 1.0, %v4668_v63  ;;  %v1492_v32 = vmax.f32 %v5415_v53, %v5458_v19  ;;  %1270 = vst.msk [vmem:[#allocation3 + $0x80] sm:$0xff] %vm313_vm2, %v5470_v25 }
 0x14e   : > { %7465 = vst [vmem:[#allocation33_spill] sm:$0xff] %v5449_v51  ;;  %v1119_v39 = vld [vmem:[#allocation2 + $0x169] sm:$0xff]  ;;  %v1088_v9 = vmax.f32 %v1024_v37, %v1056_v28  ;;  %v1152_v8 = vld [vmem:[#allocation2 + $0x172] sm:$0xff]  ;;  %1993 = vst.msk [vmem:[#allocation2 + $0x10] sm:$0xff] %vm313_vm2, %v5449_v51  ;;  %v5484_v3 = vmax.f32 %v5302_v18, %v5215_v24 }
 0x14f   : > { %v1151_v21 = vld [vmem:[#allocation2 + $0x16a] sm:$0xff]  ;;  %1268 = vst.msk [vmem:[#allocation3 + $0x70] sm:$0xff] %vm313_vm2, %v5456_v17  ;;  %v1184_v56 = vmax.f32 %v1120_v4, %v1152_v8  ;;  %1995 = vst.msk [vmem:[#allocation2 + $0x30] sm:$0xff] %vm313_vm2, %v5465_v7  ;;  %v5489_v63 = vmax.f32 %v1490_v12, %v5228_v40  ;;  %4679 = vrcp.f32 %v852_v59  ;;  %v5496_v4 = vmax.f32 %v1492_v32, %v5208_v16  ;;  %v1325_v38 = vld [vmem:[#allocation3 + $0x20] sm:$0xff] }
 0x150   : > { %7467 = vst [vmem:[#allocation35_spill] sm:$0xff] %v5484_v3  ;;  %v1183_v10 = vmax.f32 %v1119_v39, %v1151_v21  ;;  %v1022_v61 = vld [vmem:[#allocation2 + $0x14e] sm:$0xff]  ;;  %1272 = vst.msk [vmem:[#allocation3 + $0x90] sm:$0xff] %vm313_vm2, %v5484_v3  ;;  %v5501_v40 = vmax.f32 %v1430_v34, %v5460_v30  ;;  %v7468_v21 = vmax.f32 %v5373_v13, %v5375_v47  ;;  %v7489_v3 = vld [vmem:[#allocation24_spill] sm:$0xff] }
 0x151   : > { %v1054_v37 = vld [vmem:[#allocation2 + $0x14f] sm:$0xff]  ;;  %v1421_v59 = vld [vmem:[#allocation3 + $0x40] sm:$0xff]  ;;  %1997 = vst.msk [vmem:[#allocation2 + $0x50] sm:$0xff] %vm313_vm2, %v5489_v63  ;;  %1999 = vst.msk [vmem:[#allocation2 + $0x70] sm:$0xff] %vm313_vm2, %v5496_v4  ;;  %v7478_v52 = vmax.f32 %v5423_v44, %v5472_v62 }
 0x152   : > { %v1117_v28 = vld [vmem:[#allocation2 + $0x149] sm:$0xff]  ;;  %v1086_v49 = vmax.f32 %v1022_v61, %v1054_v37  ;;  %v1118_v18 = vld [vmem:[#allocation2 + $0x151] sm:$0xff]  ;;  %v4670_v12 = vpop.eup %4669  ;;  %v5506_v8 = vmax.f32 %v7468_v21, %v1183_v10  ;;  %v1216_v61 = vmax.f32 %v1088_v9, %v1184_v56  ;;  %v5516_v13 = vmax.f32 %v1421_v59, %v5462_v0 }
 0x153   : > { %v1149_v36 = vld [vmem:[#allocation2 + $0x14a] sm:$0xff]  ;;  %v1150_v39 = vld [vmem:[#allocation2 + $0x152] sm:$0xff]  ;;  %v4672_v16 = vpop.eup %4671  ;;  %v855_v32 = vadd.f32 1.0, %v4670_v12  ;;  %v7471_v9 = vmax.f32 %v5382_v58, %v5384_v33  ;;  %v1425_v12 = vld [vmem:[#allocation3 + $0x60] sm:$0xff] }
 0x154   : > { %v1181_v37 = vmax.f32 %v1117_v28, %v1149_v36  ;;  %v1182_v53 = vmax.f32 %v1118_v18, %v1150_v39  ;;  %v1388_v24 = vld [vmem:[#allocation3 + $0x30] sm:$0xff]  ;;  %v4674_v47 = vpop.eup %4673  ;;  %v5521_v36 = vmax.f32 %v1216_v61, %v5378_v35  ;;  %v5528_v28 = vld [vmem:[#allocation2 + $0x1a6] sm:$0xff]  ;;  %v5533_v39 = vmul.f32 %v4672_v16, %v5269_v27 }
 0x155   : > { %v5510_v41 = vmax.f32 %v1388_v24, %v1421_v59  ;;  %v5512_v34 = vld [vmem:[#allocation3 + $0x10] sm:$0xff]  ;;  %v5530_v18 = vld [vmem:[#allocation2 + $0x1a7] sm:$0xff]  ;;  %v4676_v21 = vpop.eup %4675  ;;  %v5538_v35 = vmul.f32 %v4674_v47, %v5292_v54  ;;  %4681 = vrcp.f32 %v855_v32  ;;  %v1359_v16 = vmax.f32 %v1325_v38, %v1388_v24 }
 0x156   : > { %7469 = vst [vmem:[#allocation36_spill] sm:$0xff] %v5512_v34  ;;  %v1357_v55 = vmax.f32 %v5512_v34, %v1325_v38  ;;  %7470 = vst [vmem:[#allocation37_spill] sm:$0xff] %v5521_v36  ;;  %v5526_v10 = vmax.f32 %v7471_v9, %v1181_v37  ;;  %v1214_v56 = vmax.f32 %v1086_v49, %v1182_v53  ;;  %v4678_v33 = vpop.eup %4677  ;;  %v5547_v27 = vld [vmem:[#allocation2 + $0x186] sm:$0xff]  ;;  %v1427_v32 = vld [vmem:[#allocation3 + $0x70] sm:$0xff] }
 0x157   : > { %v1485_v58 = vmax.f32 %v5049_v46, %v5510_v41  ;;  %1281 = vst.msk [vmem:[#allocation3 + $0xd8] sm:$0xff] %vm313_vm2, %v5521_v36  ;;  %v5549_v53 = vld [vmem:[#allocation2 + $0x187] sm:$0xff]  ;;  %996 = vst.msk [vmem:[#allocation2 + $0x1b0] sm:$0xff] %vm313_vm2, %v5533_v39  ;;  %v5566_v59 = vld [vmem:[#allocation2 + $0x32] sm:$0xff] }
 0x158   : > { %v5545_v49 = vmax.f32 %v1214_v56, %v5387_v50  ;;  %v7473_v54 = vld [vmem:[#allocation28_spill] sm:$0xff]  ;;  %v1487_v37 = vmax.f32 %v1357_v55, %v5516_v13  ;;  %994 = vst.msk [vmem:[#allocation2 + $0x190] sm:$0xff] %vm313_vm2, %v5538_v35  ;;  %v853_v50 = vadd.f32 1.0, %v4678_v33  ;;  %v5564_v56 = vld [vmem:[#allocation2 + $0x31] sm:$0xff]  ;;  %v5612_v34 = vld [vmem:[#allocation3 + $0xa8] sm:$0xff] }
 0x159   : > { %v5554_v61 = vmul.f32 %v4676_v21, %v7473_v54  ;;  %v5562_v9 = vmax.f32 %v1485_v58, %v5399_v60  ;;  %v5569_v21 = vmax.f32 %v5462_v0, %v1425_v12  ;;  %v1429_v55 = vld [vmem:[#allocation3 + $0x80] sm:$0xff]  ;;  %v5580_v60 = vmax.f32 %v1425_v12, %v1427_v32  ;;  %v5589_v54 = vld [vmem:[#allocation2 + $0x51] sm:$0xff]  ;;  %v4680_v36 = vpop.eup %4679 }
 0x15a   : > { %7472 = vst [vmem:[#allocation38_spill] sm:$0xff] %v5545_v49  ;;  %1279 = vst.msk [vmem:[#allocation3 + $0xc8] sm:$0xff] %vm313_vm2, %v5545_v49  ;;  %v5576_v24 = vmax.f32 %v1487_v37, %v5405_v6  ;;  %v964_v58 = vpack.c.bf16 %v5538_v35, %v5446_v29  ;;  %4683 = vrcp.f32 %v853_v50  ;;  %v5591_v6 = vld [vmem:[#allocation2 + $0x52] sm:$0xff]  ;;  %v965_v12 = vpack.c.bf16 %v5533_v39, %v5430_v45 }
 0x15b   : > { %7474 = vst [vmem:[#allocation28_spill] sm:$0xff] %v5562_v9  ;;  %999 = vst.msk [vmem:[#allocation2 + $0x1e8] sm:$0xff] %vm313_vm2, %v5554_v61  ;;  %v1549_v0 = vpack.c.bf16 %v5449_v51, %v5562_v9  ;;  %v1489_v33 = vmax.f32 %v1359_v16, %v5569_v21  ;;  %v5595_v37 = vld [vmem:[#allocation3 + $0x90] sm:$0xff]  ;;  %v1491_v16 = vmax.f32 %v5510_v41, %v5580_v60 }
 0x15c   : > { %7475 = vst [vmem:[#allocation39_spill] sm:$0xff] %v5580_v60  ;;  %1992 = vst.msk [vmem:[#allocation2 + $0x8] sm:$0xff] %vm313_vm2, %v5562_v9  ;;  %v1550_v50 = vpack.c.bf16 %v5465_v7, %v5576_v24  ;;  %v5605_v47 = vld [vmem:[#allocation2 + $0x71] sm:$0xff]  ;;  %4352 = vmatprep.mubr.msk.bf16.mxu1 %vm313_vm2, %v964_v58  ;;  %v5610_v26 = vmax.f32 %v1427_v32, %v1429_v55  ;;  %v5629_v32 = vsel %vm1615_vm4, %v5349_v31, 0 }
 0x15d   : > { %1994 = vst.msk [vmem:[#allocation2 + $0x28] sm:$0xff] %vm313_vm2, %v5576_v24  ;;  %v5607_v15 = vld [vmem:[#allocation2 + $0x72] sm:$0xff]  ;;  %4294 = vmatprep.mubr.msk.bf16.mxu0 %vm313_vm2, %v1549_v0  ;;  %v5616_v49 = vmax.f32 %v1489_v33, %v5409_v57  ;;  %4353 = vmatmul.mubr.msk.bf16.gmra.mrb[8].mxu1 %vm313_vm2, %v965_v12  ;;  %7480 = vst [vmem:[#allocation41_spill] sm:$0xff] %v5629_v32  ;;  %v5641_v38 = vmax.f32 %v1429_v55, %v5595_v37 }
 0x15e   : > { %7476 = vst [vmem:[#allocation40_spill] sm:$0xff] %v5610_v26  ;;  %v7477_v41 = vld [vmem:[#allocation26_spill] sm:$0xff]  ;;  %4295 = vmatmul.mubr.msk.bf16.vlgmr.msra.gmra.mrb[32].mxu0 %vm313_vm2, %v1550_v50  ;;  %v7482_v57 = vld [vmem:[#allocation19_spill] sm:$0xff]  ;;  %v1493_v12 = vmax.f32 %v5516_v13, %v5610_v26  ;;  %v5657_v55 = vmax.f32 %v5460_v30, %v5612_v34  ;;  %v7487_v50 = vld [vmem:[#allocation4_spill] sm:$0xff] }
 0x15f   : > { %v5625_v58 = vmax.f32 %v7478_v52, %v7477_v41  ;;  %v7481_v9 = vld [vmem:[#allocation30_spill] sm:$0xff]  ;;  %v5636_v33 = vmax.f32 %v1491_v16, %v7482_v57  ;;  %v1551_v31 = vpack.c.bf16 %v5489_v63, %v5616_v49  ;;  %1996 = vst.msk [vmem:[#allocation2 + $0x48] sm:$0xff] %vm313_vm2, %v5616_v49  ;;  %4327 = vmatpush3.bf16.msra.mxu0 %v7487_v50 }
 0x160   : > { %v5632_v0 = vmul.f32 %v4680_v36, %v7481_v9  ;;  %7483 = vst [vmem:[#allocation30_spill] sm:$0xff] %v5641_v38  ;;  %v1028_v52 = vld [vmem:[#allocation2 + $0x1ae] sm:$0xff]  ;;  %v1496_v36 = vmax.f32 %v5441_v23, %v5501_v40  ;;  %v7484_v9 = vld [vmem:[#allocation27_spill] sm:$0xff]  ;;  %v1495_v30 = vmax.f32 %v5569_v21, %v5641_v38 }
 0x161   : > { %7479 = vst [vmem:[#allocation26_spill] sm:$0xff] %v5625_v58  ;;  %v1060_v44 = vld [vmem:[#allocation2 + $0x1af] sm:$0xff]  ;;  %2001 = vst.msk [vmem:[#allocation2 + $0x90] sm:$0xff] %vm313_vm2, %v5625_v58  ;;  %v5653_v13 = vmax.f32 %v5371_v43, %v7484_v9  ;;  %v1552_v23 = vpack.c.bf16 %v5496_v4, %v5636_v33  ;;  %v5667_v43 = vmax.f32 %v1493_v12, %v5436_v22  ;;  %v4682_v9 = vpop.eup %4681  ;;  %4298 = vmatprep.mubr.msk.bf16.mxu0 %vm313_vm2, %v1551_v31 }
 0x162   : > { %v1123_v41 = vld [vmem:[#allocation2 + $0x1a9] sm:$0xff]  ;;  %7486 = vst [vmem:[#allocation27_spill] sm:$0xff] %v5657_v55  ;;  %v1092_v16 = vmax.f32 %v1028_v52, %v1060_v44  ;;  %v1124_v57 = vld [vmem:[#allocation2 + $0x1b1] sm:$0xff]  ;;  %997 = vst.msk [vmem:[#allocation2 + $0x1c8] sm:$0xff] %vm313_vm2, %v5632_v0  ;;  %v5673_v25 = vmax.f32 %v1496_v36, %v7489_v3  ;;  %v1498_v22 = vmax.f32 %v5458_v19, %v5657_v55 }
 0x163   : > { %7485 = vst [vmem:[#allocation19_spill] sm:$0xff] %v5653_v13  ;;  %v1155_v32 = vld [vmem:[#allocation2 + $0x1aa] sm:$0xff]  ;;  %v1156_v46 = vld [vmem:[#allocation2 + $0x1b2] sm:$0xff]  ;;  %1998 = vst.msk [vmem:[#allocation2 + $0x68] sm:$0xff] %vm313_vm2, %v5636_v33  ;;  %v5687_v3 = vmax.f32 %v1495_v30, %v5456_v17  ;;  %v7490_v19 = vmax.f32 %v5528_v28, %v5530_v18 }
 0x164   : > { %7488 = vst [vmem:[#allocation4_spill] sm:$0xff] %v5667_v43  ;;  %v1187_v52 = vmax.f32 %v1123_v41, %v1155_v32  ;;  %v1188_v44 = vmax.f32 %v1124_v57, %v1156_v46  ;;  %v1026_v50 = vld [vmem:[#allocation2 + $0x18e] sm:$0xff]  ;;  %1274 = vst.msk [vmem:[#allocation3 + $0xa0] sm:$0xff] %vm313_vm2, %v5653_v13  ;;  %v5680_v46 = vmul.f32 %v4682_v9, %v5352_v11  ;;  %v1436_v41 = vld [vmem:[#allocation3 + $0xb8] sm:$0xff] }
 0x165   : > { %v1058_v51 = vld [vmem:[#allocation2 + $0x18f] sm:$0xff]  ;;  %v1553_v32 = vpack.c.bf16 %v5625_v58, %v5667_v43  ;;  %2000 = vst.msk [vmem:[#allocation2 + $0x88] sm:$0xff] %vm313_vm2, %v5667_v43  ;;  %v5694_v11 = vld [vmem:[#allocation2 + $0x1e6] sm:$0xff]  ;;  %2003 = vst.msk [vmem:[#allocation2 + $0xb0] sm:$0xff] %vm313_vm2, %v5673_v25 }
 0x166   : > { %v1121_v2 = vld [vmem:[#allocation2 + $0x189] sm:$0xff]  ;;  %v1090_v12 = vmax.f32 %v1026_v50, %v1058_v51  ;;  %v1122_v26 = vld [vmem:[#allocation2 + $0x191] sm:$0xff]  ;;  %v5692_v51 = vmax.f32 %v7490_v19, %v1187_v52  ;;  %v1220_v31 = vmax.f32 %v1092_v16, %v1188_v44  ;;  %1000 = vst.msk [vmem:[#allocation2 + $0x1f0] sm:$0xff] %vm313_vm2, %v5680_v46  ;;  %2002 = vst.msk [vmem:[#allocation2 + $0xa8] sm:$0xff] %vm313_vm2, %v5687_v3  ;;  %v4684_v52 = vpop.eup %4683  ;;  %4299 = vmatmul.mubr.msk.bf16.gmra.mrb[36].mxu0 %vm313_vm2, %v1552_v23 }
 0x167   : > { %v1153_v21 = vld [vmem:[#allocation2 + $0x18a] sm:$0xff]  ;;  %v1154_v38 = vld [vmem:[#allocation2 + $0x192] sm:$0xff]  ;;  %4302 = vmatprep.mubr.msk.bf16.mxu0 %vm313_vm2, %v1553_v32  ;;  %v5744_v23 = vmax.f32 %v5612_v34, %v1436_v41 }
 0x168   : > { %v1185_v36 = vmax.f32 %v1121_v2, %v1153_v21  ;;  %v1186_v57 = vmax.f32 %v1122_v26, %v1154_v38  ;;  %v5696_v9 = vld [vmem:[#allocation2 + $0x1e7] sm:$0xff]  ;;  %v2059_v30 = vld [vmem:[#allocation2 + $0x2f] sm:$0xff]  ;;  %v7491_v38 = vld [vmem:[#allocation31_spill] sm:$0xff]  ;;  %v5714_v44 = vmax.f32 %v1220_v31, %v5533_v39  ;;  %v7493_v21 = vmax.f32 %v5547_v27, %v5549_v53 }
 0x169   : > { %v2026_v50 = vld [vmem:[#allocation2 + $0x26] sm:$0xff]  ;;  %v2027_v28 = vld [vmem:[#allocation2 + $0x2e] sm:$0xff]  ;;  %v5711_v16 = vmax.f32 %v1498_v22, %v7491_v38  ;;  %v5724_v2 = vmul.f32 %v4684_v52, %v5355_v20  ;;  %v7497_v52 = vmax.f32 %v5589_v54, %v5591_v6 }
 0x16a   : > { %v2058_v18 = vld [vmem:[#allocation2 + $0x27] sm:$0xff]  ;;  %7492 = vst [vmem:[#allocation24_spill] sm:$0xff] %v5714_v44  ;;  %v5719_v19 = vmax.f32 %v7493_v21, %v1185_v36  ;;  %v1218_v17 = vmax.f32 %v1090_v12, %v1186_v57  ;;  %v2091_v22 = vmax.f32 %v2027_v28, %v2059_v30  ;;  %1285 = vst.msk [vmem:[#allocation3 + $0xf8] sm:$0xff] %vm313_vm2, %v5714_v44 }
 0x16b   : > { %v2090_v26 = vmax.f32 %v2026_v50, %v2058_v18  ;;  %v2122_v13 = vld [vmem:[#allocation2 + $0x29] sm:$0xff]  ;;  %2005 = vst.msk [vmem:[#allocation2 + $0xd0] sm:$0xff] %vm313_vm2, %v5711_v16  ;;  %998 = vst.msk [vmem:[#allocation2 + $0x1d0] sm:$0xff] %vm313_vm2, %v5724_v2  ;;  %v7496_v57 = vmax.f32 %v5564_v56, %v5566_v59  ;;  %v966_v30 = vpack.c.bf16 %v5724_v2, %v5632_v0 }
 0x16c   : > { %v2154_v55 = vld [vmem:[#allocation2 + $0x2a] sm:$0xff]  ;;  %v5736_v20 = vmax.f32 %v1218_v17, %v5538_v35  ;;  %v1500_v59 = vmax.f32 %v5472_v62, %v5744_v23 }
 0x16d   : > { %v5721_v60 = vld [vmem:[#allocation3 + $0xc8] sm:$0xff]  ;;  %v2186_v38 = vmax.f32 %v2122_v13, %v2154_v55  ;;  %4356 = vmatprep.mubr.msk.bf16.mxu1 %vm313_vm2, %v966_v30 }
 0x16e   : > { %v2028_v58 = vld [vmem:[#allocation2 + $0x46] sm:$0xff]  ;;  %v2029_v43 = vld [vmem:[#allocation2 + $0x4e] sm:$0xff]  ;;  %7495 = vst [vmem:[#allocation31_spill] sm:$0xff] %v5736_v20  ;;  %1283 = vst.msk [vmem:[#allocation3 + $0xe8] sm:$0xff] %vm313_vm2, %v5736_v20  ;;  %v5768_v56 = vmax.f32 %v1436_v41, %v5721_v60 }
 0x16f   : > { %v2060_v39 = vld [vmem:[#allocation2 + $0x47] sm:$0xff]  ;;  %v2061_v55 = vld [vmem:[#allocation2 + $0x4f] sm:$0xff]  ;;  %v2218_v35 = vmax.f32 %v2090_v26, %v2186_v38 }
 0x170   : > { %v7494_v27 = vld [vmem:[#allocation25_spill] sm:$0xff]  ;;  %v2092_v31 = vmax.f32 %v2028_v58, %v2060_v39  ;;  %v2219_v58 = vmax.f32 %v2091_v22, %v7496_v57  ;;  %v2093_v50 = vmax.f32 %v2029_v43, %v2061_v55  ;;  %v5783_v55 = vld [vmem:[#allocation2 + $0x12] sm:$0xff] }
 0x171   : > { %v5731_v53 = vmax.f32 %v5359_v48, %v7494_v27  ;;  %v5738_v12 = vld [vmem:[#allocation2 + $0x1c6] sm:$0xff]  ;;  %v5748_v48 = vmax.f32 %v5526_v10, %v5329_v5  ;;  %v2031_v10 = vld [vmem:[#allocation2 + $0x6e] sm:$0xff]  ;;  %v5771_v43 = vmax.f32 %v2218_v35, %v5576_v24 }
 0x172   : > { %v5740_v13 = vld [vmem:[#allocation2 + $0x1c7] sm:$0xff]  ;;  %v2063_v18 = vld [vmem:[#allocation2 + $0x6f] sm:$0xff]  ;;  %v5774_v26 = vmax.f32 %v2219_v58, %v5465_v7  ;;  %v2221_v21 = vmax.f32 %v2093_v50, %v7497_v52 }
 0x173   : > { %v1093_v36 = vmax.f32 %v5738_v12, %v5740_v13  ;;  %v2124_v32 = vld [vmem:[#allocation2 + $0x49] sm:$0xff]  ;;  %1276 = vst.msk [vmem:[#allocation3 + $0xb0] sm:$0xff] %vm313_vm2, %v5731_v53  ;;  %1278 = vst.msk [vmem:[#allocation3 + $0xc0] sm:$0xff] %vm313_vm2, %v5748_v48  ;;  %v5781_v27 = vld [vmem:[#allocation2 + $0x11] sm:$0xff] }
 0x174   : > { %v2156_v17 = vld [vmem:[#allocation2 + $0x4a] sm:$0xff]  ;;  %2282 = vst.msk [vmem:[#allocation3 + $0x30] sm:$0xff] %vm313_vm2, %v5771_v43  ;;  %2283 = vst.msk [vmem:[#allocation3 + $0x38] sm:$0xff] %vm313_vm2, %v5774_v26  ;;  %v7521_v12 = vld [vmem:[#allocation35_spill] sm:$0xff] }
 0x175   : > { %v2030_v34 = vld [vmem:[#allocation2 + $0x66] sm:$0xff]  ;;  %v2188_v5 = vmax.f32 %v2124_v32, %v2156_v17  ;;  %v1032_v41 = vld [vmem:[#allocation2 + $0x1ee] sm:$0xff]  ;;  %v2095_v32 = vmax.f32 %v2031_v10, %v2063_v18  ;;  %v5804_v10 = vmax.f32 %v5506_v8, %v5318_v1  ;;  %v7501_v1 = vmax.f32 %v5605_v47, %v5607_v15  ;;  %v1452_v47 = vld [vmem:[#allocation3 + $0x138] sm:$0xff] }
 0x176   : > { %v2062_v28 = vld [vmem:[#allocation2 + $0x67] sm:$0xff]  ;;  %v1064_v57 = vld [vmem:[#allocation2 + $0x1ef] sm:$0xff] }
 0x177   : > { %v2094_v22 = vmax.f32 %v2030_v34, %v2062_v28  ;;  %v2126_v38 = vld [vmem:[#allocation2 + $0x69] sm:$0xff]  ;;  %v2220_v35 = vmax.f32 %v2092_v31, %v2188_v5  ;;  %v1096_v6 = vmax.f32 %v1032_v41, %v1064_v57  ;;  %v1128_v50 = vld [vmem:[#allocation2 + $0x1f1] sm:$0xff]  ;;  %v5790_v28 = vmax.f32 %v2221_v21, %v5489_v63  ;;  %1280 = vst.msk [vmem:[#allocation3 + $0xd0] sm:$0xff] %vm313_vm2, %v5804_v10 }
 0x178   : > { %v2158_v39 = vld [vmem:[#allocation2 + $0x6a] sm:$0xff]  ;;  %v1160_v34 = vld [vmem:[#allocation2 + $0x1f2] sm:$0xff]  ;;  %v7499_v31 = vpack.c.bf16 %v5680_v46, %v5554_v61  ;;  %v1502_v5 = vmax.f32 %v5501_v40, %v5768_v56  ;;  %v2223_v8 = vmax.f32 %v2095_v32, %v7501_v1 }
 0x179   : > { %v5779_v62 = vld [vmem:[#allocation2 + $0x86] sm:$0xff]  ;;  %v2190_v7 = vmax.f32 %v2126_v38, %v2158_v39  ;;  %v1192_v18 = vmax.f32 %v1128_v50, %v1160_v34  ;;  %v5807_v30 = vmax.f32 %v2220_v35, %v5616_v49  ;;  %v5809_v52 = vld [vmem:[#allocation2 + $0x8e] sm:$0xff]  ;;  %v5815_v41 = vld [vmem:[#allocation3 + $0xf8] sm:$0xff]  ;;  %2285 = vst.msk [vmem:[#allocation3 + $0x48] sm:$0xff] %vm313_vm2, %v5790_v28  ;;  %v7502_v35 = vpack.c.bf16 %v5673_v25, %v5687_v3 }
 0x17a   : > { %v1127_v24 = vld [vmem:[#allocation2 + $0x1e9] sm:$0xff]  ;;  %4357 = vmatmul.mubr.msk.bf16.gmra.mrb[12].mxu1 %vm313_vm2, %v7499_v31  ;;  %v5813_v39 = vld [vmem:[#allocation3 + $0x120] sm:$0xff]  ;;  %v2161_v1 = vld [vmem:[#allocation2 + $0x92] sm:$0xff] }
 0x17b   : > { %v7498_v58 = vld [vmem:[#allocation29_spill] sm:$0xff]  ;;  %7500 = vst [vmem:[#allocation25_spill] sm:$0xff] %v5813_v39  ;;  %v1451_v40 = vld [vmem:[#allocation3 + $0x130] sm:$0xff]  ;;  %4303 = vmatmul.mubr.msk.bf16.gmra.mrb[40].mxu0 %vm313_vm2, %v7502_v35  ;;  %2284 = vst.msk [vmem:[#allocation3 + $0x40] sm:$0xff] %vm313_vm2, %v5807_v30 }
 0x17c   : > { %v5787_v54 = vmax.f32 %v1500_v59, %v7498_v58  ;;  %v1159_v17 = vld [vmem:[#allocation2 + $0x1ea] sm:$0xff]  ;;  %v2222_v59 = vmax.f32 %v2094_v22, %v2190_v7  ;;  %v5829_v7 = vmax.f32 %v1502_v5, %v5392_v42  ;;  %v1224_v58 = vmax.f32 %v1096_v6, %v1192_v18 }
 0x17d   : > { %v1191_v63 = vmax.f32 %v1127_v24, %v1159_v17  ;;  %v2064_v21 = vld [vmem:[#allocation2 + $0x87] sm:$0xff]  ;;  %v2065_v38 = vld [vmem:[#allocation2 + $0x8f] sm:$0xff] }
 0x17e   : > { %2007 = vst.msk [vmem:[#allocation2 + $0xf0] sm:$0xff] %vm313_vm2, %v5787_v54  ;;  %v2096_v49 = vmax.f32 %v5779_v62, %v2064_v21  ;;  %v2097_v22 = vmax.f32 %v5809_v52, %v2065_v38  ;;  %v2128_v57 = vld [vmem:[#allocation2 + $0x89] sm:$0xff]  ;;  %v2129_v24 = vld [vmem:[#allocation2 + $0x91] sm:$0xff]  ;;  %v7503_v62 = vmax.f32 %v5694_v11, %v5696_v9  ;;  %v5837_v31 = vmax.f32 %v2222_v59, %v5636_v33 }
 0x17f   : > { %v1419_v15 = vld [vmem:[#allocation3 + $0x128] sm:$0xff]  ;;  %v1126_v52 = vld [vmem:[#allocation2 + $0x1d1] sm:$0xff]  ;;  %v5844_v11 = vmax.f32 %v2223_v8, %v5496_v4  ;;  %2009 = vst.msk [vmem:[#allocation2 + $0x110] sm:$0xff] %vm313_vm2, %v5829_v7  ;;  %v5850_v33 = vmax.f32 %v5719_v19, %v5446_v29  ;;  %v5854_v9 = vmax.f32 %v5692_v51, %v5430_v45  ;;  %v5857_v6 = vmax.f32 %v1224_v58, %v5680_v46 }
 0x180   : > { %v1223_v32 = vmax.f32 %v7503_v62, %v1191_v63  ;;  %v1030_v50 = vld [vmem:[#allocation2 + $0x1ce] sm:$0xff]  ;;  %2286 = vst.msk [vmem:[#allocation3 + $0x50] sm:$0xff] %vm313_vm2, %v5837_v31  ;;  %v2193_v51 = vmax.f32 %v2129_v24, %v2161_v1  ;;  %v2034_v19 = vld [vmem:[#allocation2 + $0xa6] sm:$0xff] }
 0x181   : > { %v1062_v17 = vld [vmem:[#allocation2 + $0x1cf] sm:$0xff]  ;;  %7504 = vst [vmem:[#allocation29_spill] sm:$0xff] %v5844_v11  ;;  %7505 = vst [vmem:[#allocation42_spill] sm:$0xff] %v5850_v33  ;;  %v2066_v35 = vld [vmem:[#allocation2 + $0xa7] sm:$0xff] }
 0x182   : > { %v1125_v34 = vld [vmem:[#allocation2 + $0x1c9] sm:$0xff]  ;;  %v1094_v5 = vmax.f32 %v1030_v50, %v1062_v17  ;;  %v1158_v38 = vld [vmem:[#allocation2 + $0x1d2] sm:$0xff]  ;;  %7506 = vst [vmem:[#allocation43_spill] sm:$0xff] %v5854_v9  ;;  %7507 = vst [vmem:[#allocation44_spill] sm:$0xff] %v5857_v6  ;;  %v5864_v8 = vmax.f32 %v1223_v32, %v5554_v61  ;;  %v5875_v61 = vmax.f32 %v5813_v39, %v1451_v40 }
 0x183   : > { %v1157_v21 = vld [vmem:[#allocation2 + $0x1ca] sm:$0xff]  ;;  %v1190_v18 = vmax.f32 %v1126_v52, %v1158_v38  ;;  %2287 = vst.msk [vmem:[#allocation3 + $0x58] sm:$0xff] %vm313_vm2, %v5844_v11  ;;  %1282 = vst.msk [vmem:[#allocation3 + $0xe0] sm:$0xff] %vm313_vm2, %v5850_v33  ;;  %v2098_v32 = vmax.f32 %v2034_v19, %v2066_v35  ;;  %v5886_v17 = vmax.f32 %v1419_v15, %v1452_v47  ;;  %v2163_v38 = vld [vmem:[#allocation2 + $0xb2] sm:$0xff] }
 0x184   : > { %v1189_v63 = vmax.f32 %v1125_v34, %v1157_v21  ;;  %v5859_v59 = vld [vmem:[#allocation3 + $0xe8] sm:$0xff]  ;;  %7508 = vst [vmem:[#allocation45_spill] sm:$0xff] %v5864_v8  ;;  %1284 = vst.msk [vmem:[#allocation3 + $0xf0] sm:$0xff] %vm313_vm2, %v5854_v9  ;;  %v2131_v50 = vld [vmem:[#allocation2 + $0xb1] sm:$0xff]  ;;  %v2225_v34 = vmax.f32 %v2097_v22, %v2193_v51 }
 0x185   : > { %v2160_v4 = vld [vmem:[#allocation2 + $0x8a] sm:$0xff]  ;;  %7509 = vst [vmem:[#allocation46_spill] sm:$0xff] %v5875_v61  ;;  %1289 = vst.msk [vmem:[#allocation3 + $0x118] sm:$0xff] %vm313_vm2, %v5857_v6  ;;  %v1222_v24 = vmax.f32 %v1094_v5, %v1190_v18  ;;  %v5896_v15 = vld [vmem:[#allocation2 + $0xd2] sm:$0xff] }
 0x186   : > { %v2192_v45 = vmax.f32 %v2128_v57, %v2160_v4  ;;  %v2035_v46 = vld [vmem:[#allocation2 + $0xae] sm:$0xff]  ;;  %v5882_v57 = vmax.f32 %v1093_v36, %v1189_v63  ;;  %1288 = vst.msk [vmem:[#allocation3 + $0x110] sm:$0xff] %vm313_vm2, %v5864_v8  ;;  %7510 = vst [vmem:[#allocation47_spill] sm:$0xff] %v5886_v17  ;;  %v1433_v4 = vld [vmem:[#allocation3 + $0xa0] sm:$0xff]  ;;  %v2195_v63 = vmax.f32 %v2131_v50, %v2163_v38 }
 0x187   : > { %v2067_v62 = vld [vmem:[#allocation2 + $0xaf] sm:$0xff]  ;;  %v5891_v36 = vmax.f32 %v1222_v24, %v5724_v2  ;;  %v1465_v18 = vmax.f32 %v5595_v37, %v1433_v4  ;;  %v7512_v47 = vld [vmem:[#allocation4_spill] sm:$0xff]  ;;  %v7516_v50 = vld [vmem:[#allocation39_spill] sm:$0xff] }
 0x188   : > { %v2130_v58 = vld [vmem:[#allocation2 + $0xa9] sm:$0xff]  ;;  %v2224_v40 = vmax.f32 %v2096_v49, %v2192_v45  ;;  %v2099_v52 = vmax.f32 %v2035_v46, %v2067_v62  ;;  %v5894_v1 = vld [vmem:[#allocation2 + $0xd1] sm:$0xff]  ;;  %v1437_v24 = vld [vmem:[#allocation3 + $0xc0] sm:$0xff] }
 0x189   : > { %v2162_v21 = vld [vmem:[#allocation2 + $0xaa] sm:$0xff]  ;;  %v5910_v37 = vld [vmem:[#allocation2 + $0xf2] sm:$0xff]  ;;  %1287 = vst.msk [vmem:[#allocation3 + $0x108] sm:$0xff] %vm313_vm2, %v5891_v36 }
 0x18a   : > { %v2194_v5 = vmax.f32 %v2130_v58, %v2162_v21  ;;  %v1435_v49 = vld [vmem:[#allocation3 + $0xb0] sm:$0xff]  ;;  %v1450_v22 = vld [vmem:[#allocation3 + $0x128] sm:$0xff]  ;;  %v5899_v45 = vmax.f32 %v2224_v40, %v7512_v47  ;;  %v2227_v58 = vmax.f32 %v2099_v52, %v2195_v63  ;;  %v1497_v40 = vmax.f32 %v7516_v50, %v1465_v18  ;;  %v5933_v47 = vld [vmem:[#allocation3 + $0xd8] sm:$0xff] }
 0x18b   : > { %v7514_v51 = vld [vmem:[#allocation26_spill] sm:$0xff]  ;;  %v5906_v46 = vmax.f32 %v1433_v4, %v1435_v49  ;;  %v2024_v50 = vld [vmem:[#allocation2 + $0x6] sm:$0xff] }
 0x18c   : > { %7513 = vst [vmem:[#allocation4_spill] sm:$0xff] %v5899_v45  ;;  %v5902_v19 = vmax.f32 %v2225_v34, %v7514_v51  ;;  %v5908_v35 = vld [vmem:[#allocation2 + $0xf1] sm:$0xff]  ;;  %v2226_v62 = vmax.f32 %v2098_v32, %v2194_v5  ;;  %2288 = vst.msk [vmem:[#allocation3 + $0x60] sm:$0xff] %vm313_vm2, %v5899_v45  ;;  %v7517_v32 = vld [vmem:[#allocation40_spill] sm:$0xff]  ;;  %v5929_v5 = vmax.f32 %v1435_v49, %v1437_v24 }
 0x18d   : > { %v5917_v21 = vld [vmem:[#allocation2 + $0x111] sm:$0xff]  ;;  %v1499_v52 = vmax.f32 %v7517_v32, %v5906_v46  ;;  %v5942_v2 = vmax.f32 %v2227_v58, %v5673_v25  ;;  %v5949_v49 = vmax.f32 %v5721_v60, %v5933_v47  ;;  %v2056_v63 = vld [vmem:[#allocation2 + $0x7] sm:$0xff] }
 0x18e   : > { %7515 = vst [vmem:[#allocation26_spill] sm:$0xff] %v5902_v19  ;;  %v5919_v38 = vld [vmem:[#allocation2 + $0x112] sm:$0xff]  ;;  %2289 = vst.msk [vmem:[#allocation3 + $0x68] sm:$0xff] %vm313_vm2, %v5902_v19  ;;  %v5939_v34 = vmax.f32 %v2226_v62, %v5687_v3  ;;  %v2120_v14 = vld [vmem:[#allocation2 + $0x9] sm:$0xff]  ;;  %v2088_v58 = vmax.f32 %v2024_v50, %v2056_v63 }
 0x18f   : > { %v5921_v4 = vld [vmem:[#allocation3 + $0xd0] sm:$0xff]  ;;  %7519 = vst [vmem:[#allocation40_spill] sm:$0xff] %v5942_v2  ;;  %v5952_v6 = vmax.f32 %v1499_v52, %v7521_v12  ;;  %2291 = vst.msk [vmem:[#allocation3 + $0x78] sm:$0xff] %vm313_vm2, %v5942_v2  ;;  %v7523_v60 = vld [vmem:[#allocation27_spill] sm:$0xff] }
 0x190   : > { %v5936_v51 = vmax.f32 %v1437_v24, %v5921_v4  ;;  %v2025_v13 = vld [vmem:[#allocation2 + $0xe] sm:$0xff]  ;;  %7518 = vst [vmem:[#allocation39_spill] sm:$0xff] %v5939_v34  ;;  %v1417_v24 = vld [vmem:[#allocation3 + $0x118] sm:$0xff]  ;;  %2290 = vst.msk [vmem:[#allocation3 + $0x70] sm:$0xff] %vm313_vm2, %v5939_v34  ;;  %v1504_v12 = vmax.f32 %v7523_v60, %v5949_v49 }
 0x191   : > { %v7520_v42 = vld [vmem:[#allocation34_spill] sm:$0xff]  ;;  %v2441_v63 = vld [vmem:[#allocation3 + $0x48] sm:$0xff]  ;;  %2006 = vst.msk [vmem:[#allocation2 + $0xe8] sm:$0xff] %vm313_vm2, %v5952_v6  ;;  %v7524_v50 = vld [vmem:[#allocation19_spill] sm:$0xff] }
 0x192   : > { %v5945_v32 = vmax.f32 %v1497_v40, %v7520_v42  ;;  %v2057_v29 = vld [vmem:[#allocation2 + $0xf] sm:$0xff]  ;;  %v1503_v25 = vmax.f32 %v1465_v18, %v5936_v51  ;;  %v1482_v42 = vmax.f32 %v1417_v24, %v1450_v22  ;;  %v2440_v18 = vld [vmem:[#allocation3 + $0x40] sm:$0xff]  ;;  %v1556_v22 = vpack.c.bf16 %v5787_v54, %v5952_v6  ;;  %v5989_v19 = vld [vmem:[#allocation3 + $0x38] sm:$0xff] }
 0x193   : > { %v7522_v3 = vld [vmem:[#allocation30_spill] sm:$0xff]  ;;  %v2089_v52 = vmax.f32 %v2025_v13, %v2057_v29  ;;  %v7525_v29 = vmax.f32 %v5859_v59, %v5815_v41  ;;  %v7526_v60 = vld [vmem:[#allocation32_spill] sm:$0xff] }
 0x194   : > { %v1501_v62 = vmax.f32 %v7522_v3, %v5929_v5  ;;  %v2152_v8 = vld [vmem:[#allocation2 + $0xa] sm:$0xff]  ;;  %v1555_v40 = vpack.c.bf16 %v5711_v16, %v5945_v32  ;;  %2004 = vst.msk [vmem:[#allocation2 + $0xc8] sm:$0xff] %vm313_vm2, %v5945_v32  ;;  %v5975_v3 = vmax.f32 %v1503_v25, %v5731_v53  ;;  %v5984_v61 = vmax.f32 %v1504_v12, %v7526_v60  ;;  %v2443_v53 = vld [vmem:[#allocation3 + $0x58] sm:$0xff] }
 0x195   : > { %v2184_v17 = vmax.f32 %v2120_v14, %v2152_v8  ;;  %v5977_v2 = vld [vmem:[#allocation3 + $0x30] sm:$0xff]  ;;  %v1514_v13 = vmax.f32 %v7525_v29, %v1482_v42  ;;  %v1441_v8 = vld [vmem:[#allocation3 + $0xe0] sm:$0xff]  ;;  %v1442_v25 = vld [vmem:[#allocation3 + $0xe8] sm:$0xff]  ;;  %v6028_v44 = vmax.f32 %v2441_v63, %v2443_v53 }
 0x196   : > { %v5972_v24 = vmax.f32 %v1501_v62, %v7524_v50  ;;  %v2442_v34 = vld [vmem:[#allocation3 + $0x50] sm:$0xff]  ;;  %4306 = vmatprep.mubr.msk.bf16.mxu0 %vm313_vm2, %v1555_v40  ;;  %v7527_v62 = vmax.f32 %v5781_v27, %v5783_v55  ;;  %v5992_v14 = vmax.f32 %v5977_v2, %v2440_v18  ;;  %2010 = vst.msk [vmem:[#allocation2 + $0x128] sm:$0xff] %vm313_vm2, %v5975_v3  ;;  %v6008_v40 = vld [vmem:[#allocation3 + $0xf8] sm:$0xff]  ;;  %2011 = vst.msk [vmem:[#allocation2 + $0x130] sm:$0xff] %vm313_vm2, %v5984_v61 }
 0x197   : > { %4307 = vmatmul.mubr.msk.bf16.gmra.mrb[44].mxu0 %vm313_vm2, %v1556_v22  ;;  %v2216_v27 = vmax.f32 %v2088_v58, %v2184_v17  ;;  %v6002_v55 = vmax.f32 %v5989_v19, %v2441_v63  ;;  %v6004_v59 = vmax.f32 %v2440_v18, %v2442_v34  ;;  %v6006_v42 = vld [vmem:[#allocation3 + $0xf0] sm:$0xff]  ;;  %v6011_v12 = vmax.f32 %v1514_v13, %v5891_v36  ;;  %v7529_v17 = vld [vmem:[#allocation33_spill] sm:$0xff]  ;;  %v6020_v29 = vld [vmem:[#allocation3 + $0x60] sm:$0xff] }
 0x198   : > { %v2217_v50 = vmax.f32 %v2089_v52, %v7527_v62  ;;  %v1557_v41 = vpack.c.bf16 %v5829_v7, %v5972_v24  ;;  %2008 = vst.msk [vmem:[#allocation2 + $0x108] sm:$0xff] %vm313_vm2, %v5972_v24  ;;  %v1558_v52 = vpack.c.bf16 %v5984_v61, %v5975_v3  ;;  %v7530_v22 = vld [vmem:[#allocation5_spill] sm:$0xff]  ;;  %v7531_v62 = vld [vmem:[#allocation28_spill] sm:$0xff]  ;;  %v7532_v13 = vld [vmem:[#allocation6_spill] sm:$0xff]  ;;  %v6031_v9 = vmax.f32 %v5921_v4, %v1441_v8 }
 0x199   : > { %7528 = vst [vmem:[#allocation34_spill] sm:$0xff] %v6011_v12  ;;  %v2504_v18 = vmax.f32 %v7530_v22, %v5992_v14  ;;  %v6022_v60 = vld [vmem:[#allocation3 + $0x68] sm:$0xff]  ;;  %v2248_v36 = vmax.f32 %v2216_v27, %v7531_v62  ;;  %v2505_v45 = vmax.f32 %v7532_v13, %v6002_v55  ;;  %2021 = vst.msk [vmem:[#allocation2 + $0x1d0] sm:$0xff] %vm313_vm2, %v6011_v12 }
 0x19a   : > { %v2249_v58 = vmax.f32 %v2217_v50, %v7529_v17  ;;  %4310 = vmatprep.mubr.msk.bf16.mxu0 %vm313_vm2, %v1557_v41  ;;  %7533 = vst [vmem:[#allocation35_spill] sm:$0xff] %v6031_v9  ;;  %v6037_v50 = vmax.f32 %v5933_v47, %v1442_v25  ;;  %v6040_v41 = vmax.f32 %v1441_v8, %v6006_v42  ;;  %v2039_v20 = vld [vmem:[#allocation2 + $0xee] sm:$0xff] }
 0x19b   : > { %v1476_v27 = vmax.f32 %v1442_v25, %v6008_v40  ;;  %v6044_v17 = vmax.f32 %v2442_v34, %v6020_v29  ;;  %v2036_v63 = vld [vmem:[#allocation2 + $0xc6] sm:$0xff]  ;;  %v2037_v22 = vld [vmem:[#allocation2 + $0xce] sm:$0xff]  ;;  %2280 = vst.msk [vmem:[#allocation3 + $0x20] sm:$0xff] %vm313_vm2, %v2248_v36  ;;  %v6047_v62 = vmax.f32 %v2504_v18, %v2248_v36  ;;  %v1505_v47 = vmax.f32 %v5906_v46, %v6031_v9 }
 0x19c   : > { %2281 = vst.msk [vmem:[#allocation3 + $0x28] sm:$0xff] %vm313_vm2, %v2249_v58  ;;  %7534 = vst [vmem:[#allocation30_spill] sm:$0xff] %v6037_v50  ;;  %v2068_v4 = vld [vmem:[#allocation2 + $0xc7] sm:$0xff]  ;;  %v6049_v13 = vmax.f32 %v2505_v45, %v2249_v58  ;;  %v6054_v8 = vmax.f32 %v2443_v53, %v6022_v60  ;;  %v2069_v12 = vld [vmem:[#allocation2 + $0xcf] sm:$0xff]  ;;  %v1506_v33 = vmax.f32 %v5744_v23, %v6037_v50 }
 0x19d   : > { %7535 = vst [vmem:[#allocation27_spill] sm:$0xff] %v6040_v41  ;;  %7536 = vst [vmem:[#allocation19_spill] sm:$0xff] %v6047_v62  ;;  %v2100_v25 = vmax.f32 %v2036_v63, %v2068_v4  ;;  %v2132_v39 = vld [vmem:[#allocation2 + $0xc9] sm:$0xff]  ;;  %v1507_v11 = vmax.f32 %v5929_v5, %v6040_v41  ;;  %v1508_v18 = vmax.f32 %v5768_v56, %v1476_v27 }
 0x19e   : > { %7537 = vst [vmem:[#allocation32_spill] sm:$0xff] %v6049_v13  ;;  %v2164_v34 = vld [vmem:[#allocation2 + $0xca] sm:$0xff]  ;;  %v2101_v45 = vmax.f32 %v2037_v22, %v2069_v12  ;;  %v2568_v53 = vpack.c.bf16 %v6049_v13, %v6047_v62  ;;  %2830 = vst.msk [vmem:[#allocation2 + $0x8] sm:$0xff] %vm313_vm2, %v6047_v62  ;;  %v6068_v23 = vmax.f32 %v1505_v47, %v5748_v48 }
 0x19f   : > { %v2196_v58 = vmax.f32 %v2132_v39, %v2164_v34  ;;  %v2038_v36 = vld [vmem:[#allocation2 + $0xe6] sm:$0xff]  ;;  %2831 = vst.msk [vmem:[#allocation2 + $0x10] sm:$0xff] %vm313_vm2, %v6049_v13  ;;  %v2071_v56 = vld [vmem:[#allocation2 + $0xef] sm:$0xff]  ;;  %v6076_v4 = vmax.f32 %v1507_v11, %v5804_v10  ;;  %v7540_v48 = vmax.f32 %v5894_v1, %v5896_v15  ;;  %4311 = vmatmul.mubr.msk.bf16.gmra.mrb[48].mxu0 %vm313_vm2, %v1558_v52 }
 0x1a0   : > { %v2070_v46 = vld [vmem:[#allocation2 + $0xe7] sm:$0xff]  ;;  %v7538_v63 = vld [vmem:[#allocation38_spill] sm:$0xff]  ;;  %v2103_v13 = vmax.f32 %v2039_v20, %v2071_v56  ;;  %2012 = vst.msk [vmem:[#allocation2 + $0x148] sm:$0xff] %vm313_vm2, %v6068_v23  ;;  %4362 = vmatprep.mubr.msk.bf16.mxu1 %vm313_vm2, %v2568_v53  ;;  %v7541_v53 = vmax.f32 %v5908_v35, %v5910_v37 }
 0x1a1   : > { %v6070_v5 = vld [vmem:[#allocation3 + $0x108] sm:$0xff]  ;;  %v2102_v12 = vmax.f32 %v2038_v36, %v2070_v46  ;;  %v6073_v22 = vmax.f32 %v1506_v33, %v7538_v63  ;;  %v2228_v41 = vmax.f32 %v2100_v25, %v2196_v58  ;;  %v2229_v47 = vmax.f32 %v2101_v45, %v7540_v48  ;;  %2014 = vst.msk [vmem:[#allocation2 + $0x168] sm:$0xff] %vm313_vm2, %v6076_v4  ;;  %v6102_v15 = vld [vmem:[#allocation2 + $0x1d1] sm:$0xff] }
 0x1a2   : > { %v2134_v39 = vld [vmem:[#allocation2 + $0xe9] sm:$0xff]  ;;  %v6104_v52 = vld [vmem:[#allocation2 + $0x1d2] sm:$0xff]  ;;  %v2231_v56 = vmax.f32 %v2103_v13, %v7541_v53 }
 0x1a3   : > { %v2166_v27 = vld [vmem:[#allocation2 + $0xea] sm:$0xff]  ;;  %v1559_v1 = vpack.c.bf16 %v6073_v22, %v6068_v23  ;;  %2013 = vst.msk [vmem:[#allocation2 + $0x150] sm:$0xff] %vm313_vm2, %v6073_v22  ;;  %v6107_v25 = vmax.f32 %v2228_v41, %v5945_v32  ;;  %v6110_v45 = vmax.f32 %v2229_v47, %v5711_v16  ;;  %v6122_v16 = vmax.f32 %v6008_v40, %v6070_v5 }
 0x1a4   : > { %v7539_v34 = vld [vmem:[#allocation37_spill] sm:$0xff]  ;;  %v2198_v50 = vmax.f32 %v2134_v39, %v2166_v27  ;;  %v6128_v37 = vmax.f32 %v2231_v56, %v5787_v54  ;;  %v2139_v13 = vld [vmem:[#allocation2 + $0x131] sm:$0xff]  ;;  %v7542_v40 = vmax.f32 %v5917_v21, %v5919_v38  ;;  %v2346_v54 = vld [vmem:[#allocation3 + $0x20] sm:$0xff] }
 0x1a5   : > { %v6079_v62 = vmax.f32 %v1508_v18, %v7539_v34  ;;  %v2040_v9 = vld [vmem:[#allocation2 + $0x106] sm:$0xff]  ;;  %v2041_v36 = vld [vmem:[#allocation2 + $0x10e] sm:$0xff]  ;;  %4314 = vmatprep.mubr.msk.bf16.mxu0 %vm313_vm2, %v1559_v1  ;;  %2292 = vst.msk [vmem:[#allocation3 + $0x80] sm:$0xff] %vm313_vm2, %v6107_v25  ;;  %2293 = vst.msk [vmem:[#allocation3 + $0x88] sm:$0xff] %vm313_vm2, %v6110_v45  ;;  %v2380_v21 = vmax.f32 %v2346_v54, %v5977_v2 }
 0x1a6   : > { %v2072_v46 = vld [vmem:[#allocation2 + $0x107] sm:$0xff]  ;;  %v2073_v10 = vld [vmem:[#allocation2 + $0x10f] sm:$0xff]  ;;  %v2230_v58 = vmax.f32 %v2102_v12, %v2198_v50  ;;  %2295 = vst.msk [vmem:[#allocation3 + $0x98] sm:$0xff] %vm313_vm2, %v6128_v37 }
 0x1a7   : > { %v2104_v11 = vmax.f32 %v2040_v9, %v2072_v46  ;;  %v2136_v33 = vld [vmem:[#allocation2 + $0x109] sm:$0xff]  ;;  %v1560_v20 = vpack.c.bf16 %v6079_v62, %v6076_v4  ;;  %2015 = vst.msk [vmem:[#allocation2 + $0x170] sm:$0xff] %vm313_vm2, %v6079_v62  ;;  %v6100_v9 = vmax.f32 %v5882_v57, %v5632_v0  ;;  %v2105_v57 = vmax.f32 %v2041_v36, %v2073_v10  ;;  %v2171_v36 = vld [vmem:[#allocation2 + $0x132] sm:$0xff]  ;;  %v7543_v1 = vld [vmem:[#allocation36_spill] sm:$0xff] }
 0x1a8   : > { %v2168_v18 = vld [vmem:[#allocation2 + $0x10a] sm:$0xff]  ;;  %v6125_v35 = vmax.f32 %v2230_v58, %v5952_v6  ;;  %v4814_v58 = vld [vmem:[#allocation3 + $0x18] sm:$0xff] }
 0x1a9   : > { %v2042_v39 = vld [vmem:[#allocation2 + $0x126] sm:$0xff]  ;;  %v2200_v27 = vmax.f32 %v2136_v33, %v2168_v18  ;;  %v2043_v63 = vld [vmem:[#allocation2 + $0x12e] sm:$0xff]  ;;  %1286 = vst.msk [vmem:[#allocation3 + $0x100] sm:$0xff] %vm313_vm2, %v6100_v9  ;;  %v2233_v6 = vmax.f32 %v2105_v57, %v7542_v40  ;;  %v1510_v33 = vmax.f32 %v5949_v49, %v6122_v16  ;;  %v2203_v18 = vmax.f32 %v2139_v13, %v2171_v36 }
 0x1aa   : > { %v2074_v34 = vld [vmem:[#allocation2 + $0x127] sm:$0xff]  ;;  %v2075_v48 = vld [vmem:[#allocation2 + $0x12f] sm:$0xff]  ;;  %2294 = vst.msk [vmem:[#allocation3 + $0x90] sm:$0xff] %vm313_vm2, %v6125_v35  ;;  %4315 = vmatmul.mubr.msk.bf16.gmra.mrb[52].mxu0 %vm313_vm2, %v1560_v20 }
 0x1ab   : > { %v2106_v32 = vmax.f32 %v2042_v39, %v2074_v34  ;;  %v2107_v50 = vmax.f32 %v2043_v63, %v2075_v48  ;;  %v2138_v41 = vld [vmem:[#allocation2 + $0x129] sm:$0xff]  ;;  %v2232_v47 = vmax.f32 %v2104_v11, %v2200_v27  ;;  %v2378_v11 = vmax.f32 %v7543_v1, %v2346_v54 }
 0x1ac   : > { %v2170_v12 = vld [vmem:[#allocation2 + $0x12a] sm:$0xff]  ;;  %v6149_v56 = vmax.f32 %v2233_v6, %v5829_v7 }
 0x1ad   : > { %v2202_v46 = vmax.f32 %v2138_v41, %v2170_v12  ;;  %v2347_v10 = vld [vmem:[#allocation3 + $0x28] sm:$0xff]  ;;  %v6146_v38 = vmax.f32 %v2232_v47, %v5972_v24  ;;  %v6152_v34 = vld [vmem:[#allocation3 + $0x70] sm:$0xff]  ;;  %v2235_v48 = vmax.f32 %v2107_v50, %v2203_v18  ;;  %v2506_v41 = vmax.f32 %v2378_v11, %v6004_v59 }
 0x1ae   : > { %v2379_v53 = vmax.f32 %v4814_v58, %v2347_v10  ;;  %v2044_v57 = vld [vmem:[#allocation2 + $0x146] sm:$0xff]  ;;  %v2381_v63 = vmax.f32 %v2347_v10, %v5989_v19  ;;  %v2045_v12 = vld [vmem:[#allocation2 + $0x14e] sm:$0xff]  ;;  %2297 = vst.msk [vmem:[#allocation3 + $0xa8] sm:$0xff] %vm313_vm2, %v6149_v56  ;;  %v2508_v50 = vmax.f32 %v2380_v21, %v6044_v17 }
 0x1af   : > { %v2234_v39 = vmax.f32 %v2106_v32, %v2202_v46  ;;  %v2076_v27 = vld [vmem:[#allocation2 + $0x147] sm:$0xff]  ;;  %v2077_v2 = vld [vmem:[#allocation2 + $0x14f] sm:$0xff]  ;;  %2296 = vst.msk [vmem:[#allocation3 + $0xa0] sm:$0xff] %vm313_vm2, %v6146_v38  ;;  %v6166_v46 = vld [vmem:[#allocation3 + $0x78] sm:$0xff]  ;;  %v6169_v20 = vmax.f32 %v2235_v48, %v5984_v61 }
 0x1b0   : > { %v2507_v13 = vmax.f32 %v2379_v53, %v6028_v44  ;;  %v2108_v40 = vmax.f32 %v2044_v57, %v2076_v27  ;;  %v2140_v24 = vld [vmem:[#allocation2 + $0x149] sm:$0xff]  ;;  %v2109_v32 = vmax.f32 %v2045_v12, %v2077_v2  ;;  %v2141_v47 = vld [vmem:[#allocation2 + $0x151] sm:$0xff]  ;;  %v2509_v36 = vmax.f32 %v2381_v63, %v6054_v8 }
 0x1b1   : > { %v6158_v7 = vmax.f32 %v2234_v39, %v5975_v3  ;;  %v2172_v6 = vld [vmem:[#allocation2 + $0x14a] sm:$0xff]  ;;  %v2173_v19 = vld [vmem:[#allocation2 + $0x152] sm:$0xff]  ;;  %v6172_v3 = vmax.f32 %v2506_v41, %v5771_v43  ;;  %v6180_v61 = vmax.f32 %v2508_v50, %v5807_v30  ;;  %2299 = vst.msk [vmem:[#allocation3 + $0xb8] sm:$0xff] %vm313_vm2, %v6169_v20  ;;  %v1445_v30 = vld [vmem:[#allocation3 + $0x100] sm:$0xff] }
 0x1b2   : > { %v6175_v54 = vmax.f32 %v2507_v13, %v5774_v26  ;;  %v2204_v10 = vmax.f32 %v2140_v24, %v2172_v6  ;;  %v2046_v18 = vld [vmem:[#allocation2 + $0x166] sm:$0xff]  ;;  %v2047_v1 = vld [vmem:[#allocation2 + $0x16e] sm:$0xff]  ;;  %v2205_v58 = vmax.f32 %v2141_v47, %v2173_v19  ;;  %v6183_v43 = vmax.f32 %v2509_v36, %v5790_v28  ;;  %v1448_v19 = vld [vmem:[#allocation3 + $0x118] sm:$0xff] }
 0x1b3   : > { %v2078_v11 = vld [vmem:[#allocation2 + $0x167] sm:$0xff]  ;;  %v2079_v53 = vld [vmem:[#allocation2 + $0x16f] sm:$0xff]  ;;  %2298 = vst.msk [vmem:[#allocation3 + $0xb0] sm:$0xff] %vm313_vm2, %v6158_v7  ;;  %2832 = vst.msk [vmem:[#allocation2 + $0x28] sm:$0xff] %vm313_vm2, %v6172_v3  ;;  %v6195_v28 = vmax.f32 %v6020_v29, %v6152_v34  ;;  %v6209_v29 = vmax.f32 %v6022_v60, %v6166_v46  ;;  %v6214_v47 = vmax.f32 %v6006_v42, %v1445_v30 }
 0x1b4   : > { %v2110_v21 = vmax.f32 %v2046_v18, %v2078_v11  ;;  %v2142_v39 = vld [vmem:[#allocation2 + $0x169] sm:$0xff]  ;;  %v2143_v57 = vld [vmem:[#allocation2 + $0x171] sm:$0xff]  ;;  %v2569_v26 = vpack.c.bf16 %v6175_v54, %v6172_v3  ;;  %2833 = vst.msk [vmem:[#allocation2 + $0x30] sm:$0xff] %vm313_vm2, %v6175_v54  ;;  %v2236_v27 = vmax.f32 %v2108_v40, %v2204_v10  ;;  %v2111_v63 = vmax.f32 %v2047_v1, %v2079_v53  ;;  %v2448_v18 = vld [vmem:[#allocation3 + $0x80] sm:$0xff] }
 0x1b5   : > { %v2174_v48 = vld [vmem:[#allocation2 + $0x16a] sm:$0xff]  ;;  %v2175_v41 = vld [vmem:[#allocation2 + $0x172] sm:$0xff]  ;;  %v2237_v13 = vmax.f32 %v2109_v32, %v2205_v58  ;;  %v2570_v24 = vpack.c.bf16 %v6183_v43, %v6180_v61  ;;  %2834 = vst.msk [vmem:[#allocation2 + $0x48] sm:$0xff] %vm313_vm2, %v6180_v61  ;;  %2835 = vst.msk [vmem:[#allocation2 + $0x50] sm:$0xff] %vm313_vm2, %v6183_v43  ;;  %v2510_v32 = vmax.f32 %v5992_v14, %v6195_v28 }
 0x1b6   : > { %v2206_v12 = vmax.f32 %v2142_v39, %v2174_v48  ;;  %v2207_v2 = vmax.f32 %v2143_v57, %v2175_v41  ;;  %4363 = vmatmul.mubr.msk.bf16.vlgmr.msra.gmra.mrb[16].mxu1 %vm313_vm2, %v2569_v26  ;;  %v6205_v40 = vmax.f32 %v2236_v27, %v6068_v23  ;;  %v1447_v6 = vld [vmem:[#allocation3 + $0x110] sm:$0xff]  ;;  %v7544_v50 = vld [vmem:[#allocation41_spill] sm:$0xff]  ;;  %v2511_v60 = vmax.f32 %v6002_v55, %v6209_v29  ;;  %v7545_v1 = vld [vmem:[#allocation31_spill] sm:$0xff] }
 0x1b7   : > { %4395 = vmatpush3.bf16.msra.mxu1 %v7544_v50  ;;  %v6218_v36 = vmax.f32 %v2237_v13, %v6073_v22  ;;  %4366 = vmatprep.mubr.msk.bf16.mxu1 %vm313_vm2, %v2570_v24  ;;  %v6224_v14 = vmax.f32 %v2510_v32, %v5837_v31  ;;  %v1509_v42 = vmax.f32 %v5936_v51, %v6214_v47  ;;  %v6236_v11 = vld [vmem:[#allocation3 + $0x88] sm:$0xff]  ;;  %v6238_v58 = vld [vmem:[#allocation3 + $0x90] sm:$0xff] }
 0x1b8   : > { %v2238_v10 = vmax.f32 %v2110_v21, %v2206_v12  ;;  %v2239_v23 = vmax.f32 %v2111_v63, %v2207_v2  ;;  %v6232_v22 = vmax.f32 %v1510_v33, %v7545_v1  ;;  %2300 = vst.msk [vmem:[#allocation3 + $0xc0] sm:$0xff] %vm313_vm2, %v6205_v40  ;;  %v1479_v51 = vmax.f32 %v1445_v30, %v1447_v6  ;;  %v7546_v33 = vld [vmem:[#allocation29_spill] sm:$0xff]  ;;  %v7547_v21 = vld [vmem:[#allocation42_spill] sm:$0xff]  ;;  %v7549_v63 = vld [vmem:[#allocation35_spill] sm:$0xff] }
 0x1b9   : > { %2301 = vst.msk [vmem:[#allocation3 + $0xc8] sm:$0xff] %vm313_vm2, %v6218_v36  ;;  %v1480_v49 = vmax.f32 %v6070_v5, %v1448_v19  ;;  %v6250_v53 = vmax.f32 %v2511_v60, %v7546_v33  ;;  %2836 = vst.msk [vmem:[#allocation2 + $0x68] sm:$0xff] %vm313_vm2, %v6224_v14  ;;  %v6255_v39 = vmax.f32 %v1509_v42, %v7547_v21  ;;  %v7550_v41 = vld [vmem:[#allocation30_spill] sm:$0xff]  ;;  %v7552_v1 = vld [vmem:[#allocation43_spill] sm:$0xff] }
 0x1ba   : > { %v6241_v55 = vmax.f32 %v2238_v10, %v6076_v4  ;;  %v6244_v31 = vmax.f32 %v2239_v23, %v6079_v62  ;;  %2017 = vst.msk [vmem:[#allocation2 + $0x190] sm:$0xff] %vm313_vm2, %v6232_v22  ;;  %v7548_v62 = vld [vmem:[#allocation25_spill] sm:$0xff]  ;;  %v6261_v57 = vmax.f32 %v6152_v34, %v2448_v18  ;;  %v1511_v48 = vmax.f32 %v7549_v63, %v1479_v51  ;;  %v6285_v10 = vld [vmem:[#allocation3 + $0x98] sm:$0xff] }
 0x1bb   : > { %v1481_v4 = vmax.f32 %v1447_v6, %v7548_v62  ;;  %v2864_v26 = vld [vmem:[#allocation2 + $0x26] sm:$0xff]  ;;  %v2865_v27 = vld [vmem:[#allocation2 + $0x2e] sm:$0xff]  ;;  %v1512_v30 = vmax.f32 %v7550_v41, %v1480_v49  ;;  %v6271_v13 = vmax.f32 %v6166_v46, %v6236_v11  ;;  %v6274_v34 = vmax.f32 %v2448_v18, %v6238_v58  ;;  %2837 = vst.msk [vmem:[#allocation2 + $0x70] sm:$0xff] %vm313_vm2, %v6250_v53  ;;  %v7551_v46 = vld [vmem:[#allocation27_spill] sm:$0xff] }
 0x1bc   : > { %v2896_v5 = vld [vmem:[#allocation2 + $0x27] sm:$0xff]  ;;  %2302 = vst.msk [vmem:[#allocation3 + $0xd0] sm:$0xff] %vm313_vm2, %v6241_v55  ;;  %2303 = vst.msk [vmem:[#allocation3 + $0xd8] sm:$0xff] %vm313_vm2, %v6244_v31  ;;  %v2897_v12 = vld [vmem:[#allocation2 + $0x2f] sm:$0xff]  ;;  %v2571_v6 = vpack.c.bf16 %v6250_v53, %v6224_v14  ;;  %v1561_v19 = vpack.c.bf16 %v6232_v22, %v6255_v39  ;;  %v6288_v51 = vmax.f32 %v1511_v48, %v7552_v1 }
 0x1bd   : > { %v2928_v2 = vmax.f32 %v2864_v26, %v2896_v5  ;;  %v2960_v24 = vld [vmem:[#allocation2 + $0x29] sm:$0xff]  ;;  %v2961_v32 = vld [vmem:[#allocation2 + $0x31] sm:$0xff]  ;;  %2016 = vst.msk [vmem:[#allocation2 + $0x188] sm:$0xff] %vm313_vm2, %v6255_v39  ;;  %v1513_v50 = vmax.f32 %v7551_v46, %v1481_v4  ;;  %v2929_v23 = vmax.f32 %v2865_v27, %v2897_v12  ;;  %v7553_v49 = vld [vmem:[#allocation24_spill] sm:$0xff]  ;;  %v2512_v21 = vmax.f32 %v6004_v59, %v6261_v57 }
 0x1be   : > { %v2992_v18 = vld [vmem:[#allocation2 + $0x2a] sm:$0xff]  ;;  %v2993_v60 = vld [vmem:[#allocation2 + $0x32] sm:$0xff]  ;;  %v6291_v33 = vmax.f32 %v1512_v30, %v7553_v49  ;;  %4367 = vmatmul.mubr.msk.bf16.gmra.mrb[20].mxu1 %vm313_vm2, %v2571_v6  ;;  %4318 = vmatprep.mubr.msk.bf16.mxu0 %vm313_vm2, %v1561_v19  ;;  %2018 = vst.msk [vmem:[#allocation2 + $0x1a8] sm:$0xff] %vm313_vm2, %v6288_v51 }
 0x1bf   : > { %v2866_v42 = vld [vmem:[#allocation2 + $0x46] sm:$0xff]  ;;  %v3024_v62 = vmax.f32 %v2960_v24, %v2992_v18  ;;  %v3025_v26 = vmax.f32 %v2961_v32, %v2993_v60  ;;  %v2867_v5 = vld [vmem:[#allocation2 + $0x4e] sm:$0xff]  ;;  %v6298_v27 = vmax.f32 %v1513_v50, %v6100_v9  ;;  %v2513_v24 = vmax.f32 %v6028_v44, %v6271_v13 }
 0x1c0   : > { %v2898_v63 = vld [vmem:[#allocation2 + $0x47] sm:$0xff]  ;;  %v2899_v4 = vld [vmem:[#allocation2 + $0x4f] sm:$0xff]  ;;  %v1562_v59 = vpack.c.bf16 %v6291_v33, %v6288_v51  ;;  %2019 = vst.msk [vmem:[#allocation2 + $0x1b0] sm:$0xff] %vm313_vm2, %v6291_v33 }
 0x1c1   : > { %v2930_v48 = vmax.f32 %v2866_v42, %v2898_v63  ;;  %v2931_v41 = vmax.f32 %v2867_v5, %v2899_v4  ;;  %v2962_v12 = vld [vmem:[#allocation2 + $0x49] sm:$0xff]  ;;  %v2963_v30 = vld [vmem:[#allocation2 + $0x51] sm:$0xff]  ;;  %v3056_v32 = vmax.f32 %v2928_v2, %v3024_v62  ;;  %v3057_v9 = vmax.f32 %v2929_v23, %v3025_v26  ;;  %2020 = vst.msk [vmem:[#allocation2 + $0x1c8] sm:$0xff] %vm313_vm2, %v6298_v27  ;;  %v7555_v5 = vld [vmem:[#allocation4_spill] sm:$0xff] }
 0x1c2   : > { %v2994_v46 = vld [vmem:[#allocation2 + $0x4a] sm:$0xff]  ;;  %v2995_v6 = vld [vmem:[#allocation2 + $0x52] sm:$0xff]  ;;  %4319 = vmatmul.mubr.msk.bf16.gmra.mrb[56].mxu0 %vm313_vm2, %v1562_v59  ;;  %v6316_v63 = vmax.f32 %v2512_v21, %v7555_v5  ;;  %v6323_v23 = vmax.f32 %v6236_v11, %v6285_v10 }
 0x1c3   : > { %v3026_v19 = vmax.f32 %v2962_v12, %v2994_v46  ;;  %v7554_v50 = vld [vmem:[#allocation34_spill] sm:$0xff]  ;;  %v3027_v60 = vmax.f32 %v2963_v30, %v2995_v6  ;;  %v2868_v42 = vld [vmem:[#allocation2 + $0x66] sm:$0xff]  ;;  %v6326_v62 = vmax.f32 %v3056_v32, %v6172_v3  ;;  %v6329_v26 = vmax.f32 %v3057_v9, %v6175_v54 }
 0x1c4   : > { %v1563_v18 = vpack.c.bf16 %v7554_v50, %v6298_v27  ;;  %v2900_v1 = vld [vmem:[#allocation2 + $0x67] sm:$0xff]  ;;  %v6312_v49 = vld [vmem:[#allocation2 + $0x191] sm:$0xff]  ;;  %2838 = vst.msk [vmem:[#allocation2 + $0x88] sm:$0xff] %vm313_vm2, %v6316_v63  ;;  %v2514_v3 = vmax.f32 %v6044_v17, %v6274_v34 }
 0x1c5   : > { %v7556_v44 = vld [vmem:[#allocation26_spill] sm:$0xff]  ;;  %7557 = vst [vmem:[#allocation33_spill] sm:$0xff] %v6326_v62  ;;  %7558 = vst [vmem:[#allocation5_spill] sm:$0xff] %v6329_v26  ;;  %v3058_v4 = vmax.f32 %v2930_v48, %v3026_v19  ;;  %v2932_v12 = vmax.f32 %v2868_v42, %v2900_v1  ;;  %v3059_v21 = vmax.f32 %v2931_v41, %v3027_v60  ;;  %v6341_v54 = vld [vmem:[#allocation3 + $0xa0] sm:$0xff] }
 0x1c6   : > { %v6319_v2 = vmax.f32 %v2513_v24, %v7556_v44  ;;  %v2177_v30 = vld [vmem:[#allocation2 + $0x192] sm:$0xff]  ;;  %4322 = vmatprep.mubr.msk.bf16.mxu0 %vm313_vm2, %v1563_v18  ;;  %v2964_v24 = vld [vmem:[#allocation2 + $0x69] sm:$0xff]  ;;  %3120 = vst.msk [vmem:[#allocation3 + $0x30] sm:$0xff] %vm313_vm2, %v6326_v62  ;;  %3121 = vst.msk [vmem:[#allocation3 + $0x38] sm:$0xff] %vm313_vm2, %v6329_v26  ;;  %v2515_v18 = vmax.f32 %v6054_v8, %v6323_v23 }
 0x1c7   : > { %v2869_v46 = vld [vmem:[#allocation2 + $0x6e] sm:$0xff]  ;;  %v2209_v6 = vmax.f32 %v6312_v49, %v2177_v30  ;;  %v6344_v48 = vmax.f32 %v3058_v4, %v6180_v61  ;;  %v6355_v42 = vmax.f32 %v3059_v21, %v6183_v43  ;;  %v2048_v49 = vld [vmem:[#allocation2 + $0x186] sm:$0xff]  ;;  %v7562_v4 = vld [vmem:[#allocation39_spill] sm:$0xff] }
 0x1c8   : > { %v2901_v59 = vld [vmem:[#allocation2 + $0x6f] sm:$0xff]  ;;  %v2572_v11 = vpack.c.bf16 %v6319_v2, %v6316_v63  ;;  %2839 = vst.msk [vmem:[#allocation2 + $0x90] sm:$0xff] %vm313_vm2, %v6319_v2  ;;  %v2080_v44 = vld [vmem:[#allocation2 + $0x187] sm:$0xff]  ;;  %v6359_v30 = vmax.f32 %v2514_v3, %v7562_v4  ;;  %v7564_v21 = vld [vmem:[#allocation47_spill] sm:$0xff] }
 0x1c9   : > { %7559 = vst [vmem:[#allocation28_spill] sm:$0xff] %v6344_v48  ;;  %v2933_v41 = vmax.f32 %v2869_v46, %v2901_v59  ;;  %v2965_v32 = vld [vmem:[#allocation2 + $0x71] sm:$0xff]  ;;  %7561 = vst [vmem:[#allocation6_spill] sm:$0xff] %v6355_v42  ;;  %v2112_v59 = vmax.f32 %v2048_v49, %v2080_v44  ;;  %v2144_v0 = vld [vmem:[#allocation2 + $0x189] sm:$0xff] }
 0x1ca   : > { %v2996_v9 = vld [vmem:[#allocation2 + $0x6a] sm:$0xff]  ;;  %v2997_v19 = vld [vmem:[#allocation2 + $0x72] sm:$0xff]  ;;  %4370 = vmatprep.mubr.msk.bf16.mxu1 %vm313_vm2, %v2572_v11  ;;  %3122 = vst.msk [vmem:[#allocation3 + $0x40] sm:$0xff] %vm313_vm2, %v6344_v48  ;;  %3123 = vst.msk [vmem:[#allocation3 + $0x48] sm:$0xff] %vm313_vm2, %v6355_v42 }
 0x1cb   : > { %v7560_v60 = vld [vmem:[#allocation46_spill] sm:$0xff]  ;;  %v3028_v61 = vmax.f32 %v2964_v24, %v2996_v9  ;;  %v3029_v1 = vmax.f32 %v2965_v32, %v2997_v19  ;;  %v1516_v24 = vmax.f32 %v6122_v16, %v7564_v21  ;;  %v7565_v32 = vld [vmem:[#allocation45_spill] sm:$0xff]  ;;  %2840 = vst.msk [vmem:[#allocation2 + $0xa8] sm:$0xff] %vm313_vm2, %v6359_v30 }
 0x1cc   : > { %v1515_v17 = vmax.f32 %v6214_v47, %v7560_v60  ;;  %v2049_v5 = vld [vmem:[#allocation2 + $0x18e] sm:$0xff]  ;;  %v7563_v47 = vld [vmem:[#allocation40_spill] sm:$0xff] }
 0x1cd   : > { %v2081_v46 = vld [vmem:[#allocation2 + $0x18f] sm:$0xff]  ;;  %v6364_v43 = vmax.f32 %v2515_v18, %v7563_v47  ;;  %v3060_v11 = vmax.f32 %v2932_v12, %v3028_v61  ;;  %v3061_v19 = vmax.f32 %v2933_v41, %v3029_v1  ;;  %v2050_v26 = vld [vmem:[#allocation2 + $0x1a6] sm:$0xff]  ;;  %v6388_v61 = vmax.f32 %v6238_v58, %v6341_v54 }
 0x1ce   : > { %v2176_v8 = vld [vmem:[#allocation2 + $0x18a] sm:$0xff]  ;;  %v6369_v9 = vmax.f32 %v1515_v17, %v7565_v32  ;;  %v2113_v3 = vmax.f32 %v2049_v5, %v2081_v46 }
 0x1cf   : > { %v2208_v4 = vmax.f32 %v2144_v0, %v2176_v8  ;;  %v2051_v49 = vld [vmem:[#allocation2 + $0x1ae] sm:$0xff]  ;;  %v2573_v12 = vpack.c.bf16 %v6364_v43, %v6359_v30  ;;  %2841 = vst.msk [vmem:[#allocation2 + $0xb0] sm:$0xff] %vm313_vm2, %v6364_v43  ;;  %v7566_v0 = vld [vmem:[#allocation44_spill] sm:$0xff]  ;;  %v6396_v5 = vmax.f32 %v3061_v19, %v6250_v53 }
 0x1d0   : > { %v2082_v44 = vld [vmem:[#allocation2 + $0x1a7] sm:$0xff]  ;;  %v2083_v47 = vld [vmem:[#allocation2 + $0x1af] sm:$0xff]  ;;  %v6382_v41 = vmax.f32 %v1516_v24, %v7566_v0  ;;  %2022 = vst.msk [vmem:[#allocation2 + $0x1e8] sm:$0xff] %vm313_vm2, %v6369_v9  ;;  %v2241_v8 = vmax.f32 %v2113_v3, %v2209_v6 }
 0x1d1   : > { %v6375_v18 = vld [vmem:[#allocation3 + $0xa8] sm:$0xff]  ;;  %v2114_v16 = vmax.f32 %v2050_v26, %v2082_v44  ;;  %v2147_v17 = vld [vmem:[#allocation2 + $0x1b1] sm:$0xff]  ;;  %v6393_v26 = vmax.f32 %v3060_v11, %v6224_v14  ;;  %v2240_v46 = vmax.f32 %v2112_v59, %v2208_v4  ;;  %v2115_v0 = vmax.f32 %v2051_v49, %v2083_v47  ;;  %4371 = vmatmul.mubr.msk.bf16.gmra.mrb[24].mxu1 %vm313_vm2, %v2573_v12 }
 0x1d2   : > { %v2146_v48 = vld [vmem:[#allocation2 + $0x1a9] sm:$0xff]  ;;  %v2179_v24 = vld [vmem:[#allocation2 + $0x1b2] sm:$0xff]  ;;  %v1564_v14 = vpack.c.bf16 %v6382_v41, %v6369_v9  ;;  %2023 = vst.msk [vmem:[#allocation2 + $0x1f0] sm:$0xff] %vm313_vm2, %v6382_v41  ;;  %v6407_v6 = vmax.f32 %v2241_v8, %v6232_v22  ;;  %3125 = vst.msk [vmem:[#allocation3 + $0x58] sm:$0xff] %vm313_vm2, %v6396_v5  ;;  %v6416_v22 = vmax.f32 %v6285_v10, %v6375_v18 }
 0x1d3   : > { %v6390_v1 = vld [vmem:[#allocation3 + $0xb0] sm:$0xff]  ;;  %v2052_v44 = vld [vmem:[#allocation2 + $0x1c6] sm:$0xff]  ;;  %v2211_v62 = vmax.f32 %v2147_v17, %v2179_v24  ;;  %v6404_v53 = vmax.f32 %v2240_v46, %v6255_v39  ;;  %3124 = vst.msk [vmem:[#allocation3 + $0x50] sm:$0xff] %vm313_vm2, %v6393_v26  ;;  %v6428_v10 = vld [vmem:[#allocation3 + $0xb8] sm:$0xff] }
 0x1d4   : > { %v2178_v32 = vld [vmem:[#allocation2 + $0x1aa] sm:$0xff]  ;;  %4323 = vmatmul.mubr.msk.bf16.gmra.mrb[60].mxu0 %vm313_vm2, %v1564_v14  ;;  %2305 = vst.msk [vmem:[#allocation3 + $0xe8] sm:$0xff] %vm313_vm2, %v6407_v6  ;;  %v7568_v46 = vld [vmem:[#allocation8_spill] sm:$0xff]  ;;  %v6432_v24 = vmax.f32 %v6341_v54, %v6390_v1  ;;  %v2517_v54 = vmax.f32 %v6209_v29, %v6416_v22 }
 0x1d5   : > { %v2210_v42 = vmax.f32 %v2146_v48, %v2178_v32  ;;  %v2084_v21 = vld [vmem:[#allocation2 + $0x1c7] sm:$0xff]  ;;  %v2243_v49 = vmax.f32 %v2115_v0, %v2211_v62  ;;  %v2903_v47 = vld [vmem:[#allocation2 + $0x8f] sm:$0xff]  ;;  %2304 = vst.msk [vmem:[#allocation3 + $0xe0] sm:$0xff] %vm313_vm2, %v6404_v53  ;;  %v2516_v32 = vmax.f32 %v6195_v28, %v6388_v61 }
 0x1d6   : > { %v2148_v60 = vld [vmem:[#allocation2 + $0x1c9] sm:$0xff]  ;;  %v2116_v59 = vmax.f32 %v2052_v44, %v2084_v21  ;;  %v2967_v12 = vld [vmem:[#allocation2 + $0x91] sm:$0xff]  ;;  %v2456_v29 = vld [vmem:[#allocation3 + $0xc0] sm:$0xff] }
 0x1d7   : > { %v2180_v58 = vld [vmem:[#allocation2 + $0x1ca] sm:$0xff]  ;;  %v2242_v4 = vmax.f32 %v2114_v16, %v2210_v42  ;;  %v2999_v62 = vld [vmem:[#allocation2 + $0x92] sm:$0xff]  ;;  %v6438_v0 = vmax.f32 %v2243_v49, %v6291_v33 }
 0x1d8   : > { %v2212_v48 = vmax.f32 %v2148_v60, %v2180_v58  ;;  %v2870_v11 = vld [vmem:[#allocation2 + $0x86] sm:$0xff]  ;;  %v2871_v19 = vld [vmem:[#allocation2 + $0x8e] sm:$0xff]  ;;  %v3031_v14 = vmax.f32 %v2967_v12, %v2999_v62 }
 0x1d9   : > { %v2902_v3 = vld [vmem:[#allocation2 + $0x87] sm:$0xff]  ;;  %v2935_v21 = vmax.f32 %v2871_v19, %v2903_v47  ;;  %v7567_v16 = vld [vmem:[#allocation10_spill] sm:$0xff]  ;;  %v6435_v44 = vmax.f32 %v2242_v4, %v6288_v51  ;;  %v6446_v51 = vmax.f32 %v2516_v32, %v6107_v25  ;;  %2307 = vst.msk [vmem:[#allocation3 + $0xf8] sm:$0xff] %vm313_vm2, %v6438_v0 }
 0x1da   : > { %v2934_v17 = vmax.f32 %v2870_v11, %v2902_v3  ;;  %v2966_v39 = vld [vmem:[#allocation2 + $0x89] sm:$0xff]  ;;  %v2244_v60 = vmax.f32 %v2116_v59, %v2212_v48  ;;  %v7569_v8 = vpack.c.bf16 %v7567_v16, %v7568_v46  ;;  %v6459_v16 = vmax.f32 %v2517_v54, %v6110_v45  ;;  %v2183_v54 = vld [vmem:[#allocation2 + $0x1f2] sm:$0xff] }
 0x1db   : > { %v2998_v42 = vld [vmem:[#allocation2 + $0x8a] sm:$0xff]  ;;  %v3063_v33 = vmax.f32 %v2935_v21, %v3031_v14  ;;  %2306 = vst.msk [vmem:[#allocation3 + $0xf0] sm:$0xff] %vm313_vm2, %v6435_v44  ;;  %2842 = vst.msk [vmem:[#allocation2 + $0xc8] sm:$0xff] %vm313_vm2, %v6446_v51  ;;  %v2518_v46 = vmax.f32 %v6261_v57, %v6432_v24 }
 0x1dc   : > { %4328 = vmatprep.mubr.msk.bf16.mxu0 %vm313_vm2, %v7569_v8  ;;  %v3030_v58 = vmax.f32 %v2966_v39, %v2998_v42  ;;  %v2872_v59 = vld [vmem:[#allocation2 + $0xa6] sm:$0xff]  ;;  %v6441_v11 = vmax.f32 %v2244_v60, %v6298_v27  ;;  %v2873_v28 = vld [vmem:[#allocation2 + $0xae] sm:$0xff]  ;;  %v6454_v27 = vmax.f32 %v6375_v18, %v6428_v10  ;;  %v2574_v57 = vpack.c.bf16 %v6459_v16, %v6446_v51 }
 0x1dd   : > { %v2904_v48 = vld [vmem:[#allocation2 + $0xa7] sm:$0xff]  ;;  %v2905_v19 = vld [vmem:[#allocation2 + $0xaf] sm:$0xff]  ;;  %v6469_v8 = vmax.f32 %v3063_v33, %v6319_v2  ;;  %2843 = vst.msk [vmem:[#allocation2 + $0xd0] sm:$0xff] %vm313_vm2, %v6459_v16 }
 0x1de   : > { %v2936_v3 = vmax.f32 %v2872_v59, %v2904_v48  ;;  %v2968_v47 = vld [vmem:[#allocation2 + $0xa9] sm:$0xff]  ;;  %v3062_v4 = vmax.f32 %v2934_v17, %v3030_v58  ;;  %v2937_v49 = vmax.f32 %v2873_v28, %v2905_v19  ;;  %v2969_v39 = vld [vmem:[#allocation2 + $0xb1] sm:$0xff]  ;;  %2308 = vst.msk [vmem:[#allocation3 + $0x100] sm:$0xff] %vm313_vm2, %v6441_v11  ;;  %v2519_v45 = vmax.f32 %v6271_v13, %v6454_v27 }
 0x1df   : > { %v3000_v12 = vld [vmem:[#allocation2 + $0xaa] sm:$0xff]  ;;  %v3001_v42 = vld [vmem:[#allocation2 + $0xb2] sm:$0xff]  ;;  %7570 = vst [vmem:[#allocation38_spill] sm:$0xff] %v6469_v8  ;;  %3127 = vst.msk [vmem:[#allocation3 + $0x68] sm:$0xff] %vm313_vm2, %v6469_v8  ;;  %v6482_v13 = vmax.f32 %v2518_v46, %v6125_v35  ;;  %4374 = vmatprep.mubr.msk.bf16.mxu1 %vm313_vm2, %v2574_v57 }
 0x1e0   : > { %v3032_v60 = vmax.f32 %v2968_v47, %v3000_v12  ;;  %v3033_v25 = vmax.f32 %v2969_v39, %v3001_v42  ;;  %v2054_v62 = vld [vmem:[#allocation2 + $0x1e6] sm:$0xff]  ;;  %v2055_v17 = vld [vmem:[#allocation2 + $0x1ee] sm:$0xff]  ;;  %v6466_v18 = vmax.f32 %v3062_v4, %v6316_v63  ;;  %v2459_v42 = vld [vmem:[#allocation3 + $0xd8] sm:$0xff] }
 0x1e1   : > { %v2086_v21 = vld [vmem:[#allocation2 + $0x1e7] sm:$0xff]  ;;  %v2087_v32 = vld [vmem:[#allocation2 + $0x1ef] sm:$0xff]  ;;  %2844 = vst.msk [vmem:[#allocation2 + $0xe8] sm:$0xff] %vm313_vm2, %v6482_v13 }
 0x1e2   : > { %v2118_v58 = vmax.f32 %v2054_v62, %v2086_v21  ;;  %v2150_v14 = vld [vmem:[#allocation2 + $0x1e9] sm:$0xff]  ;;  %v2151_v59 = vld [vmem:[#allocation2 + $0x1f1] sm:$0xff]  ;;  %v3064_v48 = vmax.f32 %v2936_v3, %v3032_v60  ;;  %v3065_v28 = vmax.f32 %v2937_v49, %v3033_v25  ;;  %v2119_v19 = vmax.f32 %v2055_v17, %v2087_v32  ;;  %3126 = vst.msk [vmem:[#allocation3 + $0x60] sm:$0xff] %vm313_vm2, %v6466_v18  ;;  %v7575_v62 = vld [vmem:[#allocation12_spill] sm:$0xff] }
 0x1e3   : > { %v2182_v47 = vld [vmem:[#allocation2 + $0x1ea] sm:$0xff]  ;;  %v2215_v4 = vmax.f32 %v2151_v59, %v2183_v54  ;;  %v6485_v3 = vmax.f32 %v2519_v45, %v6128_v37  ;;  %v7572_v49 = vld [vmem:[#allocation7_spill] sm:$0xff]  ;;  %v6503_v37 = vmax.f32 %v6390_v1, %v2456_v29 }
 0x1e4   : > { %v2457_v63 = vld [vmem:[#allocation3 + $0xc8] sm:$0xff]  ;;  %v2214_v2 = vmax.f32 %v2150_v14, %v2182_v47  ;;  %v2458_v12 = vld [vmem:[#allocation3 + $0xd0] sm:$0xff]  ;;  %v6492_v60 = vmax.f32 %v3064_v48, %v6359_v30  ;;  %v6495_v25 = vmax.f32 %v3065_v28, %v6364_v43  ;;  %v7577_v14 = vld [vmem:[#allocation11_spill] sm:$0xff] }
 0x1e5   : > { %v7571_v33 = vld [vmem:[#allocation9_spill] sm:$0xff]  ;;  %v7574_v35 = vld [vmem:[#allocation14_spill] sm:$0xff]  ;;  %v2247_v46 = vmax.f32 %v2119_v19, %v2215_v4  ;;  %v2575_v32 = vpack.c.bf16 %v6485_v3, %v6482_v13  ;;  %2845 = vst.msk [vmem:[#allocation2 + $0xf0] sm:$0xff] %vm313_vm2, %v6485_v3  ;;  %v6512_v30 = vmax.f32 %v6428_v10, %v2457_v63  ;;  %v2520_v43 = vmax.f32 %v6274_v34, %v6503_v37  ;;  %v2460_v48 = vld [vmem:[#allocation3 + $0xe0] sm:$0xff] }
 0x1e6   : > { %v7573_v39 = vpack.c.bf16 %v7571_v33, %v7572_v49  ;;  %v7576_v17 = vpack.c.bf16 %v7574_v35, %v7575_v62  ;;  %v2246_v21 = vmax.f32 %v2118_v58, %v2214_v2  ;;  %3128 = vst.msk [vmem:[#allocation3 + $0x70] sm:$0xff] %vm313_vm2, %v6492_v60  ;;  %3129 = vst.msk [vmem:[#allocation3 + $0x78] sm:$0xff] %vm313_vm2, %v6495_v25  ;;  %v7578_v59 = vld [vmem:[#allocation13_spill] sm:$0xff]  ;;  %v6526_v10 = vld [vmem:[#allocation3 + $0xf0] sm:$0xff] }
 0x1e7   : > { %v6520_v1 = vmax.f32 %v2456_v29, %v2458_v12  ;;  %v6522_v58 = vmax.f32 %v2457_v63, %v2459_v42  ;;  %v955_v45 = vpack.c.bf16 %v7578_v59, %v7577_v14  ;;  %v2461_v28 = vld [vmem:[#allocation3 + $0xe8] sm:$0xff]  ;;  %v6532_v47 = vmax.f32 %v2247_v46, %v6382_v41  ;;  %4375 = vmatmul.mubr.msk.bf16.gmra.mrb[28].mxu1 %vm313_vm2, %v2575_v32  ;;  %v7579_v29 = vld [vmem:[#allocation16_spill] sm:$0xff]  ;;  %v7580_v63 = vld [vmem:[#allocation18_spill] sm:$0xff] }
 0x1e8   : > { %4329 = vmatmul.mubr.msk.bf16.vlgmr.msra.gmra.mrb[32].mxu0 %vm313_vm2, %v7573_v39  ;;  %v6529_v19 = vmax.f32 %v2246_v21, %v6369_v9  ;;  %v2874_v54 = vld [vmem:[#allocation2 + $0xc6] sm:$0xff]  ;;  %v2521_v34 = vmax.f32 %v6323_v23, %v6512_v30  ;;  %v956_v2 = vpack.c.bf16 %v7580_v63, %v7579_v29  ;;  %v6539_v4 = vld [vmem:[#allocation3 + $0xf8] sm:$0xff]  ;;  %v6542_v49 = vmax.f32 %v2520_v43, %v6146_v38  ;;  %v2875_v23 = vld [vmem:[#allocation2 + $0xce] sm:$0xff] }
 0x1e9   : > { %4332 = vmatprep.mubr.msk.bf16.mxu0 %vm313_vm2, %v7576_v17  ;;  %v2906_v57 = vld [vmem:[#allocation2 + $0xc7] sm:$0xff]  ;;  %v2522_v9 = vmax.f32 %v6388_v61, %v6520_v1  ;;  %v2523_v41 = vmax.f32 %v6416_v22, %v6522_v58  ;;  %2311 = vst.msk [vmem:[#allocation3 + $0x118] sm:$0xff] %vm313_vm2, %v6532_v47  ;;  %v2907_v39 = vld [vmem:[#allocation2 + $0xcf] sm:$0xff]  ;;  %v6555_v38 = vmax.f32 %v2458_v12, %v2460_v48 }
 0x1ea   : > { %v2938_v33 = vmax.f32 %v2874_v54, %v2906_v57  ;;  %2310 = vst.msk [vmem:[#allocation3 + $0x110] sm:$0xff] %vm313_vm2, %v6529_v19  ;;  %v2970_v35 = vld [vmem:[#allocation2 + $0xc9] sm:$0xff]  ;;  %v6553_v62 = vmax.f32 %v2521_v34, %v6149_v56  ;;  %v6557_v17 = vmax.f32 %v2459_v42, %v2461_v28  ;;  %v6560_v61 = vmax.f32 %v2460_v48, %v6526_v10  ;;  %v2971_v21 = vld [vmem:[#allocation2 + $0xd1] sm:$0xff] }
 0x1eb   : > { %v2939_v22 = vmax.f32 %v2875_v23, %v2907_v39  ;;  %v3002_v46 = vld [vmem:[#allocation2 + $0xca] sm:$0xff]  ;;  %v3003_v32 = vld [vmem:[#allocation2 + $0xd2] sm:$0xff]  ;;  %2846 = vst.msk [vmem:[#allocation2 + $0x108] sm:$0xff] %vm313_vm2, %v6542_v49  ;;  %v6565_v43 = vmax.f32 %v2522_v9, %v6158_v7  ;;  %v6568_v56 = vmax.f32 %v2523_v41, %v6169_v20  ;;  %v6571_v12 = vmax.f32 %v2461_v28, %v6539_v4  ;;  %v6580_v20 = vld [vmem:[#allocation3 + $0x100] sm:$0xff] }
 0x1ec   : > { %v3034_v42 = vmax.f32 %v2970_v35, %v3002_v46  ;;  %v3035_v14 = vmax.f32 %v2971_v21, %v3003_v32  ;;  %v2576_v59 = vpack.c.bf16 %v6553_v62, %v6542_v49  ;;  %2847 = vst.msk [vmem:[#allocation2 + $0x110] sm:$0xff] %vm313_vm2, %v6553_v62  ;;  %v2524_v7 = vmax.f32 %v6432_v24, %v6555_v38  ;;  %v2053_v48 = vld [vmem:[#allocation2 + $0x1ce] sm:$0xff]  ;;  %v2876_v57 = vld [vmem:[#allocation2 + $0xe6] sm:$0xff] }
 0x1ed   : > { %v2085_v54 = vld [vmem:[#allocation2 + $0x1cf] sm:$0xff]  ;;  %v2908_v34 = vld [vmem:[#allocation2 + $0xe7] sm:$0xff]  ;;  %v2577_v29 = vpack.c.bf16 %v6568_v56, %v6565_v43  ;;  %2848 = vst.msk [vmem:[#allocation2 + $0x128] sm:$0xff] %vm313_vm2, %v6565_v43  ;;  %2849 = vst.msk [vmem:[#allocation2 + $0x130] sm:$0xff] %vm313_vm2, %v6568_v56  ;;  %v2525_v24 = vmax.f32 %v6454_v27, %v6557_v17  ;;  %v2527_v63 = vmax.f32 %v6512_v30, %v6571_v12 }
 0x1ee   : > { %v2877_v28 = vld [vmem:[#allocation2 + $0xee] sm:$0xff]  ;;  %v3066_v9 = vmax.f32 %v2938_v33, %v3034_v42  ;;  %v3067_v41 = vmax.f32 %v2939_v22, %v3035_v14  ;;  %v2940_v39 = vmax.f32 %v2876_v57, %v2908_v34  ;;  %4378 = vmatprep.mubr.msk.bf16.mxu1 %vm313_vm2, %v2576_v59  ;;  %v6597_v46 = vmax.f32 %v2524_v7, %v6205_v40 }
 0x1ef   : > { %v2909_v23 = vld [vmem:[#allocation2 + $0xef] sm:$0xff]  ;;  %v6600_v8 = vmax.f32 %v2525_v24, %v6218_v36  ;;  %v6606_v30 = vmax.f32 %v2527_v63, %v6244_v31  ;;  %4379 = vmatmul.mubr.msk.bf16.gmra.mrb[0].mxu1 %vm313_vm2, %v2577_v29  ;;  %v2117_v31 = vmax.f32 %v2053_v48, %v2085_v54  ;;  %v7585_v48 = vld [vmem:[#allocation23_spill] sm:$0xff] }
 0x1f0   : > { %4333 = vmatmul.mubr.msk.bf16.gmra.mrb[36].mxu0 %vm313_vm2, %v955_v45  ;;  %v2526_v45 = vmax.f32 %v6503_v37, %v6560_v61  ;;  %v2972_v35 = vld [vmem:[#allocation2 + $0xe9] sm:$0xff]  ;;  %v2973_v21 = vld [vmem:[#allocation2 + $0xf1] sm:$0xff]  ;;  %v6609_v33 = vmax.f32 %v3066_v9, %v6446_v51  ;;  %v6612_v22 = vmax.f32 %v3067_v41, %v6459_v16  ;;  %2850 = vst.msk [vmem:[#allocation2 + $0x148] sm:$0xff] %vm313_vm2, %v6597_v46 }
 0x1f1   : > { %4336 = vmatprep.mubr.msk.bf16.mxu0 %vm313_vm2, %v956_v2  ;;  %v2941_v2 = vmax.f32 %v2877_v28, %v2909_v23  ;;  %v3004_v32 = vld [vmem:[#allocation2 + $0xea] sm:$0xff]  ;;  %v3005_v27 = vld [vmem:[#allocation2 + $0xf2] sm:$0xff]  ;;  %v2578_v36 = vpack.c.bf16 %v6600_v8, %v6597_v46  ;;  %2851 = vst.msk [vmem:[#allocation2 + $0x150] sm:$0xff] %vm313_vm2, %v6600_v8  ;;  %2853 = vst.msk [vmem:[#allocation2 + $0x170] sm:$0xff] %vm313_vm2, %v6606_v30  ;;  %v6629_v51 = vmax.f32 %v6526_v10, %v6580_v20 }
 0x1f2   : > { %v6603_v37 = vmax.f32 %v2526_v45, %v6241_v55  ;;  %7581 = vst [vmem:[#allocation37_spill] sm:$0xff] %v6612_v22  ;;  %v3036_v40 = vmax.f32 %v2972_v35, %v3004_v32  ;;  %v3037_v42 = vmax.f32 %v2973_v21, %v3005_v27  ;;  %v2466_v16 = vld [vmem:[#allocation3 + $0x110] sm:$0xff]  ;;  %v2878_v7 = vld [vmem:[#allocation2 + $0x106] sm:$0xff]  ;;  %3130 = vst.msk [vmem:[#allocation3 + $0x80] sm:$0xff] %vm313_vm2, %v6609_v33 }
 0x1f3   : > { %v2910_v57 = vld [vmem:[#allocation2 + $0x107] sm:$0xff]  ;;  %3131 = vst.msk [vmem:[#allocation3 + $0x88] sm:$0xff] %vm313_vm2, %v6612_v22  ;;  %v7582_v28 = vld [vmem:[#allocation15_spill] sm:$0xff]  ;;  %v2911_v63 = vld [vmem:[#allocation2 + $0x10f] sm:$0xff]  ;;  %4382 = vmatprep.mubr.msk.bf16.mxu1 %vm313_vm2, %v2578_v36  ;;  %v7586_v23 = vmax.f32 %v6102_v15, %v6104_v52  ;;  %v2528_v35 = vmax.f32 %v6520_v1, %v6629_v51  ;;  %v2498_v21 = vmax.f32 %v6580_v20, %v2466_v16 }
 0x1f4   : > { %v2579_v55 = vpack.c.bf16 %v6606_v30, %v6603_v37  ;;  %2852 = vst.msk [vmem:[#allocation2 + $0x168] sm:$0xff] %vm313_vm2, %v6603_v37  ;;  %v3068_v14 = vmax.f32 %v2940_v39, %v3036_v40  ;;  %v3069_v59 = vmax.f32 %v2941_v2, %v3037_v42  ;;  %v7583_v34 = vld [vmem:[#allocation17_spill] sm:$0xff]  ;;  %v6639_v45 = vld [vmem:[#allocation3 + $0x118] sm:$0xff]  ;;  %v2942_v9 = vmax.f32 %v2878_v7, %v2910_v57  ;;  %v4815_v36 = vld [vmem:[#allocation3 + $0x120] sm:$0xff] }
 0x1f5   : > { %v957_v29 = vpack.c.bf16 %v7583_v34, %v7582_v28  ;;  %v7584_v24 = vld [vmem:[#allocation21_spill] sm:$0xff]  ;;  %v2245_v39 = vmax.f32 %v2117_v31, %v7586_v23  ;;  %v2975_v40 = vld [vmem:[#allocation2 + $0x111] sm:$0xff]  ;;  %v2500_v15 = vmax.f32 %v2466_v16, %v4815_v36  ;;  %v2530_v16 = vmax.f32 %v6555_v38, %v2498_v21  ;;  %v7589_v23 = vld [vmem:[#allocation20_spill] sm:$0xff] }
 0x1f6   : > { %v958_v54 = vpack.c.bf16 %v7585_v48, %v7584_v24  ;;  %v2879_v10 = vld [vmem:[#allocation2 + $0x10e] sm:$0xff]  ;;  %v6649_v2 = vmax.f32 %v3068_v14, %v6482_v13  ;;  %v6652_v32 = vmax.f32 %v3069_v59, %v6485_v3  ;;  %v2880_v57 = vld [vmem:[#allocation2 + $0x126] sm:$0xff]  ;;  %v6657_v13 = vmax.f32 %v2528_v35, %v6404_v53 }
 0x1f7   : > { %v2974_v41 = vld [vmem:[#allocation2 + $0x109] sm:$0xff]  ;;  %v2943_v27 = vmax.f32 %v2879_v10, %v2911_v63  ;;  %v3007_v7 = vld [vmem:[#allocation2 + $0x112] sm:$0xff]  ;;  %v2277_v20 = vmax.f32 %v2245_v39, %v7554_v50  ;;  %v2532_v53 = vmax.f32 %v6560_v61, %v2500_v15  ;;  %4383 = vmatmul.mubr.msk.bf16.gmra.mrb[4].mxu1 %vm313_vm2, %v2579_v55  ;;  %v6677_v61 = vmax.f32 %v2530_v16, %v6435_v44 }
 0x1f8   : > { %7587 = vst [vmem:[#allocation36_spill] sm:$0xff] %v6649_v2  ;;  %7588 = vst [vmem:[#allocation41_spill] sm:$0xff] %v6652_v32  ;;  %v3006_v42 = vld [vmem:[#allocation2 + $0x10a] sm:$0xff]  ;;  %4337 = vmatmul.mubr.msk.bf16.gmra.mrb[40].mxu0 %vm313_vm2, %v957_v29  ;;  %v3039_v31 = vmax.f32 %v2975_v40, %v3007_v7  ;;  %v3009_v63 = vld [vmem:[#allocation2 + $0x132] sm:$0xff] }
 0x1f9   : > { %v3038_v52 = vmax.f32 %v2974_v41, %v3006_v42  ;;  %v2881_v1 = vld [vmem:[#allocation2 + $0x12e] sm:$0xff]  ;;  %4340 = vmatprep.mubr.msk.bf16.mxu0 %vm313_vm2, %v958_v54  ;;  %3132 = vst.msk [vmem:[#allocation3 + $0x90] sm:$0xff] %vm313_vm2, %v6649_v2  ;;  %3133 = vst.msk [vmem:[#allocation3 + $0x98] sm:$0xff] %vm313_vm2, %v6652_v32  ;;  %v2882_v41 = vld [vmem:[#allocation2 + $0x146] sm:$0xff] }
 0x1fa   : > { %v2912_v28 = vld [vmem:[#allocation2 + $0x127] sm:$0xff]  ;;  %v2913_v3 = vld [vmem:[#allocation2 + $0x12f] sm:$0xff]  ;;  %v3071_v48 = vmax.f32 %v2943_v27, %v3039_v31  ;;  %2309 = vst.msk [vmem:[#allocation3 + $0x108] sm:$0xff] %vm313_vm2, %v2277_v20  ;;  %2854 = vst.msk [vmem:[#allocation2 + $0x188] sm:$0xff] %vm313_vm2, %v6657_v13 }
 0x1fb   : > { %v2944_v14 = vmax.f32 %v2880_v57, %v2912_v28  ;;  %v2976_v59 = vld [vmem:[#allocation2 + $0x129] sm:$0xff]  ;;  %v2977_v34 = vld [vmem:[#allocation2 + $0x131] sm:$0xff]  ;;  %v3070_v24 = vmax.f32 %v2942_v9, %v3038_v52  ;;  %v2945_v54 = vmax.f32 %v2881_v1, %v2913_v3  ;;  %2856 = vst.msk [vmem:[#allocation2 + $0x1a8] sm:$0xff] %vm313_vm2, %v6677_v61 }
 0x1fc   : > { %v4816_v29 = vld [vmem:[#allocation3 + $0x128] sm:$0xff]  ;;  %v7590_v39 = vld [vmem:[#allocation22_spill] sm:$0xff]  ;;  %v3041_v21 = vmax.f32 %v2977_v34, %v3009_v63  ;;  %v6684_v36 = vmax.f32 %v3071_v48, %v6553_v62 }
 0x1fd   : > { %v2501_v50 = vmax.f32 %v6639_v45, %v4816_v29  ;;  %v3008_v10 = vld [vmem:[#allocation2 + $0x12a] sm:$0xff]  ;;  %v959_v35 = vpack.c.bf16 %v7590_v39, %v7589_v23  ;;  %v6681_v27 = vmax.f32 %v3070_v24, %v6542_v49  ;;  %v3011_v49 = vld [vmem:[#allocation2 + $0x152] sm:$0xff]  ;;  %v6697_v29 = vmax.f32 %v2532_v53, %v6441_v11 }
 0x1fe   : > { %v3040_v38 = vmax.f32 %v2976_v59, %v3008_v10  ;;  %v2883_v40 = vld [vmem:[#allocation2 + $0x14e] sm:$0xff]  ;;  %v6686_v28 = vld [vmem:[#allocation2 + $0x6] sm:$0xff]  ;;  %v3073_v59 = vmax.f32 %v2945_v54, %v3041_v21  ;;  %3135 = vst.msk [vmem:[#allocation3 + $0xa8] sm:$0xff] %vm313_vm2, %v6684_v36 }
 0x1ff   : > { %v2914_v42 = vld [vmem:[#allocation2 + $0x147] sm:$0xff]  ;;  %v2915_v7 = vld [vmem:[#allocation2 + $0x14f] sm:$0xff]  ;;  %v2533_v9 = vmax.f32 %v6571_v12, %v2501_v50  ;;  %3134 = vst.msk [vmem:[#allocation3 + $0xa0] sm:$0xff] %vm313_vm2, %v6681_v27  ;;  %2858 = vst.msk [vmem:[#allocation2 + $0x1c8] sm:$0xff] %vm313_vm2, %v6697_v29 }
 0x200   : > { %v2946_v15 = vmax.f32 %v2882_v41, %v2914_v42  ;;  %v2947_v52 = vmax.f32 %v2883_v40, %v2915_v7  ;;  %v2978_v31 = vld [vmem:[#allocation2 + $0x149] sm:$0xff]  ;;  %v2979_v57 = vld [vmem:[#allocation2 + $0x151] sm:$0xff]  ;;  %v3072_v12 = vmax.f32 %v2944_v14, %v3040_v38  ;;  %v6711_v11 = vmax.f32 %v3073_v59, %v6568_v56  ;;  %4341 = vmatmul.mubr.msk.bf16.gmra.mrb[44].mxu0 %vm313_vm2, %v959_v35 }
 0x201   : > { %v3010_v1 = vld [vmem:[#allocation2 + $0x14a] sm:$0xff]  ;;  %v3043_v50 = vmax.f32 %v2979_v57, %v3011_v49  ;;  %v6703_v54 = vmax.f32 %v2533_v9, %v2277_v20  ;;  %v3013_v40 = vld [vmem:[#allocation2 + $0x172] sm:$0xff] }
 0x202   : > { %v6688_v3 = vld [vmem:[#allocation2 + $0xe] sm:$0xff]  ;;  %v3042_v34 = vmax.f32 %v2978_v31, %v3010_v1  ;;  %v2884_v16 = vld [vmem:[#allocation2 + $0x166] sm:$0xff]  ;;  %v6708_v23 = vmax.f32 %v3072_v12, %v6565_v43  ;;  %3137 = vst.msk [vmem:[#allocation3 + $0xb8] sm:$0xff] %vm313_vm2, %v6711_v11 }
 0x203   : > { %v6690_v55 = vld [vmem:[#allocation2 + $0x7] sm:$0xff]  ;;  %v6692_v44 = vld [vmem:[#allocation2 + $0xf] sm:$0xff]  ;;  %v3075_v20 = vmax.f32 %v2947_v52, %v3043_v50  ;;  %2859 = vst.msk [vmem:[#allocation2 + $0x1d0] sm:$0xff] %vm313_vm2, %v6703_v54 }
 0x204   : > { %v2885_v62 = vld [vmem:[#allocation2 + $0x16e] sm:$0xff]  ;;  %v3074_v53 = vmax.f32 %v2946_v15, %v3042_v34  ;;  %3136 = vst.msk [vmem:[#allocation3 + $0xb0] sm:$0xff] %vm313_vm2, %v6708_v23  ;;  %v2926_v31 = vmax.f32 %v6686_v28, %v6690_v55  ;;  %v2927_v57 = vmax.f32 %v6688_v3, %v6692_v44  ;;  %v3150_v55 = vld [vmem:[#allocation3] sm:$0xff] }
 0x205   : > { %v2916_v24 = vld [vmem:[#allocation2 + $0x167] sm:$0xff]  ;;  %v2917_v14 = vld [vmem:[#allocation2 + $0x16f] sm:$0xff]  ;;  %v6733_v1 = vmax.f32 %v3075_v20, %v6600_v8 }
 0x206   : > { %v2980_v48 = vld [vmem:[#allocation2 + $0x169] sm:$0xff]  ;;  %v2948_v39 = vmax.f32 %v2884_v16, %v2916_v24  ;;  %v2981_v38 = vld [vmem:[#allocation2 + $0x171] sm:$0xff]  ;;  %v2949_v42 = vmax.f32 %v2885_v62, %v2917_v14  ;;  %v6719_v15 = vmax.f32 %v3074_v53, %v6597_v46  ;;  %v3278_v50 = vld [vmem:[#allocation3 + $0x40] sm:$0xff] }
 0x207   : > { %v7591_v10 = vld [vmem:[#allocation46_spill] sm:$0xff]  ;;  %v3045_v7 = vmax.f32 %v2981_v38, %v3013_v40  ;;  %v2465_v35 = vld [vmem:[#allocation3 + $0x108] sm:$0xff]  ;;  %3139 = vst.msk [vmem:[#allocation3 + $0xc8] sm:$0xff] %vm313_vm2, %v6733_v1  ;;  %v6755_v62 = vld [vmem:[#allocation3 + $0x18] sm:$0xff] }
 0x208   : > { %v2534_v63 = vmax.f32 %v6629_v51, %v7591_v10  ;;  %v2958_v41 = vld [vmem:[#allocation2 + $0x9] sm:$0xff]  ;;  %v2959_v43 = vld [vmem:[#allocation2 + $0x11] sm:$0xff]  ;;  %v2497_v59 = vmax.f32 %v6539_v4, %v2465_v35  ;;  %3138 = vst.msk [vmem:[#allocation3 + $0xc0] sm:$0xff] %vm313_vm2, %v6719_v15  ;;  %v2499_v49 = vmax.f32 %v2465_v35, %v6639_v45 }
 0x209   : > { %v3012_v21 = vld [vmem:[#allocation2 + $0x16a] sm:$0xff]  ;;  %v2991_v9 = vld [vmem:[#allocation2 + $0x12] sm:$0xff]  ;;  %v3077_v12 = vmax.f32 %v2949_v42, %v3045_v7 }
 0x20a   : > { %v3044_v51 = vmax.f32 %v2980_v48, %v3012_v21  ;;  %v2990_v56 = vld [vmem:[#allocation2 + $0xa] sm:$0xff]  ;;  %v6726_v52 = vmax.f32 %v2534_v63, %v6529_v19  ;;  %v3023_v28 = vmax.f32 %v2959_v43, %v2991_v9  ;;  %v2529_v44 = vmax.f32 %v6522_v58, %v2497_v59  ;;  %v7592_v45 = vld [vmem:[#allocation47_spill] sm:$0xff] }
 0x20b   : > { %v3022_v19 = vmax.f32 %v2958_v41, %v2990_v56  ;;  %v6741_v34 = vld [vmem:[#allocation3 + $0x8] sm:$0xff]  ;;  %v6743_v3 = vld [vmem:[#allocation3 + $0x10] sm:$0xff]  ;;  %v6749_v4 = vmax.f32 %v3077_v12, %v6606_v30  ;;  %v2535_v16 = vmax.f32 %v2497_v59, %v7592_v45  ;;  %v7593_v9 = vld [vmem:[#allocation19_spill] sm:$0xff] }
 0x20c   : > { %v3076_v46 = vmax.f32 %v2948_v39, %v3044_v51  ;;  %2860 = vst.msk [vmem:[#allocation2 + $0x1e8] sm:$0xff] %vm313_vm2, %v6726_v52  ;;  %v6757_v24 = vld [vmem:[#allocation3 + $0x48] sm:$0xff]  ;;  %v3055_v58 = vmax.f32 %v2927_v57, %v3023_v28  ;;  %v6766_v63 = vld [vmem:[#allocation3 + $0x30] sm:$0xff]  ;;  %v6769_v41 = vmax.f32 %v2529_v44, %v6407_v6  ;;  %v3214_v21 = vmax.f32 %v3150_v55, %v6743_v3  ;;  %v6783_v6 = vld [vmem:[#allocation3 + $0x38] sm:$0xff] }
 0x20d   : > { %v6759_v14 = vld [vmem:[#allocation2 + $0x186] sm:$0xff]  ;;  %v3054_v10 = vmax.f32 %v2926_v31, %v3022_v19  ;;  %3141 = vst.msk [vmem:[#allocation3 + $0xd8] sm:$0xff] %vm313_vm2, %v6749_v4  ;;  %v3215_v40 = vmax.f32 %v6741_v34, %v6755_v62  ;;  %v6785_v20 = vld [vmem:[#allocation3 + $0x50] sm:$0xff]  ;;  %v3281_v57 = vld [vmem:[#allocation3 + $0x58] sm:$0xff]  ;;  %v3310_v55 = vmax.f32 %v6766_v63, %v3278_v50 }
 0x20e   : > { %v6746_v8 = vmax.f32 %v3076_v46, %v6603_v37  ;;  %v6761_v48 = vld [vmem:[#allocation2 + $0x187] sm:$0xff]  ;;  %v2531_v37 = vmax.f32 %v6557_v17, %v2499_v49  ;;  %v6778_v17 = vmax.f32 %v2535_v16, %v6532_v47  ;;  %v2923_v7 = vld [vmem:[#allocation2 + $0x1cf] sm:$0xff]  ;;  %v2580_v12 = vpack.c.bf16 %v6769_v41, %v6657_v13  ;;  %2855 = vst.msk [vmem:[#allocation2 + $0x190] sm:$0xff] %vm313_vm2, %v6769_v41 }
 0x20f   : > { %v6764_v30 = vld [vmem:[#allocation2 + $0x1a6] sm:$0xff]  ;;  %v2891_v51 = vld [vmem:[#allocation2 + $0x1ce] sm:$0xff]  ;;  %v6791_v35 = vmax.f32 %v3054_v10, %v7593_v9  ;;  %v3311_v16 = vmax.f32 %v6783_v6, %v6757_v24 }
 0x210   : > { %v6771_v53 = vld [vmem:[#allocation2 + $0x1a7] sm:$0xff]  ;;  %3140 = vst.msk [vmem:[#allocation3 + $0xd0] sm:$0xff] %vm313_vm2, %v6746_v8  ;;  %v6788_v42 = vmax.f32 %v2531_v37, %v6438_v0  ;;  %v2955_v0 = vmax.f32 %v2891_v51, %v2923_v7  ;;  %v2987_v59 = vld [vmem:[#allocation2 + $0x1d1] sm:$0xff]  ;;  %2861 = vst.msk [vmem:[#allocation2 + $0x1f0] sm:$0xff] %vm313_vm2, %v6778_v17  ;;  %4386 = vmatprep.mubr.msk.bf16.mxu1 %vm313_vm2, %v2580_v12  ;;  %v2582_v51 = vpack.c.bf16 %v6703_v54, %v6697_v29 }
 0x211   : > { %v2890_v39 = vld [vmem:[#allocation2 + $0x1c6] sm:$0xff]  ;;  %v3019_v19 = vld [vmem:[#allocation2 + $0x1d2] sm:$0xff]  ;;  %3118 = vst.msk [vmem:[#allocation3 + $0x20] sm:$0xff] %vm313_vm2, %v6791_v35  ;;  %v3342_v7 = vmax.f32 %v3214_v21, %v3310_v55 }
 0x212   : > { %v2922_v38 = vld [vmem:[#allocation2 + $0x1c7] sm:$0xff]  ;;  %v2581_v34 = vpack.c.bf16 %v6788_v42, %v6677_v61  ;;  %2857 = vst.msk [vmem:[#allocation2 + $0x1b0] sm:$0xff] %vm313_vm2, %v6788_v42  ;;  %v3051_v45 = vmax.f32 %v2987_v59, %v3019_v19  ;;  %v3284_v10 = vld [vmem:[#allocation3 + $0x70] sm:$0xff]  ;;  %v3343_v59 = vmax.f32 %v3215_v40, %v3311_v16 }
 0x213   : > { %v2954_v43 = vmax.f32 %v2890_v39, %v2922_v38  ;;  %v2986_v56 = vld [vmem:[#allocation2 + $0x1c9] sm:$0xff]  ;;  %v7594_v47 = vld [vmem:[#allocation32_spill] sm:$0xff]  ;;  %v2950_v39 = vmax.f32 %v6759_v14, %v6761_v48  ;;  %v3374_v21 = vmax.f32 %v3342_v7, %v6791_v35  ;;  %v6835_v38 = vmax.f32 %v6757_v24, %v3281_v57 }
 0x214   : > { %v6794_v31 = vmax.f32 %v3055_v58, %v7594_v47  ;;  %v3282_v46 = vld [vmem:[#allocation3 + $0x60] sm:$0xff]  ;;  %v3018_v49 = vld [vmem:[#allocation2 + $0x1ca] sm:$0xff]  ;;  %v3285_v58 = vld [vmem:[#allocation3 + $0x78] sm:$0xff]  ;;  %4387 = vmatmul.mubr.msk.bf16.gmra.mrb[8].mxu1 %vm313_vm2, %v2581_v34  ;;  %v3083_v47 = vmax.f32 %v2955_v0, %v3051_v45 }
 0x215   : > { %v3050_v44 = vmax.f32 %v2986_v56, %v3018_v49  ;;  %v3283_v37 = vld [vmem:[#allocation3 + $0x68] sm:$0xff]  ;;  %v3286_v56 = vld [vmem:[#allocation3 + $0x80] sm:$0xff]  ;;  %v6824_v49 = vmax.f32 %v3278_v50, %v6785_v20  ;;  %v6826_v19 = vld [vmem:[#allocation3 + $0x90] sm:$0xff]  ;;  %4390 = vmatprep.mubr.msk.bf16.mxu1 %vm313_vm2, %v2582_v51 }
 0x216   : > { %3119 = vst.msk [vmem:[#allocation3 + $0x28] sm:$0xff] %vm313_vm2, %v6794_v31  ;;  %v3287_v12 = vld [vmem:[#allocation3 + $0x88] sm:$0xff]  ;;  %v6839_v40 = vmax.f32 %v3283_v37, %v3285_v58  ;;  %v6841_v50 = vld [vmem:[#allocation3 + $0x98] sm:$0xff]  ;;  %v6847_v34 = vmax.f32 %v3083_v47, %v6703_v54  ;;  %v6850_v45 = vmax.f32 %v3284_v10, %v3286_v56  ;;  %v6857_v7 = vmax.f32 %v3286_v56, %v6826_v19 }
 0x217   : > { %v3082_v9 = vmax.f32 %v2954_v43, %v3050_v44  ;;  %v6829_v14 = vld [vmem:[#allocation2 + $0x1e6] sm:$0xff]  ;;  %v6837_v43 = vmax.f32 %v3282_v46, %v3284_v10  ;;  %v3375_v44 = vmax.f32 %v3343_v59, %v6794_v31  ;;  %v6854_v51 = vmax.f32 %v3285_v58, %v3287_v12  ;;  %v2887_v28 = vld [vmem:[#allocation2 + $0x18e] sm:$0xff] }
 0x218   : > { %v6831_v48 = vld [vmem:[#allocation2 + $0x1e7] sm:$0xff]  ;;  %7596 = vst [vmem:[#allocation29_spill] sm:$0xff] %v6847_v34  ;;  %7597 = vst [vmem:[#allocation42_spill] sm:$0xff] %v6850_v45  ;;  %v3349_v24 = vmax.f32 %v3311_v16, %v6839_v40  ;;  %v2919_v32 = vld [vmem:[#allocation2 + $0x18f] sm:$0xff]  ;;  %v3314_v31 = vmax.f32 %v6785_v20, %v3282_v46  ;;  %v6867_v16 = vmax.f32 %v3287_v12, %v6841_v50 }
 0x219   : > { %v6844_v0 = vmax.f32 %v3082_v9, %v6697_v29  ;;  %v3348_v35 = vmax.f32 %v3310_v55, %v6837_v43  ;;  %7598 = vst [vmem:[#allocation25_spill] sm:$0xff] %v6854_v51  ;;  %v2982_v29 = vld [vmem:[#allocation2 + $0x189] sm:$0xff]  ;;  %v2956_v54 = vmax.f32 %v6829_v14, %v6831_v48  ;;  %3147 = vst.msk [vmem:[#allocation3 + $0x108] sm:$0xff] %vm313_vm2, %v6847_v34  ;;  %v2983_v58 = vld [vmem:[#allocation2 + $0x191] sm:$0xff] }
 0x21a   : > { %v3315_v55 = vmax.f32 %v3281_v57, %v3283_v37  ;;  %v2951_v10 = vmax.f32 %v2887_v28, %v2919_v32  ;;  %v3014_v56 = vld [vmem:[#allocation2 + $0x18a] sm:$0xff]  ;;  %v3015_v9 = vld [vmem:[#allocation2 + $0x192] sm:$0xff]  ;;  %v6873_v59 = vmax.f32 %v3349_v24, %v6396_v5  ;;  %v3350_v14 = vmax.f32 %v6824_v49, %v6850_v45 }
 0x21b   : > { %7595 = vst [vmem:[#allocation31_spill] sm:$0xff] %v6844_v0  ;;  %3146 = vst.msk [vmem:[#allocation3 + $0x100] sm:$0xff] %vm313_vm2, %v6844_v0  ;;  %v6870_v47 = vmax.f32 %v3348_v35, %v6393_v26  ;;  %v3046_v48 = vmax.f32 %v2982_v29, %v3014_v56  ;;  %v3047_v34 = vmax.f32 %v2983_v58, %v3015_v9  ;;  %v2889_v20 = vld [vmem:[#allocation2 + $0x1ae] sm:$0xff] }
 0x21c   : > { %v2921_v57 = vld [vmem:[#allocation2 + $0x1af] sm:$0xff]  ;;  %v3406_v37 = vpack.c.bf16 %v3375_v44, %v3374_v21  ;;  %v3352_v32 = vmax.f32 %v3314_v31, %v6857_v7  ;;  %v3351_v5 = vmax.f32 %v6835_v38, %v6854_v51  ;;  %v3353_v35 = vmax.f32 %v3315_v55, %v6867_v16 }
 0x21d   : > { %v2984_v46 = vld [vmem:[#allocation2 + $0x1a9] sm:$0xff]  ;;  %v2953_v28 = vmax.f32 %v2889_v20, %v2921_v57  ;;  %v2985_v12 = vld [vmem:[#allocation2 + $0x1b1] sm:$0xff]  ;;  %v3078_v24 = vmax.f32 %v2950_v39, %v3046_v48  ;;  %v3079_v29 = vmax.f32 %v2951_v10, %v3047_v34  ;;  %v7599_v21 = vpack.c.bf16 %v6778_v17, %v6726_v52 }
 0x21e   : > { %v3016_v0 = vld [vmem:[#allocation2 + $0x1aa] sm:$0xff]  ;;  %v3017_v2 = vld [vmem:[#allocation2 + $0x1b2] sm:$0xff]  ;;  %v6889_v51 = vmax.f32 %v3350_v14, %v6466_v18  ;;  %v6892_v39 = vmax.f32 %v3352_v32, %v6492_v60  ;;  %v7600_v10 = vmax.f32 %v6764_v30, %v6771_v53 }
 0x21f   : > { %v3048_v58 = vmax.f32 %v2984_v46, %v3016_v0  ;;  %v3049_v56 = vmax.f32 %v2985_v12, %v3017_v2  ;;  %4391 = vmatmul.mubr.msk.bf16.gmra.mrb[12].mxu1 %vm313_vm2, %v7599_v21  ;;  %v2893_v44 = vld [vmem:[#allocation2 + $0x1ee] sm:$0xff]  ;;  %v6895_v2 = vmax.f32 %v3353_v35, %v6495_v25  ;;  %v6898_v0 = vmax.f32 %v3078_v24, %v6657_v13 }
 0x220   : > { %v2925_v9 = vld [vmem:[#allocation2 + $0x1ef] sm:$0xff]  ;;  %4396 = vmatprep.mubr.msk.bf16.mxu1 %vm313_vm2, %v3406_v37  ;;  %v6901_v34 = vmax.f32 %v3079_v29, %v6769_v41  ;;  %v3184_v37 = vld [vmem:[#allocation3 + $0x20] sm:$0xff] }
 0x221   : > { %v2988_v20 = vld [vmem:[#allocation2 + $0x1e9] sm:$0xff]  ;;  %v2957_v57 = vmax.f32 %v2893_v44, %v2925_v9  ;;  %v2989_v45 = vld [vmem:[#allocation2 + $0x1f1] sm:$0xff]  ;;  %v3080_v48 = vmax.f32 %v7600_v10, %v3048_v58  ;;  %v3081_v46 = vmax.f32 %v2953_v28, %v3049_v56  ;;  %v3216_v60 = vmax.f32 %v6743_v3, %v3184_v37  ;;  %3142 = vst.msk [vmem:[#allocation3 + $0xe0] sm:$0xff] %vm313_vm2, %v6898_v0 }
 0x222   : > { %v3020_v26 = vld [vmem:[#allocation2 + $0x1ea] sm:$0xff]  ;;  %v3021_v22 = vld [vmem:[#allocation2 + $0x1f2] sm:$0xff]  ;;  %3143 = vst.msk [vmem:[#allocation3 + $0xe8] sm:$0xff] %vm313_vm2, %v6901_v34  ;;  %v3218_v30 = vmax.f32 %v3184_v37, %v6766_v63  ;;  %v3411_v63 = vpack.c.bf16 %v6895_v2, %v6892_v39 }
 0x223   : > { %v3185_v18 = vld [vmem:[#allocation3 + $0x28] sm:$0xff]  ;;  %v3052_v14 = vmax.f32 %v2988_v20, %v3020_v26  ;;  %v3053_v12 = vmax.f32 %v2989_v45, %v3021_v22  ;;  %v6909_v32 = vmax.f32 %v3080_v48, %v6677_v61  ;;  %v6912_v13 = vmax.f32 %v3081_v46, %v6788_v42  ;;  %v7601_v45 = vld [vmem:[#allocation38_spill] sm:$0xff]  ;;  %v3293_v20 = vld [vmem:[#allocation3 + $0xb8] sm:$0xff] }
 0x224   : > { %v3217_v25 = vmax.f32 %v6755_v62, %v3185_v18  ;;  %v3219_v22 = vmax.f32 %v3185_v18, %v6783_v6  ;;  %v3344_v62 = vmax.f32 %v3216_v60, %v6824_v49  ;;  %v3346_v53 = vmax.f32 %v3218_v30, %v3314_v31  ;;  %v3290_v6 = vld [vmem:[#allocation3 + $0xa0] sm:$0xff]  ;;  %v7602_v26 = vld [vmem:[#allocation33_spill] sm:$0xff]  ;;  %v3292_v44 = vld [vmem:[#allocation3 + $0xb0] sm:$0xff] }
 0x225   : > { %v3084_v41 = vmax.f32 %v2956_v54, %v3052_v14  ;;  %v3085_v3 = vmax.f32 %v2957_v57, %v3053_v12  ;;  %3144 = vst.msk [vmem:[#allocation3 + $0xf0] sm:$0xff] %vm313_vm2, %v6909_v32  ;;  %3145 = vst.msk [vmem:[#allocation3 + $0xf8] sm:$0xff] %vm313_vm2, %v6912_v13  ;;  %v6927_v28 = vmax.f32 %v3351_v5, %v7601_v45  ;;  %v3294_v54 = vld [vmem:[#allocation3 + $0xc0] sm:$0xff]  ;;  %v7603_v24 = vld [vmem:[#allocation5_spill] sm:$0xff] }
 0x226   : > { %v3345_v61 = vmax.f32 %v3217_v25, %v6835_v38  ;;  %v3347_v42 = vmax.f32 %v3219_v22, %v3315_v55  ;;  %v3376_v35 = vmax.f32 %v3344_v62, %v7602_v26  ;;  %v3295_v31 = vld [vmem:[#allocation3 + $0xc8] sm:$0xff]  ;;  %v7604_v55 = vld [vmem:[#allocation28_spill] sm:$0xff]  ;;  %v7605_v5 = vld [vmem:[#allocation6_spill] sm:$0xff]  ;;  %v3326_v57 = vmax.f32 %v3292_v44, %v3294_v54 }
 0x227   : > { %v6932_v49 = vmax.f32 %v3084_v41, %v6726_v52  ;;  %v6935_v38 = vmax.f32 %v3085_v3, %v6778_v17  ;;  %v3378_v58 = vmax.f32 %v3346_v53, %v7604_v55  ;;  %v3291_v21 = vld [vmem:[#allocation3 + $0xa8] sm:$0xff]  ;;  %v3296_v9 = vld [vmem:[#allocation3 + $0xd0] sm:$0xff]  ;;  %v3322_v17 = vmax.f32 %v6826_v19, %v3290_v6  ;;  %v3297_v10 = vld [vmem:[#allocation3 + $0xd8] sm:$0xff] }
 0x228   : > { %v3377_v29 = vmax.f32 %v3345_v61, %v7603_v24  ;;  %v3379_v56 = vmax.f32 %v3347_v42, %v7605_v5  ;;  %v3327_v46 = vmax.f32 %v3293_v20, %v3295_v31  ;;  %v3410_v37 = vpack.c.bf16 %v6927_v28, %v6889_v51  ;;  %v3298_v60 = vld [vmem:[#allocation3 + $0xe0] sm:$0xff] }
 0x229   : > { %3148 = vst.msk [vmem:[#allocation3 + $0x110] sm:$0xff] %vm313_vm2, %v6932_v49  ;;  %3149 = vst.msk [vmem:[#allocation3 + $0x118] sm:$0xff] %vm313_vm2, %v6935_v38  ;;  %v3323_v18 = vmax.f32 %v6841_v50, %v3291_v21  ;;  %v3358_v14 = vmax.f32 %v6857_v7, %v3326_v57  ;;  %v3328_v12 = vmax.f32 %v3294_v54, %v3296_v9  ;;  %v3299_v25 = vld [vmem:[#allocation3 + $0xe8] sm:$0xff] }
 0x22a   : > { %v3407_v52 = vpack.c.bf16 %v3377_v29, %v3376_v35  ;;  %v3408_v48 = vpack.c.bf16 %v3379_v56, %v3378_v58  ;;  %v6952_v19 = vmax.f32 %v3290_v6, %v3292_v44  ;;  %v3359_v30 = vmax.f32 %v6867_v16, %v3327_v46  ;;  %v3302_v16 = vld [vmem:[#allocation3 + $0x100] sm:$0xff]  ;;  %v3303_v6 = vld [vmem:[#allocation3 + $0x108] sm:$0xff] }
 0x22b   : > { %v3329_v22 = vmax.f32 %v3295_v31, %v3297_v10  ;;  %v3330_v41 = vmax.f32 %v3296_v9, %v3298_v60  ;;  %v3354_v3 = vmax.f32 %v6837_v43, %v3322_v17  ;;  %v6956_v62 = vmax.f32 %v3291_v21, %v3293_v20 }
 0x22c   : > { %4397 = vmatmul.mubr.msk.bf16.vlgmr.msra.gmra.mrb[16].mxu1 %vm313_vm2, %v3407_v52  ;;  %v6959_v51 = vmax.f32 %v3358_v14, %v6681_v27  ;;  %v3360_v50 = vmax.f32 %v3322_v17, %v3328_v12  ;;  %v3300_v7 = vld [vmem:[#allocation3 + $0xf0] sm:$0xff]  ;;  %v3301_v61 = vld [vmem:[#allocation3 + $0xf8] sm:$0xff]  ;;  %v6962_v53 = vmax.f32 %v3359_v30, %v6684_v36  ;;  %v3331_v45 = vmax.f32 %v3297_v10, %v3299_v25 }
 0x22d   : > { %4400 = vmatprep.mubr.msk.bf16.mxu1 %vm313_vm2, %v3408_v48  ;;  %v3361_v42 = vmax.f32 %v3323_v18, %v3329_v22  ;;  %v3362_v28 = vmax.f32 %v6952_v19, %v3330_v41  ;;  %v3355_v54 = vmax.f32 %v6839_v40, %v3323_v18  ;;  %v3332_v26 = vmax.f32 %v3298_v60, %v3300_v7  ;;  %v3308_v10 = vld [vmem:[#allocation3 + $0x130] sm:$0xff]  ;;  %v3307_v18 = vld [vmem:[#allocation3 + $0x128] sm:$0xff]  ;;  %v3309_v14 = vld [vmem:[#allocation3 + $0x138] sm:$0xff] }
 0x22e   : > { %v3392_v43 = vmax.f32 %v3360_v50, %v6708_v23  ;;  %v3333_v35 = vmax.f32 %v3299_v25, %v3301_v61  ;;  %v3414_v27 = vpack.c.bf16 %v6962_v53, %v6959_v51  ;;  %v3363_v36 = vmax.f32 %v6956_v62, %v3331_v45  ;;  %v7607_v25 = vld [vmem:[#allocation37_spill] sm:$0xff] }
 0x22f   : > { %v3393_v24 = vmax.f32 %v3361_v42, %v6711_v11  ;;  %v3394_v29 = vmax.f32 %v3362_v28, %v6719_v15  ;;  %v3364_v58 = vmax.f32 %v3326_v57, %v3332_v26  ;;  %v3334_v56 = vmax.f32 %v3300_v7, %v3302_v16  ;;  %v3306_v57 = vld [vmem:[#allocation3 + $0x120] sm:$0xff]  ;;  %v7608_v7 = vld [vmem:[#allocation42_spill] sm:$0xff] }
 0x230   : > { %v3304_v31 = vld [vmem:[#allocation3 + $0x110] sm:$0xff]  ;;  %v3305_v55 = vld [vmem:[#allocation3 + $0x118] sm:$0xff]  ;;  %v3365_v5 = vmax.f32 %v3327_v46, %v3333_v35  ;;  %v3335_v21 = vmax.f32 %v3301_v61, %v3303_v6  ;;  %v3395_v23 = vmax.f32 %v3363_v36, %v6733_v1  ;;  %v7606_v52 = vpack.c.bf16 %v6873_v59, %v6870_v47 }
 0x231   : > { %v3415_v40 = vpack.c.bf16 %v3393_v24, %v3392_v43  ;;  %v3336_v44 = vmax.f32 %v3302_v16, %v3304_v31  ;;  %v3337_v9 = vmax.f32 %v3303_v6, %v3305_v55  ;;  %v3396_v11 = vmax.f32 %v3364_v58, %v6746_v8  ;;  %v7613_v6 = vld [vmem:[#allocation29_spill] sm:$0xff] }
 0x232   : > { %v3397_v15 = vmax.f32 %v3365_v5, %v6749_v4  ;;  %v3366_v17 = vmax.f32 %v3328_v12, %v3334_v56  ;;  %v3367_v20 = vmax.f32 %v3329_v22, %v3335_v21  ;;  %v3416_v48 = vpack.c.bf16 %v3395_v23, %v3394_v29 }
 0x233   : > { %v3368_v46 = vmax.f32 %v3330_v41, %v3336_v44  ;;  %v3369_v1 = vmax.f32 %v3331_v45, %v3337_v9  ;;  %v3386_v60 = vmax.f32 %v3354_v3, %v6609_v33  ;;  %v3387_v4 = vmax.f32 %v3355_v54, %v7607_v25  ;;  %v7609_v33 = vld [vmem:[#allocation25_spill] sm:$0xff] }
 0x234   : > { %4401 = vmatmul.mubr.msk.bf16.gmra.mrb[20].mxu1 %vm313_vm2, %v7606_v52  ;;  %v3417_v47 = vpack.c.bf16 %v3397_v15, %v3396_v11  ;;  %v3398_v59 = vmax.f32 %v3366_v17, %v6898_v0  ;;  %v3399_v8 = vmax.f32 %v3367_v20, %v6901_v34  ;;  %v3340_v22 = vmax.f32 %v3306_v57, %v3308_v10  ;;  %v7611_v45 = vld [vmem:[#allocation41_spill] sm:$0xff] }
 0x235   : > { %4404 = vmatprep.mubr.msk.bf16.mxu1 %vm313_vm2, %v3410_v37  ;;  %v3400_v12 = vmax.f32 %v3368_v46, %v6909_v32  ;;  %v3401_v30 = vmax.f32 %v3369_v1, %v6912_v13  ;;  %v3341_v51 = vmax.f32 %v3307_v18, %v3309_v14  ;;  %v3356_v61 = vmax.f32 %v7608_v7, %v6952_v19  ;;  %v7610_v13 = vld [vmem:[#allocation36_spill] sm:$0xff] }
 0x236   : > { %v3418_v37 = vpack.c.bf16 %v3399_v8, %v3398_v59  ;;  %v3372_v50 = vmax.f32 %v3334_v56, %v3340_v22  ;;  %v3357_v3 = vmax.f32 %v7609_v33, %v6956_v62  ;;  %v3412_v53 = vpack.c.bf16 %v3387_v4, %v3386_v60  ;;  %v7057_v4 = vld [vmem:[%s7356_s5] ss:$0 sm:$0xff] }
 0x237   : > { %v3419_v41 = vpack.c.bf16 %v3401_v30, %v3400_v12  ;;  %v3373_v0 = vmax.f32 %v3335_v21, %v3341_v51  ;;  %v3388_v42 = vmax.f32 %v3356_v61, %v7610_v13  ;;  %v3338_v39 = vmax.f32 %v3304_v31, %v3306_v57  ;;  %v7062_v22 = vld [vmem:[%s7357_s6] ss:$0 sm:$0xff] }
 0x238   : > { %v3404_v34 = vmax.f32 %v3372_v50, %v6932_v49  ;;  %v3389_v19 = vmax.f32 %v3357_v3, %v7611_v45  ;;  %v3339_v2 = vmax.f32 %v3305_v55, %v3307_v18 }
 0x239   : > { %v3405_v32 = vmax.f32 %v3373_v0, %v6935_v38  ;;  %v7612_v38 = vld [vmem:[#allocation31_spill] sm:$0xff] }
 0x23a   : > { %v3413_v16 = vpack.c.bf16 %v3389_v19, %v3388_v42  ;;  %v3371_v49 = vmax.f32 %v3333_v35, %v3339_v2 }
 0x23b   : > { %v3421_v28 = vpack.c.bf16 %v3405_v32, %v3404_v34 }
 0x23c   : > { %4405 = vmatmul.mubr.msk.bf16.gmra.mrb[24].mxu1 %vm313_vm2, %v3411_v63  ;;  %v3370_v63 = vmax.f32 %v3332_v26, %v3338_v39  ;;  %v3403_v54 = vmax.f32 %v3371_v49, %v7613_v6 }
 0x23d   : > { %4408 = vmatprep.mubr.msk.bf16.mxu1 %vm313_vm2, %v3412_v53 }
 0x23e   : > { %v3402_v62 = vmax.f32 %v3370_v63, %v7612_v38 }
 0x240   : > { %v3420_v43 = vpack.c.bf16 %v3403_v54, %v3402_v62 }
 0x244   : > { %4409 = vmatmul.mubr.msk.bf16.gmra.mrb[28].mxu1 %vm313_vm2, %v3413_v16 }
 0x245   : > { %4412 = vmatprep.mubr.msk.bf16.mxu1 %vm313_vm2, %v3414_v27 }
 0x24c   : > { %4413 = vmatmul.mubr.msk.bf16.gmra.mrb[0].mxu1 %vm313_vm2, %v3415_v40 }
 0x24d   : > { %4416 = vmatprep.mubr.msk.bf16.mxu1 %vm313_vm2, %v3416_v48 }
 0x254   : > { %4417 = vmatmul.mubr.msk.bf16.gmra.mrb[4].mxu1 %vm313_vm2, %v3417_v47 }
 0x255   : > { %4420 = vmatprep.mubr.msk.bf16.mxu1 %vm313_vm2, %v3418_v37 }
 0x25c   : > { %4421 = vmatmul.mubr.msk.bf16.gmra.mrb[8].mxu1 %vm313_vm2, %v3419_v41 }
 0x25d   : > { %4424 = vmatprep.mubr.msk.bf16.mxu1 %vm313_vm2, %v3420_v43 }
 0x264   : > { %4425 = vmatmul.mubr.msk.bf16.gmra.mrb[12].mxu1 %vm313_vm2, %v3421_v28 }
 0x272   : > { %v7010_v27 = vpop.f32.mrb[48].mxu0 }
 0x273   : > { %v7012_v24 = vpop.f32.mrb[49].mxu0 }
 0x274   : > { %v7014_v26 = vpop.f32.mrb[50].mxu0 }
 0x275   : > { %v7016_v35 = vpop.f32.mrb[51].mxu0 }
 0x27d   : > { %v7018_v36 = vpop.f32.mrb[52].mxu0 }
 0x27e   : > { %v7020_v29 = vpop.f32.mrb[53].mxu0 }
 0x27f   : > { %v7022_v31 = vpop.f32.mrb[54].mxu0 }
 0x280   : > { %v7024_v55 = vpop.f32.mrb[55].mxu0 }
 0x295   : > { %v7026_v58 = vpop.f32.mrb[56].mxu0 }
 0x296   : > { %v7028_v5 = vpop.f32.mrb[57].mxu0 }
 0x297   : > { %v7030_v56 = vpop.f32.mrb[58].mxu0 }
 0x298   : > { %v7032_v21 = vpop.f32.mrb[59].mxu0 }
 0x2a7   : > { %v7034_v40 = vpop.f32.mrb[60].mxu0 }
 0x2a8   : > { %v7036_v23 = vpop.f32.mrb[61].mxu0 }
 0x2a9   : > { %v7038_v44 = vpop.f32.mrb[62].mxu0 }
 0x2aa   : > { %v7040_v9 = vpop.f32.mrb[63].mxu0 }
 0x2bb   : > { %v4330_v52 = vpop.f32.mrb[32].mxu0 }
 0x2bc   : > { %v1865_v11 = vpop.f32.mrb[33].mxu0 }
 0x2bd   : > { %v4331_v15 = vpop.f32.mrb[34].mxu0 }
 0x2be   : > { %v1868_v17 = vpop.f32.mrb[35].mxu0 }
 0x2c3   : > { %v4334_v20 = vpop.f32.mrb[36].mxu0 }
 0x2c4   : > { %v1881_v57 = vpop.f32.mrb[37].mxu0 }
 0x2c5   : > { %v4335_v10 = vpop.f32.mrb[38].mxu0 }
 0x2c6   : > { %v1884_v48 = vpop.f32.mrb[39].mxu0 }
 0x2cb   : > { %v4338_v46 = vpop.f32.mrb[40].mxu0 }
 0x2cc   : > { %v1897_v1 = vpop.f32.mrb[41].mxu0 }
 0x2cd   : > { %v7042_v18 = vpop.f32.mrb[42].mxu0 }
 0x2ce   : > { %v7044_v14 = vpop.f32.mrb[43].mxu0 }
 0x2d3   : > { %v7046_v60 = vpop.f32.mrb[44].mxu0 }
 0x2d4   : > { %v7048_v47 = vpop.f32.mrb[45].mxu0 }
 0x2d5   : > { %v7050_v59 = vpop.f32.mrb[46].mxu0 }
 0x2d6   : > { %v7052_v8 = vpop.f32.mrb[47].mxu0 }
 0x2ff   : > { %v4398_v25 = vpop.f32.mrb[16].mxu1 }
 0x300   : > { %v4430_v12 = vadd.f32 %v4398_v25, %v4330_v52  ;;  %v3509_v30 = vpop.f32.mrb[17].mxu1 }
 0x301   : > { %v4431_v37 = vadd.f32 %v3509_v30, %v1865_v11  ;;  %v4399_v51 = vpop.f32.mrb[18].mxu1 }
 0x302   : > { %v3677_v41 = vmul.f32 %v4430_v12, %v7057_v4  ;;  %v4432_v50 = vadd.f32 %v4399_v51, %v4331_v15  ;;  %v3512_v7 = vpop.f32.mrb[19].mxu1 }
 0x303   : > { %v3675_v61 = vmul.f32 %v4431_v37, %v7057_v4  ;;  %v4433_v33 = vadd.f32 %v3512_v7, %v1868_v17 }
 0x304   : > { %v7067_v3 = vadd.f32 %v7062_v22, %v3677_v41  ;;  %v3678_v0 = vmul.f32 %v4432_v50, %v7057_v4 }
 0x305   : > { %v7071_v53 = vadd.f32 %v7062_v22, %v3675_v61  ;;  %v3676_v34 = vmul.f32 %v4433_v33, %v7057_v4 }
 0x306   : > { %v3748_v32 = vsub.f32 0.0, %v7067_v3  ;;  %v7076_v13 = vadd.f32 %v7062_v22, %v3678_v0 }
 0x307   : > { %v3746_v42 = vsub.f32 0.0, %v7071_v53  ;;  %v7080_v45 = vadd.f32 %v7062_v22, %v3676_v34  ;;  %v4402_v19 = vpop.f32.mrb[20].mxu1 }
 0x308   : > { %v3782_v28 = vmul.f32 1.442695, %v3748_v32  ;;  %v3749_v16 = vsub.f32 0.0, %v7076_v13  ;;  %v4434_v39 = vadd.f32 %v4402_v19, %v4334_v20  ;;  %v3525_v2 = vpop.f32.mrb[21].mxu1 }
 0x309   : > { %v3778_v63 = vmul.f32 1.442695, %v3746_v42  ;;  %v3747_v49 = vsub.f32 0.0, %v7080_v45  ;;  %v4435_v38 = vadd.f32 %v3525_v2, %v1881_v57  ;;  %v4403_v62 = vpop.f32.mrb[22].mxu1 }
 0x30a   : > { %4685 = vpow2.f32 %v3782_v28  ;;  %v3784_v6 = vmul.f32 1.442695, %v3749_v16  ;;  %v3681_v54 = vmul.f32 %v4434_v39, %v7057_v4  ;;  %v4436_v43 = vadd.f32 %v4403_v62, %v4335_v10  ;;  %v3528_v52 = vpop.f32.mrb[23].mxu1 }
 0x30b   : > { %4687 = vpow2.f32 %v3778_v63  ;;  %v3780_v11 = vmul.f32 1.442695, %v3747_v49  ;;  %v3679_v15 = vmul.f32 %v4435_v38, %v7057_v4  ;;  %v4437_v17 = vadd.f32 %v3528_v52, %v1884_v48 }
 0x30c   : > { %4689 = vpow2.f32 %v3784_v6  ;;  %v7087_v20 = vadd.f32 %v7062_v22, %v3681_v54  ;;  %v3682_v25 = vmul.f32 %v4436_v43, %v7057_v4 }
 0x30d   : > { %4691 = vpow2.f32 %v3780_v11  ;;  %v7091_v57 = vadd.f32 %v7062_v22, %v3679_v15  ;;  %v3680_v12 = vmul.f32 %v4437_v17, %v7057_v4 }
 0x30e   : > { %v3752_v10 = vsub.f32 0.0, %v7087_v20  ;;  %v7096_v30 = vadd.f32 %v7062_v22, %v3682_v25 }
 0x30f   : > { %v3750_v37 = vsub.f32 0.0, %v7091_v57  ;;  %v7100_v48 = vadd.f32 %v7062_v22, %v3680_v12  ;;  %v4406_v51 = vpop.f32.mrb[24].mxu1 }
 0x310   : > { %v3790_v41 = vmul.f32 1.442695, %v3752_v10  ;;  %v3753_v50 = vsub.f32 0.0, %v7096_v30  ;;  %v4438_v7 = vadd.f32 %v4406_v51, %v4338_v46  ;;  %v3541_v61 = vpop.f32.mrb[25].mxu1 }
 0x311   : > { %v3786_v33 = vmul.f32 1.442695, %v3750_v37  ;;  %v3751_v0 = vsub.f32 0.0, %v7100_v48  ;;  %v4439_v34 = vadd.f32 %v3541_v61, %v1897_v1  ;;  %v4407_v32 = vpop.f32.mrb[26].mxu1 }
 0x312   : > { %4693 = vpow2.f32 %v3790_v41  ;;  %v3792_v42 = vmul.f32 1.442695, %v3753_v50  ;;  %v3685_v19 = vmul.f32 %v4438_v7, %v7057_v4  ;;  %v4440_v28 = vadd.f32 %v4407_v32, %v7042_v18  ;;  %v3544_v16 = vpop.f32.mrb[27].mxu1 }
 0x313   : > { %4695 = vpow2.f32 %v3786_v33  ;;  %v3788_v39 = vmul.f32 1.442695, %v3751_v0  ;;  %v3683_v2 = vmul.f32 %v4439_v34, %v7057_v4  ;;  %v4441_v63 = vadd.f32 %v3544_v16, %v7044_v14 }
 0x314   : > { %v4686_v46 = vpop.eup %4685  ;;  %4697 = vpow2.f32 %v3792_v42  ;;  %v7109_v49 = vadd.f32 %v7062_v22, %v3685_v19  ;;  %v3686_v1 = vmul.f32 %v4440_v28, %v7057_v4 }
 0x315   : > { %v4688_v38 = vpop.eup %4687  ;;  %v3844_v62 = vadd.f32 1.0, %v4686_v46  ;;  %4699 = vpow2.f32 %v3788_v39  ;;  %v7113_v6 = vadd.f32 %v7062_v22, %v3683_v2  ;;  %v3684_v18 = vmul.f32 %v4441_v63, %v7057_v4 }
 0x316   : > { %v4690_v54 = vpop.eup %4689  ;;  %v3842_v43 = vadd.f32 1.0, %v4688_v38  ;;  %v3756_v52 = vsub.f32 0.0, %v7109_v49  ;;  %v7118_v14 = vadd.f32 %v7062_v22, %v3686_v1 }
 0x317   : > { %v4692_v11 = vpop.eup %4691  ;;  %4701 = vrcp.f32 %v3844_v62  ;;  %v3845_v15 = vadd.f32 1.0, %v4690_v54  ;;  %v3754_v17 = vsub.f32 0.0, %v7113_v6  ;;  %v7122_v25 = vadd.f32 %v7062_v22, %v3684_v18  ;;  %v4410_v12 = vpop.f32.mrb[28].mxu1 }
 0x318   : > { %4703 = vrcp.f32 %v3842_v43  ;;  %v3843_v10 = vadd.f32 1.0, %v4692_v11  ;;  %v3798_v37 = vmul.f32 1.442695, %v3756_v52  ;;  %v3757_v51 = vsub.f32 0.0, %v7118_v14  ;;  %v3557_v41 = vpop.f32.mrb[29].mxu1 }
 0x319   : > { %4705 = vrcp.f32 %v3845_v15  ;;  %v3794_v50 = vmul.f32 1.442695, %v3754_v17  ;;  %v3755_v7 = vsub.f32 0.0, %v7122_v25  ;;  %v4442_v61 = vadd.f32 %v4410_v12, %v7046_v60  ;;  %v4411_v33 = vpop.f32.mrb[30].mxu1 }
 0x31a   : > { %4707 = vrcp.f32 %v3843_v10  ;;  %v3800_v0 = vmul.f32 1.442695, %v3757_v51  ;;  %v4443_v34 = vadd.f32 %v3557_v41, %v7048_v47  ;;  %v4444_v32 = vadd.f32 %v4411_v33, %v7050_v59  ;;  %v3560_v42 = vpop.f32.mrb[31].mxu1 }
 0x31b   : > { %4709 = vpow2.f32 %v3798_v37  ;;  %v3796_v19 = vmul.f32 1.442695, %v3755_v7  ;;  %v3689_v28 = vmul.f32 %v4442_v61, %v7057_v4  ;;  %v4445_v16 = vadd.f32 %v3560_v42, %v7052_v8 }
 0x31c   : > { %v4694_v39 = vpop.eup %4693  ;;  %4711 = vpow2.f32 %v3794_v50  ;;  %v3687_v2 = vmul.f32 %v4443_v34, %v7057_v4  ;;  %v3690_v60 = vmul.f32 %v4444_v32, %v7057_v4 }
 0x31d   : > { %v4696_v63 = vpop.eup %4695  ;;  %v3848_v46 = vadd.f32 1.0, %v4694_v39  ;;  %4713 = vpow2.f32 %v3800_v0  ;;  %v7134_v47 = vadd.f32 %v7062_v22, %v3689_v28  ;;  %v3688_v59 = vmul.f32 %v4445_v16, %v7057_v4 }
 0x31e   : > { %v4698_v1 = vpop.eup %4697  ;;  %v3846_v38 = vadd.f32 1.0, %v4696_v63  ;;  %4715 = vpow2.f32 %v3796_v19  ;;  %v7139_v8 = vadd.f32 %v7062_v22, %v3687_v2  ;;  %v7142_v62 = vadd.f32 %v7062_v22, %v3690_v60 }
 0x31f   : > { %v4700_v18 = vpop.eup %4699  ;;  %4717 = vrcp.f32 %v3848_v46  ;;  %v3849_v54 = vadd.f32 1.0, %v4698_v1  ;;  %v3760_v43 = vsub.f32 0.0, %v7134_v47  ;;  %v7146_v52 = vadd.f32 %v7062_v22, %v3688_v59  ;;  %v4414_v11 = vpop.f32.mrb[0].mxu1 }
 0x320   : > { %4719 = vrcp.f32 %v3846_v38  ;;  %v3847_v15 = vadd.f32 1.0, %v4700_v18  ;;  %v3758_v17 = vsub.f32 0.0, %v7139_v8  ;;  %v3761_v12 = vsub.f32 0.0, %v7142_v62  ;;  %v3573_v10 = vpop.f32.mrb[1].mxu1 }
 0x321   : > { %v4702_v37 = vpop.eup %4701  ;;  %4721 = vrcp.f32 %v3849_v54  ;;  %v3806_v51 = vmul.f32 1.442695, %v3760_v43  ;;  %v3759_v41 = vsub.f32 0.0, %v7146_v52  ;;  %v4446_v50 = vadd.f32 %v4414_v11, %v7010_v27  ;;  %v4415_v7 = vpop.f32.mrb[2].mxu1 }
 0x322   : > { %v4704_v61 = vpop.eup %4703  ;;  %v3940_v33 = vmul.f32 %v4702_v37, %v7067_v3  ;;  %4723 = vrcp.f32 %v3847_v15  ;;  %v3802_v0 = vmul.f32 1.442695, %v3758_v17  ;;  %v3808_v34 = vmul.f32 1.442695, %v3761_v12  ;;  %v3576_v32 = vpop.f32.mrb[3].mxu1 }
 0x323   : > { %v4706_v42 = vpop.eup %4705  ;;  %v3938_v19 = vmul.f32 %v4704_v61, %v7071_v53  ;;  %4725 = vpow2.f32 %v3806_v51  ;;  %v3804_v28 = vmul.f32 1.442695, %v3759_v41  ;;  %v3693_v16 = vmul.f32 %v4446_v50, %v7057_v4 }
 0x324   : > { %v4708_v39 = vpop.eup %4707  ;;  %3972 = vst.msk [vmem:[%s7153_s29 + $0x10] sm:$0xff] %vm436_vm3, %v3940_v33  ;;  %v3941_v27 = vmul.f32 %v4706_v42, %v7076_v13  ;;  %4727 = vpow2.f32 %v3802_v0  ;;  %v4447_v3 = vadd.f32 %v3573_v10, %v7012_v24  ;;  %v4448_v2 = vadd.f32 %v4415_v7, %v7014_v26 }
 0x325   : > { %v4710_v60 = vpop.eup %4709  ;;  %3970 = vst.msk [vmem:[%s7153_s29] sm:$0xff] %vm436_vm3, %v3938_v19  ;;  %v3939_v53 = vmul.f32 %v4708_v39, %v7080_v45  ;;  %4729 = vpow2.f32 %v3808_v34  ;;  %v7169_v63 = vadd.f32 %v7062_v22, %v3693_v16  ;;  %v4449_v46 = vadd.f32 %v3576_v32, %v7016_v35 }
 0x326   : > { %v4712_v59 = vpop.eup %4711  ;;  %3973 = vst.msk [vmem:[%s7153_s29 + $0x18] sm:$0xff] %vm436_vm3, %v3941_v27  ;;  %v3852_v13 = vadd.f32 1.0, %v4710_v60  ;;  %4731 = vpow2.f32 %v3804_v28  ;;  %v3691_v24 = vmul.f32 %v4447_v3, %v7057_v4  ;;  %v3694_v26 = vmul.f32 %v4448_v2, %v7057_v4 }
 0x327   : > { %v4714_v1 = vpop.eup %4713  ;;  %3971 = vst.msk [vmem:[%s7153_s29 + $0x8] sm:$0xff] %vm436_vm3, %v3939_v53  ;;  %v3850_v38 = vadd.f32 1.0, %v4712_v59  ;;  %v3764_v45 = vsub.f32 0.0, %v7169_v63  ;;  %v3692_v18 = vmul.f32 %v4449_v46, %v7057_v4  ;;  %v4418_v54 = vpop.f32.mrb[4].mxu1 }
 0x328   : > { %v4716_v43 = vpop.eup %4715  ;;  %4733 = vrcp.f32 %v3852_v13  ;;  %v3853_v35 = vadd.f32 1.0, %v4714_v1  ;;  %v7181_v11 = vadd.f32 %v7062_v22, %v3691_v24  ;;  %v7184_v15 = vadd.f32 %v7062_v22, %v3694_v26  ;;  %v3589_v17 = vpop.f32.mrb[5].mxu1 }
 0x329   : > { %v4718_v12 = vpop.eup %4717  ;;  %4735 = vrcp.f32 %v3850_v38  ;;  %v3851_v10 = vadd.f32 1.0, %v4716_v43  ;;  %v3814_v37 = vmul.f32 1.442695, %v3764_v45  ;;  %v7187_v51 = vadd.f32 %v7062_v22, %v3692_v18  ;;  %v4419_v41 = vpop.f32.mrb[6].mxu1 }
 0x32a   : > { %v4720_v50 = vpop.eup %4719  ;;  %v3944_v7 = vmul.f32 %v4718_v12, %v7087_v20  ;;  %4737 = vrcp.f32 %v3853_v35  ;;  %v3762_v61 = vsub.f32 0.0, %v7181_v11  ;;  %v3765_v33 = vsub.f32 0.0, %v7184_v15  ;;  %v3592_v0 = vpop.f32.mrb[7].mxu1 }
 0x32b   : > { %v4722_v34 = vpop.eup %4721  ;;  %v3942_v32 = vmul.f32 %v4720_v50, %v7091_v57  ;;  %4739 = vrcp.f32 %v3851_v10  ;;  %v3763_v42 = vsub.f32 0.0, %v7187_v51  ;;  %v4450_v19 = vadd.f32 %v4418_v54, %v7018_v36 }
 0x32c   : > { %v4724_v28 = vpop.eup %4723  ;;  %3976 = vst.msk [vmem:[%s7153_s29 + $0x30] sm:$0xff] %vm436_vm3, %v3944_v7  ;;  %v3945_v20 = vmul.f32 %v4722_v34, %v7096_v30  ;;  %4741 = vpow2.f32 %v3814_v37  ;;  %v3810_v16 = vmul.f32 1.442695, %v3762_v61  ;;  %v3816_v39 = vmul.f32 1.442695, %v3765_v33 }
 0x32d   : > { %v4726_v27 = vpop.eup %4725  ;;  %3974 = vst.msk [vmem:[%s7153_s29 + $0x20] sm:$0xff] %vm436_vm3, %v3942_v32  ;;  %v3943_v57 = vmul.f32 %v4724_v28, %v7100_v48  ;;  %v3812_v3 = vmul.f32 1.442695, %v3763_v42  ;;  %v3697_v2 = vmul.f32 %v4450_v19, %v7057_v4  ;;  %v4451_v60 = vadd.f32 %v3589_v17, %v7020_v29 }
 0x32e   : > { %v4728_v36 = vpop.eup %4727  ;;  %3977 = vst.msk [vmem:[%s7153_s29 + $0x38] sm:$0xff] %vm436_vm3, %v3945_v20  ;;  %v3856_v53 = vadd.f32 1.0, %v4726_v27  ;;  %4743 = vpow2.f32 %v3810_v16  ;;  %v4452_v30 = vadd.f32 %v4419_v41, %v7022_v31  ;;  %v4453_v46 = vadd.f32 %v3592_v0, %v7024_v55 }
 0x32f   : > { %v4730_v59 = vpop.eup %4729  ;;  %3975 = vst.msk [vmem:[%s7153_s29 + $0x28] sm:$0xff] %vm436_vm3, %v3943_v57  ;;  %v3854_v13 = vadd.f32 1.0, %v4728_v36  ;;  %4745 = vpow2.f32 %v3816_v39  ;;  %v7210_v48 = vadd.f32 %v7062_v22, %v3697_v2  ;;  %v3695_v24 = vmul.f32 %v4451_v60, %v7057_v4  ;;  %v4422_v29 = vpop.f32.mrb[8].mxu1 }
 0x330   : > { %v4732_v26 = vpop.eup %4731  ;;  %4747 = vrcp.f32 %v3856_v53  ;;  %v3857_v1 = vadd.f32 1.0, %v4730_v59  ;;  %v3698_v38 = vmul.f32 %v4452_v30, %v7057_v4  ;;  %v3696_v31 = vmul.f32 %v4453_v46, %v7057_v4  ;;  %v3605_v45 = vpop.f32.mrb[9].mxu1 }
 0x331   : > { %4749 = vrcp.f32 %v3854_v13  ;;  %v3855_v55 = vadd.f32 1.0, %v4732_v26  ;;  %v3768_v18 = vsub.f32 0.0, %v7210_v48  ;;  %v7217_v54 = vadd.f32 %v7062_v22, %v3695_v24  ;;  %v4423_v43 = vpop.f32.mrb[10].mxu1 }
 0x332   : > { %v4734_v35 = vpop.eup %4733  ;;  %4751 = vrcp.f32 %v3857_v1  ;;  %v7220_v17 = vadd.f32 %v7062_v22, %v3698_v38  ;;  %v7223_v12 = vadd.f32 %v7062_v22, %v3696_v31  ;;  %v4454_v10 = vadd.f32 %v4422_v29, %v7026_v58  ;;  %v3608_v37 = vpop.f32.mrb[11].mxu1 }
 0x333   : > { %v4736_v41 = vpop.eup %4735  ;;  %v3948_v50 = vmul.f32 %v4734_v35, %v7109_v49  ;;  %4753 = vrcp.f32 %v3855_v55  ;;  %v3822_v7 = vmul.f32 1.442695, %v3768_v18  ;;  %v3766_v61 = vsub.f32 0.0, %v7217_v54 }
 0x334   : > { %v4738_v33 = vpop.eup %4737  ;;  %v3946_v0 = vmul.f32 %v4736_v41, %v7113_v6  ;;  %4755 = vpow2.f32 %v3812_v3  ;;  %v3769_v34 = vsub.f32 0.0, %v7220_v17  ;;  %v3767_v32 = vsub.f32 0.0, %v7223_v12 }
 0x335   : > { %v4740_v42 = vpop.eup %4739  ;;  %3980 = vst.msk [vmem:[%s7153_s29 + $0x50] sm:$0xff] %vm436_vm3, %v3948_v50  ;;  %v3949_v58 = vmul.f32 %v4738_v33, %v7118_v14  ;;  %4757 = vpow2.f32 %v3822_v7  ;;  %v3818_v49 = vmul.f32 1.442695, %v3766_v61  ;;  %v3701_v19 = vmul.f32 %v4454_v10, %v7057_v4 }
 0x336   : > { %v4742_v28 = vpop.eup %4741  ;;  %3978 = vst.msk [vmem:[%s7153_s29 + $0x40] sm:$0xff] %vm436_vm3, %v3946_v0  ;;  %v3947_v6 = vmul.f32 %v4740_v42, %v7122_v25  ;;  %v3824_v20 = vmul.f32 1.442695, %v3769_v34  ;;  %v3820_v16 = vmul.f32 1.442695, %v3767_v32  ;;  %v4455_v39 = vadd.f32 %v3605_v45, %v7028_v5 }
 0x337   : > { %3981 = vst.msk [vmem:[%s7153_s29 + $0x58] sm:$0xff] %vm436_vm3, %v3949_v58  ;;  %v3860_v27 = vadd.f32 1.0, %v4742_v28  ;;  %4759 = vpow2.f32 %v3818_v49  ;;  %v7242_v14 = vadd.f32 %v7062_v22, %v3701_v19  ;;  %v4456_v57 = vadd.f32 %v4423_v43, %v7030_v56  ;;  %v4426_v3 = vpop.f32.mrb[12].mxu1 }
 0x338   : > { %v4744_v2 = vpop.eup %4743  ;;  %3979 = vst.msk [vmem:[%s7153_s29 + $0x48] sm:$0xff] %vm436_vm3, %v3947_v6  ;;  %4761 = vpow2.f32 %v3824_v20  ;;  %v3699_v25 = vmul.f32 %v4455_v39, %v7057_v4  ;;  %v4457_v60 = vadd.f32 %v3608_v37, %v7032_v21  ;;  %v4458_v5 = vadd.f32 %v4426_v3, %v7034_v40  ;;  %v3621_v36 = vpop.f32.mrb[13].mxu1 }
 0x339   : > { %v4746_v53 = vpop.eup %4745  ;;  %4763 = vrcp.f32 %v3860_v27  ;;  %v3858_v30 = vadd.f32 1.0, %v4744_v2  ;;  %v3772_v46 = vsub.f32 0.0, %v7242_v14  ;;  %v3702_v59 = vmul.f32 %v4456_v57, %v7057_v4  ;;  %v4427_v56 = vpop.f32.mrb[14].mxu1 }
 0x33a   : > { %v4748_v13 = vpop.eup %4747  ;;  %v3861_v24 = vadd.f32 1.0, %v4746_v53  ;;  %4765 = vpow2.f32 %v3820_v16  ;;  %v7253_v29 = vadd.f32 %v7062_v22, %v3699_v25  ;;  %v3700_v21 = vmul.f32 %v4457_v60, %v7057_v4  ;;  %v3624_v26 = vpop.f32.mrb[15].mxu1 }
 0x33b   : > { %v4750_v40 = vpop.eup %4749  ;;  %v3952_v1 = vmul.f32 %v4748_v13, %v7134_v47  ;;  %4767 = vrcp.f32 %v3858_v30  ;;  %v3830_v38 = vmul.f32 1.442695, %v3772_v46  ;;  %v7258_v31 = vadd.f32 %v7062_v22, %v3702_v59 }
 0x33c   : > { %v4752_v45 = vpop.eup %4751  ;;  %v3950_v55 = vmul.f32 %v4750_v40, %v7139_v8  ;;  %4769 = vrcp.f32 %v3861_v24  ;;  %v3770_v18 = vsub.f32 0.0, %v7253_v29  ;;  %v7263_v43 = vadd.f32 %v7062_v22, %v3700_v21 }
 0x33d   : > { %v4754_v35 = vpop.eup %4753  ;;  %3984 = vst.msk [vmem:[%s7153_s29 + $0x70] sm:$0xff] %vm436_vm3, %v3952_v1  ;;  %v3953_v47 = vmul.f32 %v4752_v45, %v7142_v62  ;;  %4771 = vpow2.f32 %v3830_v38  ;;  %v3773_v10 = vsub.f32 0.0, %v7258_v31  ;;  %v3705_v37 = vmul.f32 %v4458_v5, %v7057_v4 }
 0x33e   : > { %v4756_v41 = vpop.eup %4755  ;;  %3982 = vst.msk [vmem:[%s7153_s29 + $0x60] sm:$0xff] %vm436_vm3, %v3950_v55  ;;  %v3951_v8 = vmul.f32 %v4754_v35, %v7146_v52  ;;  %v3826_v50 = vmul.f32 1.442695, %v3770_v18  ;;  %v3771_v7 = vsub.f32 0.0, %v7263_v43  ;;  %v4459_v61 = vadd.f32 %v3621_v36, %v7036_v23 }
 0x33f   : > { %v4758_v33 = vpop.eup %4757  ;;  %3985 = vst.msk [vmem:[%s7153_s29 + $0x78] sm:$0xff] %vm436_vm3, %v3953_v47  ;;  %v3859_v62 = vadd.f32 1.0, %v4756_v41  ;;  %v3832_v0 = vmul.f32 1.442695, %v3773_v10  ;;  %v7278_v34 = vadd.f32 %v7062_v22, %v3705_v37  ;;  %v4460_v32 = vadd.f32 %v4427_v56, %v7038_v44 }
 0x340   : > { %3983 = vst.msk [vmem:[%s7153_s29 + $0x68] sm:$0xff] %vm436_vm3, %v3951_v8  ;;  %v3864_v42 = vadd.f32 1.0, %v4758_v33  ;;  %4773 = vpow2.f32 %v3826_v50  ;;  %v3703_v52 = vmul.f32 %v4459_v61, %v7057_v4  ;;  %v4461_v19 = vadd.f32 %v3624_v26, %v7040_v9 }
 0x341   : > { %v4760_v58 = vpop.eup %4759  ;;  %4775 = vrcp.f32 %v3859_v62  ;;  %v3776_v23 = vsub.f32 0.0, %v7278_v34  ;;  %v3706_v49 = vmul.f32 %v4460_v32, %v7057_v4  ;;  %v3828_v20 = vmul.f32 1.442695, %v3771_v7 }
 0x342   : > { %v4762_v28 = vpop.eup %4761  ;;  %4777 = vrcp.f32 %v3864_v42  ;;  %v3862_v6 = vadd.f32 1.0, %v4760_v58  ;;  %v7288_v44 = vadd.f32 %v7062_v22, %v3703_v52  ;;  %v3704_v25 = vmul.f32 %v4461_v19, %v7057_v4 }
 0x343   : > { %v4764_v16 = vpop.eup %4763  ;;  %v3865_v39 = vadd.f32 1.0, %v4762_v28  ;;  %4779 = vpow2.f32 %v3832_v0  ;;  %v3838_v27 = vmul.f32 1.442695, %v3776_v23  ;;  %v7291_v57 = vadd.f32 %v7062_v22, %v3706_v49 }
 0x344   : > { %v4766_v3 = vpop.eup %4765  ;;  %v3956_v2 = vmul.f32 %v4764_v16, %v7169_v63  ;;  %4781 = vrcp.f32 %v3862_v6  ;;  %v3774_v9 = vsub.f32 0.0, %v7288_v44  ;;  %v7301_v63 = vadd.f32 %v7062_v22, %v3704_v25 }
 0x345   : > { %v4768_v60 = vpop.eup %4767  ;;  %4783 = vrcp.f32 %v3865_v39  ;;  %v3863_v5 = vadd.f32 1.0, %v4766_v3  ;;  %v3777_v36 = vsub.f32 0.0, %v7291_v57 }
 0x346   : > { %v4770_v53 = vpop.eup %4769  ;;  %3988 = vst.msk [vmem:[%s7153_s29 + $0x90] sm:$0xff] %vm436_vm3, %v3956_v2  ;;  %v3954_v30 = vmul.f32 %v4768_v60, %v7181_v11  ;;  %4785 = vpow2.f32 %v3828_v20  ;;  %v3834_v46 = vmul.f32 1.442695, %v3774_v9  ;;  %v3775_v24 = vsub.f32 0.0, %v7301_v63 }
 0x347   : > { %v4772_v59 = vpop.eup %4771  ;;  %v3957_v56 = vmul.f32 %v4770_v53, %v7184_v15  ;;  %4787 = vrcp.f32 %v3863_v5  ;;  %v3840_v4 = vmul.f32 1.442695, %v3777_v36 }
 0x348   : > { %3986 = vst.msk [vmem:[%s7153_s29 + $0x80] sm:$0xff] %vm436_vm3, %v3954_v30  ;;  %v3868_v13 = vadd.f32 1.0, %v4772_v59  ;;  %4789 = vpow2.f32 %v3838_v27  ;;  %v3836_v22 = vmul.f32 1.442695, %v3775_v24 }
 0x349   : > { %3989 = vst.msk [vmem:[%s7153_s29 + $0x98] sm:$0xff] %vm436_vm3, %v3957_v56  ;;  %4791 = vpow2.f32 %v3834_v46 }
 0x34a   : > { %v4774_v11 = vpop.eup %4773  ;;  %4793 = vrcp.f32 %v3868_v13 }
 0x34b   : > { %v4776_v21 = vpop.eup %4775  ;;  %v3866_v26 = vadd.f32 1.0, %v4774_v11  ;;  %4795 = vpow2.f32 %v3840_v4 }
 0x34c   : > { %v4778_v15 = vpop.eup %4777  ;;  %v3955_v40 = vmul.f32 %v4776_v21, %v7187_v51  ;;  %4797 = vpow2.f32 %v3836_v22 }
 0x34d   : > { %v4780_v1 = vpop.eup %4779  ;;  %v3960_v38 = vmul.f32 %v4778_v15, %v7210_v48  ;;  %4799 = vrcp.f32 %v3866_v26 }
 0x34e   : > { %v4782_v45 = vpop.eup %4781  ;;  %3987 = vst.msk [vmem:[%s7153_s29 + $0x88] sm:$0xff] %vm436_vm3, %v3955_v40  ;;  %v3869_v55 = vadd.f32 1.0, %v4780_v1 }
 0x34f   : > { %v4784_v18 = vpop.eup %4783  ;;  %3992 = vst.msk [vmem:[%s7153_s29 + $0xb0] sm:$0xff] %vm436_vm3, %v3960_v38  ;;  %v3958_v35 = vmul.f32 %v4782_v45, %v7217_v54 }
 0x350   : > { %v4786_v47 = vpop.eup %4785  ;;  %v3961_v10 = vmul.f32 %v4784_v18, %v7220_v17  ;;  %4801 = vrcp.f32 %v3869_v55 }
 0x351   : > { %v4788_v51 = vpop.eup %4787  ;;  %3990 = vst.msk [vmem:[%s7153_s29 + $0xa0] sm:$0xff] %vm436_vm3, %v3958_v35  ;;  %v3867_v37 = vadd.f32 1.0, %v4786_v47 }
 0x352   : > { %v4790_v48 = vpop.eup %4789  ;;  %3993 = vst.msk [vmem:[%s7153_s29 + $0xb8] sm:$0xff] %vm436_vm3, %v3961_v10  ;;  %v3959_v41 = vmul.f32 %v4788_v51, %v7223_v12 }
 0x353   : > { %v4792_v8 = vpop.eup %4791  ;;  %4803 = vrcp.f32 %v3867_v37  ;;  %v3872_v50 = vadd.f32 1.0, %v4790_v48 }
 0x354   : > { %v4794_v7 = vpop.eup %4793  ;;  %3991 = vst.msk [vmem:[%s7153_s29 + $0xa8] sm:$0xff] %vm436_vm3, %v3959_v41  ;;  %v3870_v54 = vadd.f32 1.0, %v4792_v8 }
 0x355   : > { %v4796_v17 = vpop.eup %4795  ;;  %v3964_v61 = vmul.f32 %v4794_v7, %v7242_v14  ;;  %4805 = vrcp.f32 %v3872_v50 }
 0x356   : > { %v4798_v33 = vpop.eup %4797  ;;  %4807 = vrcp.f32 %v3870_v54  ;;  %v3873_v62 = vadd.f32 1.0, %v4796_v17 }
 0x357   : > { %v4800_v0 = vpop.eup %4799  ;;  %3996 = vst.msk [vmem:[%s7153_s29 + $0xd0] sm:$0xff] %vm436_vm3, %v3964_v61  ;;  %v3871_v12 = vadd.f32 1.0, %v4798_v33 }
 0x358   : > { %v3962_v32 = vmul.f32 %v4800_v0, %v7253_v29  ;;  %4809 = vrcp.f32 %v3873_v62 }
 0x359   : > { %4811 = vrcp.f32 %v3871_v12 }
 0x35a   : > { %v4802_v42 = vpop.eup %4801  ;;  %3994 = vst.msk [vmem:[%s7153_s29 + $0xc0] sm:$0xff] %vm436_vm3, %v3962_v32 }
 0x35b   : > { %v3965_v14 = vmul.f32 %v4802_v42, %v7258_v31 }
 0x35d   : > { %v4804_v52 = vpop.eup %4803  ;;  %3997 = vst.msk [vmem:[%s7153_s29 + $0xd8] sm:$0xff] %vm436_vm3, %v3965_v14 }
 0x35e   : > { %v3963_v58 = vmul.f32 %v4804_v52, %v7263_v43 }
 0x35f   : > { %v4806_v23 = vpop.eup %4805 }
 0x360   : > { %v4808_v49 = vpop.eup %4807  ;;  %3995 = vst.msk [vmem:[%s7153_s29 + $0xc8] sm:$0xff] %vm436_vm3, %v3963_v58  ;;  %v3968_v29 = vmul.f32 %v4806_v23, %v7278_v34 }
 0x361   : > { %v3966_v19 = vmul.f32 %v4808_v49, %v7288_v44 }
 0x362   : > { %v4810_v28 = vpop.eup %4809  ;;  %4000 = vst.msk [vmem:[%s7153_s29 + $0xf0] sm:$0xff] %vm436_vm3, %v3968_v29 }
 0x363   : > { %v4812_v6 = vpop.eup %4811  ;;  %3998 = vst.msk [vmem:[%s7153_s29 + $0xe0] sm:$0xff] %vm436_vm3, %v3966_v19  ;;  %v3969_v31 = vmul.f32 %v4810_v28, %v7291_v57 }
 0x364   : > { %v3967_v20 = vmul.f32 %v4812_v6, %v7301_v63 }
 0x365   : > { %4001 = vst.msk [vmem:[%s7153_s29 + $0xf8] sm:$0xff] %vm436_vm3, %v3969_v31 }
 0x366   : > { %3999 = vst.msk [vmem:[%s7153_s29 + $0xe8] sm:$0xff] %vm436_vm3, %v3967_v20 }
 0x367 PF: > { %s17_s24 = sadd.s32 1, %s4823_s24  }
 0x368   : > { %p14_p4 = scmp.ge.s32.totalorder %s17_s24, 4  }
 0x36a   :  { %16 = sbr.rel (!%p14_p4) target bundleno = 1 (0x1), region = 86 }

</bundles_post_ra>
